<compile_context>
chip_gen: v7x
topology: tpu7x:2x2x1
jax: 0.10.0
libtpu: 0.0.40
codegen_flags: <defaults>
</compile_context>

<pallas_src>
import functools
import math

import jax
import jax.numpy as jnp
from jax import lax
from jax.experimental import pallas as pl
from jax.experimental.pallas import tpu as pltpu

EPS = 1e-5
DIM_SCALE = 4
NUM_CHUNKS = DIM_SCALE * DIM_SCALE  # 16


def _pick_h_tile(h, w, c, out_bytes=4, budget=2 * 1024 * 1024, max_th=16):
    """Rows of H per grid step, so one (1, 4*th, W, 4C) output block is ~<= budget."""
    per_h_bytes = NUM_CHUNKS * w * c * out_bytes
    th = max(1, min(h, max_th, budget // max(per_h_bytes, 1)))
    if th >= h:
        return h                      # full-H block: always layout-legal
    # Keep the input block's sublane extent (th*W) a multiple of 8.
    m = 8 // math.gcd(w, 8)
    th = max(m, (th // m) * m)
    return min(th, h)


def _expand_norm_rearrange_kernel(x_ref, w_ref, g_ref, b_ref, o_ref, *, c, th, wcols):
    # x_ref: (1, th*W, C)            w_ref: (4, C, 4C) bf16, resident in VMEM
    # g_ref/b_ref: (1, 4C) f32       o_ref: (1, 4*th, W, 4C)  == final layout slab
    x = x_ref[0].astype(jnp.bfloat16)          # cast once: MXU bf16 fast path
    gamma = g_ref[...]                         # hoisted, pre-tiled to 4C width
    beta = b_ref[...]
    inv_c = 1.0 / c

    for p1 in range(DIM_SCALE):
        wmat = w_ref[p1]                                          # (C, 4C) full-tile load
        y = jnp.dot(x, wmat, preferred_element_type=jnp.float32)  # (th*W, 4C) f32 accum
        chunks = []
        for p2 in range(DIM_SCALE):
            chunk = y[:, p2 * c:(p2 + 1) * c]                     # (th*W, C)
            s1 = jnp.sum(chunk, axis=-1, keepdims=True)
            s2 = jnp.sum(chunk * chunk, axis=-1, keepdims=True)
            mean = s1 * inv_c
            var = s2 * inv_c - mean * mean                        # one-pass mean/variance
            chunks.append((chunk - mean) * lax.rsqrt(var + EPS))
        # Single affine over the lane-dense (th*W, 4C) group (gamma/beta pre-tiled).
        grp = (jnp.concatenate(chunks, axis=-1) * gamma + beta).astype(o_ref.dtype)
        for hh in range(th):
            # Block-local output row 4*hh + p1 <-> final spatial row 4*(h0+hh) + p1;
            # each store is a dense (W, 4C) slab (lane-dense when C % 32 == 0).
            o_ref[0, DIM_SCALE * hh + p1, :, :] = grp[hh * wcols:(hh + 1) * wcols, :]


def prepare_expand_params(expand_weight, gamma, beta):
    """One-time (init-time) packing of nn.Linear(dim, 16*dim, bias=False).weight
    (shape (16*C, C)) and LayerNorm(dim) params.  Avoids re-materializing
    expand_weight.T in HBM on every forward call and keeps the weight VMEM-resident."""
    out_c, c = expand_weight.shape
    assert out_c == NUM_CHUNKS * c
    # w_packed[p1][k, p2*C + cc] == expand_weight.T[k, (4*p1 + p2)*C + cc]
    w_packed = (expand_weight.T.reshape(c, DIM_SCALE, DIM_SCALE * c)
                .transpose(1, 0, 2)
                .astype(jnp.bfloat16))                            # (4, C, 4C) bf16
    gamma4 = jnp.tile(gamma.reshape(1, c).astype(jnp.float32), (1, DIM_SCALE))  # (1, 4C)
    beta4 = jnp.tile(beta.reshape(1, c).astype(jnp.float32), (1, DIM_SCALE))    # (1, 4C)
    return w_packed, gamma4, beta4


def final_patch_expand_x4(x, w_packed, gamma4, beta4, input_resolution, *, out_dtype=None):
    """
    x:        (B, H*W, C)                       -- C == dim
    w_packed: (4, C, 4C) bf16                   -- from prepare_expand_params
    gamma4:   (1, 4C) f32, beta4: (1, 4C) f32   -- tiled LayerNorm(dim) params
    returns:  (B, 16*H*W, C)                    -- already rearranged, LayerNorm applied
    """
    H, W = input_resolution
    B, L, C = x.shape
    assert L == H * W, "input feature has wrong size"
    assert w_packed.shape == (DIM_SCALE, C, DIM_SCALE * C)
    out_dtype = x.dtype if out_dtype is None else out_dtype

    th = _pick_h_tile(H, W, C, out_bytes=jnp.dtype(out_dtype).itemsize)
    grid = (B, pl.cdiv(H, th))

    kernel = functools.partial(_expand_norm_rearrange_kernel, c=C, th=th, wcols=W)

    # Output declared as (B, 4H, W, 4C): this layout is row-major identical to the final
    # rearranged (B, 16*H*W, C) tensor, so the wrapper reshape below is free (metadata).
    out4 = pl.pallas_call(
        kernel,
        out_shape=jax.ShapeDtypeStruct((B, DIM_SCALE * H, W, DIM_SCALE * C), out_dtype),
        grid_spec=pltpu.PrefetchScalarGridSpec(
            num_scalar_prefetch=0,
            grid=grid,
            in_specs=[
                pl.BlockSpec((1, th * W, C), lambda b, t: (b, t, 0)),
                # Constant block index -> weight fetched once, stays resident in VMEM.
                pl.BlockSpec((DIM_SCALE, C, DIM_SCALE * C), lambda b, t: (0, 0, 0)),
                pl.BlockSpec((1, DIM_SCALE * C), lambda b, t: (0, 0)),
                pl.BlockSpec((1, DIM_SCALE * C), lambda b, t: (0, 0)),
            ],
            out_specs=pl.BlockSpec((1, DIM_SCALE * th, W, DIM_SCALE * C),
                                   lambda b, t: (b, t, 0, 0)),
        ),
        compiler_params=pltpu.CompilerParams(
            # Independent output blocks per grid step -> both axes parallel
            # (lets megacore / v7x's two TensorCores shard the grid).
            dimension_semantics=("parallel", "parallel")),
    )(x, w_packed, gamma4, beta4)

    return out4.reshape(B, DIM_SCALE * H * DIM_SCALE * W, C)


if __name__ == "__main__":
    # Small shapes consistent with the module: dim=32, input_resolution=(8, 8), batch=2.
    B = 2
    H, W = 8, 8
    DIM = 32

    key = jax.random.PRNGKey(0)
    kx, kw, kg, kb = jax.random.split(key, 4)

    x = jax.random.normal(kx, (B, H * W, DIM), dtype=jnp.float32)
    # nn.Linear(dim, 16*dim, bias=False).weight has shape (16*dim, dim)
    expand_weight = (jax.random.normal(kw, (16 * DIM, DIM), dtype=jnp.float32)
                     * (1.0 / jnp.sqrt(DIM)))
    gamma = 1.0 + 0.1 * jax.random.normal(kg, (DIM,), dtype=jnp.float32)
    beta = 0.1 * jax.random.normal(kb, (DIM,), dtype=jnp.float32)

    # One-time parameter packing (would live at module-init time in a real model).
    w_packed, g4, b4 = prepare_expand_params(expand_weight, gamma, beta)

    out = final_patch_expand_x4(x, w_packed, g4, b4, (H, W))
    out = jax.block_until_ready(out)
    assert out.shape == (B, 16 * H * W, DIM), out.shape

    def _rearrange_and_norm(y_lin):
        y = y_lin.reshape(B, H, W, DIM_SCALE, DIM_SCALE, DIM)
        y = jnp.transpose(y, (0, 1, 3, 2, 4, 5)).reshape(B, -1, DIM)
        mean = jnp.mean(y, axis=-1, keepdims=True)
        var = jnp.mean((y - mean) ** 2, axis=-1, keepdims=True)
        return (y - mean) * lax.rsqrt(var + EPS) * gamma + beta

    # Tight check against a reference using the same bf16 matmul (f32 accumulation)
    # -> catches any tiling / chunk-mapping / rearrange / LayerNorm bug precisely.
    y_bf16 = jnp.dot(x.astype(jnp.bfloat16),
                     expand_weight.T.astype(jnp.bfloat16),
                     preferred_element_type=jnp.float32)
    ref_bf16 = _rearrange_and_norm(y_bf16)
    err_tight = jnp.max(jnp.abs(out - ref_bf16))
    assert err_tight < 1e-3, f"bf16-path max abs err {err_tight}"

    # Sanity check against the pure-f32 PyTorch-equivalent reference (tolerance loosened
    # for the bf16 MXU operands; LayerNorm renormalizes most of the difference).
    ref_f32 = _rearrange_and_norm(jnp.dot(x, expand_weight.T))
    err_f32 = jnp.max(jnp.abs(out - ref_f32))
    assert err_f32 < 3e-2, f"f32-ref max abs err {err_f32}"

    print("KERNEL_OK")
</pallas_src>

<mosaic_0001>
module attributes {stable_mosaic.version = 11 : i64} {
  func.func @_expand_norm_rearrange_kernel(%arg0: i32, %arg1: i32, %arg2: memref<1x64x32xf32, #tpu.memory_space<vmem>>, %arg3: memref<4x32x128xbf16, #tpu.memory_space<vmem>>, %arg4: memref<1x128xf32, #tpu.memory_space<vmem>>, %arg5: memref<1x128xf32, #tpu.memory_space<vmem>>, %arg6: memref<1x32x8x128xf32, #tpu.memory_space<vmem>>) attributes {dimension_semantics = [#tpu.dimension_semantics<parallel>, #tpu.dimension_semantics<parallel>], iteration_bounds = array<i64: 2, 1>, scalar_prefetch = 0 : i64, scratch_operands = 0 : i64, tpu.core_type = #tpu.core_type<tc>, window_params = [{transform_indices = @transform_0, window_bounds = array<i64: 1, 64, 32>}, {pipeline_mode = #tpu.pipeline_mode<synchronous>, transform_indices = @transform_1, window_bounds = array<i64: 4, 32, 128>}, {pipeline_mode = #tpu.pipeline_mode<synchronous>, transform_indices = @transform_2, window_bounds = array<i64: 1, 128>}, {pipeline_mode = #tpu.pipeline_mode<synchronous>, transform_indices = @transform_3, window_bounds = array<i64: 1, 128>}, {transform_indices = @transform_4, window_bounds = array<i64: 1, 32, 8, 128>}]} {
    %c0 = arith.constant 0 : index
    %c0_0 = arith.constant 0 : index
    %c0_1 = arith.constant 0 : index
    %0 = vector.load %arg2[%c0, %c0_0, %c0_1] : memref<1x64x32xf32, #tpu.memory_space<vmem>>, vector<1x64x32xf32>
    %1 = vector.shape_cast %0 : vector<1x64x32xf32> to vector<64x32xf32>
    %2 = arith.truncf %1 : vector<64x32xf32> to vector<64x32xbf16>
    %c0_2 = arith.constant 0 : index
    %c0_3 = arith.constant 0 : index
    %3 = vector.load %arg4[%c0_2, %c0_3] : memref<1x128xf32, #tpu.memory_space<vmem>>, vector<1x128xf32>
    %c0_4 = arith.constant 0 : index
    %c0_5 = arith.constant 0 : index
    %4 = vector.load %arg5[%c0_4, %c0_5] : memref<1x128xf32, #tpu.memory_space<vmem>>, vector<1x128xf32>
    %c0_6 = arith.constant 0 : index
    %c0_7 = arith.constant 0 : index
    %c0_8 = arith.constant 0 : index
    %5 = vector.load %arg3[%c0_6, %c0_7, %c0_8] : memref<4x32x128xbf16, #tpu.memory_space<vmem>>, vector<1x32x128xbf16>
    %6 = vector.shape_cast %5 : vector<1x32x128xbf16> to vector<32x128xbf16>
    %cst = arith.constant dense<0.000000e+00> : vector<64x128xf32>
    %7 = tpu.matmul %2, %6, %cst {dimension_numbers = #tpu.dot_dimension_numbers<[1], [0], [0], [1], [0, 0, 1, 1], [], []>} : vector<64x32xbf16>, vector<32x128xbf16>, vector<64x128xf32> -> vector<64x128xf32>
    %8 = vector.extract_strided_slice %7 {offsets = [0, 0], sizes = [64, 32], strides = [1, 1]} : vector<64x128xf32> to vector<64x32xf32>
    %cst_9 = arith.constant dense<0.000000e+00> : vector<64xf32>
    %9 = vector.multi_reduction <add>, %8, %cst_9 [1] : vector<64x32xf32> to vector<64xf32>
    %10 = vector.shape_cast %9 : vector<64xf32> to vector<64x1xf32>
    %11 = arith.mulf %8, %8 : vector<64x32xf32>
    %cst_10 = arith.constant dense<0.000000e+00> : vector<64xf32>
    %12 = vector.multi_reduction <add>, %11, %cst_10 [1] : vector<64x32xf32> to vector<64xf32>
    %13 = vector.shape_cast %12 : vector<64xf32> to vector<64x1xf32>
    %cst_11 = arith.constant 3.125000e-02 : f32
    %14 = vector.broadcast %cst_11 : f32 to vector<64x1xf32>
    %15 = arith.mulf %10, %14 : vector<64x1xf32>
    %cst_12 = arith.constant 3.125000e-02 : f32
    %16 = vector.broadcast %cst_12 : f32 to vector<64x1xf32>
    %17 = arith.mulf %13, %16 : vector<64x1xf32>
    %18 = arith.mulf %15, %15 : vector<64x1xf32>
    %19 = arith.subf %17, %18 : vector<64x1xf32>
    %20 = vector.broadcast %15 : vector<64x1xf32> to vector<64x32xf32>
    %21 = arith.subf %8, %20 : vector<64x32xf32>
    %cst_13 = arith.constant 9.99999974E-6 : f32
    %22 = vector.broadcast %cst_13 : f32 to vector<64x1xf32>
    %23 = arith.addf %19, %22 : vector<64x1xf32>
    %24 = math.rsqrt %23 : vector<64x1xf32>
    %25 = vector.broadcast %24 : vector<64x1xf32> to vector<64x32xf32>
    %26 = arith.mulf %21, %25 : vector<64x32xf32>
    %27 = vector.extract_strided_slice %7 {offsets = [0, 32], sizes = [64, 32], strides = [1, 1]} : vector<64x128xf32> to vector<64x32xf32>
    %cst_14 = arith.constant dense<0.000000e+00> : vector<64xf32>
    %28 = vector.multi_reduction <add>, %27, %cst_14 [1] : vector<64x32xf32> to vector<64xf32>
    %29 = vector.shape_cast %28 : vector<64xf32> to vector<64x1xf32>
    %30 = arith.mulf %27, %27 : vector<64x32xf32>
    %cst_15 = arith.constant dense<0.000000e+00> : vector<64xf32>
    %31 = vector.multi_reduction <add>, %30, %cst_15 [1] : vector<64x32xf32> to vector<64xf32>
    %32 = vector.shape_cast %31 : vector<64xf32> to vector<64x1xf32>
    %cst_16 = arith.constant 3.125000e-02 : f32
    %33 = vector.broadcast %cst_16 : f32 to vector<64x1xf32>
    %34 = arith.mulf %29, %33 : vector<64x1xf32>
    %cst_17 = arith.constant 3.125000e-02 : f32
    %35 = vector.broadcast %cst_17 : f32 to vector<64x1xf32>
    %36 = arith.mulf %32, %35 : vector<64x1xf32>
    %37 = arith.mulf %34, %34 : vector<64x1xf32>
    %38 = arith.subf %36, %37 : vector<64x1xf32>
    %39 = vector.broadcast %34 : vector<64x1xf32> to vector<64x32xf32>
    %40 = arith.subf %27, %39 : vector<64x32xf32>
    %cst_18 = arith.constant 9.99999974E-6 : f32
    %41 = vector.broadcast %cst_18 : f32 to vector<64x1xf32>
    %42 = arith.addf %38, %41 : vector<64x1xf32>
    %43 = math.rsqrt %42 : vector<64x1xf32>
    %44 = vector.broadcast %43 : vector<64x1xf32> to vector<64x32xf32>
    %45 = arith.mulf %40, %44 : vector<64x32xf32>
    %46 = vector.extract_strided_slice %7 {offsets = [0, 64], sizes = [64, 32], strides = [1, 1]} : vector<64x128xf32> to vector<64x32xf32>
    %cst_19 = arith.constant dense<0.000000e+00> : vector<64xf32>
    %47 = vector.multi_reduction <add>, %46, %cst_19 [1] : vector<64x32xf32> to vector<64xf32>
    %48 = vector.shape_cast %47 : vector<64xf32> to vector<64x1xf32>
    %49 = arith.mulf %46, %46 : vector<64x32xf32>
    %cst_20 = arith.constant dense<0.000000e+00> : vector<64xf32>
    %50 = vector.multi_reduction <add>, %49, %cst_20 [1] : vector<64x32xf32> to vector<64xf32>
    %51 = vector.shape_cast %50 : vector<64xf32> to vector<64x1xf32>
    %cst_21 = arith.constant 3.125000e-02 : f32
    %52 = vector.broadcast %cst_21 : f32 to vector<64x1xf32>
    %53 = arith.mulf %48, %52 : vector<64x1xf32>
    %cst_22 = arith.constant 3.125000e-02 : f32
    %54 = vector.broadcast %cst_22 : f32 to vector<64x1xf32>
    %55 = arith.mulf %51, %54 : vector<64x1xf32>
    %56 = arith.mulf %53, %53 : vector<64x1xf32>
    %57 = arith.subf %55, %56 : vector<64x1xf32>
    %58 = vector.broadcast %53 : vector<64x1xf32> to vector<64x32xf32>
    %59 = arith.subf %46, %58 : vector<64x32xf32>
    %cst_23 = arith.constant 9.99999974E-6 : f32
    %60 = vector.broadcast %cst_23 : f32 to vector<64x1xf32>
    %61 = arith.addf %57, %60 : vector<64x1xf32>
    %62 = math.rsqrt %61 : vector<64x1xf32>
    %63 = vector.broadcast %62 : vector<64x1xf32> to vector<64x32xf32>
    %64 = arith.mulf %59, %63 : vector<64x32xf32>
    %65 = vector.extract_strided_slice %7 {offsets = [0, 96], sizes = [64, 32], strides = [1, 1]} : vector<64x128xf32> to vector<64x32xf32>
    %cst_24 = arith.constant dense<0.000000e+00> : vector<64xf32>
    %66 = vector.multi_reduction <add>, %65, %cst_24 [1] : vector<64x32xf32> to vector<64xf32>
    %67 = vector.shape_cast %66 : vector<64xf32> to vector<64x1xf32>
    %68 = arith.mulf %65, %65 : vector<64x32xf32>
    %cst_25 = arith.constant dense<0.000000e+00> : vector<64xf32>
    %69 = vector.multi_reduction <add>, %68, %cst_25 [1] : vector<64x32xf32> to vector<64xf32>
    %70 = vector.shape_cast %69 : vector<64xf32> to vector<64x1xf32>
    %cst_26 = arith.constant 3.125000e-02 : f32
    %71 = vector.broadcast %cst_26 : f32 to vector<64x1xf32>
    %72 = arith.mulf %67, %71 : vector<64x1xf32>
    %cst_27 = arith.constant 3.125000e-02 : f32
    %73 = vector.broadcast %cst_27 : f32 to vector<64x1xf32>
    %74 = arith.mulf %70, %73 : vector<64x1xf32>
    %75 = arith.mulf %72, %72 : vector<64x1xf32>
    %76 = arith.subf %74, %75 : vector<64x1xf32>
    %77 = vector.broadcast %72 : vector<64x1xf32> to vector<64x32xf32>
    %78 = arith.subf %65, %77 : vector<64x32xf32>
    %cst_28 = arith.constant 9.99999974E-6 : f32
    %79 = vector.broadcast %cst_28 : f32 to vector<64x1xf32>
    %80 = arith.addf %76, %79 : vector<64x1xf32>
    %81 = math.rsqrt %80 : vector<64x1xf32>
    %82 = vector.broadcast %81 : vector<64x1xf32> to vector<64x32xf32>
    %83 = arith.mulf %78, %82 : vector<64x32xf32>
    %84 = tpu.concatenate %26, %45, %64, %83 in 1 : vector<64x32xf32>, vector<64x32xf32>, vector<64x32xf32>, vector<64x32xf32> -> vector<64x128xf32>
    %85 = vector.broadcast %3 : vector<1x128xf32> to vector<64x128xf32>
    %86 = arith.mulf %84, %85 : vector<64x128xf32>
    %87 = vector.broadcast %4 : vector<1x128xf32> to vector<64x128xf32>
    %88 = arith.addf %86, %87 : vector<64x128xf32>
    %89 = vector.extract_strided_slice %88 {offsets = [0, 0], sizes = [8, 128], strides = [1, 1]} : vector<64x128xf32> to vector<8x128xf32>
    %c0_29 = arith.constant 0 : index
    %c0_30 = arith.constant 0 : index
    %c0_31 = arith.constant 0 : index
    %c0_32 = arith.constant 0 : index
    %90 = vector.load %arg6[%c0_29, %c0_30, %c0_31, %c0_32] : memref<1x32x8x128xf32, #tpu.memory_space<vmem>>, vector<1x1x8x128xf32>
    %91 = vector.shape_cast %90 : vector<1x1x8x128xf32> to vector<8x128xf32>
    %92 = vector.shape_cast %89 : vector<8x128xf32> to vector<1x1x8x128xf32>
    tpu.vector_store %arg6[%c0_29, %c0_30, %c0_31, %c0_32], %92 {strides = array<i32>} : memref<1x32x8x128xf32, #tpu.memory_space<vmem>>, vector<1x1x8x128xf32>,
    %93 = vector.extract_strided_slice %88 {offsets = [8, 0], sizes = [8, 128], strides = [1, 1]} : vector<64x128xf32> to vector<8x128xf32>
    %c0_33 = arith.constant 0 : index
    %c4 = arith.constant 4 : index
    %c0_34 = arith.constant 0 : index
    %c0_35 = arith.constant 0 : index
    %94 = vector.load %arg6[%c0_33, %c4, %c0_34, %c0_35] : memref<1x32x8x128xf32, #tpu.memory_space<vmem>>, vector<1x1x8x128xf32>
    %95 = vector.shape_cast %94 : vector<1x1x8x128xf32> to vector<8x128xf32>
    %96 = vector.shape_cast %93 : vector<8x128xf32> to vector<1x1x8x128xf32>
    tpu.vector_store %arg6[%c0_33, %c4, %c0_34, %c0_35], %96 {strides = array<i32>} : memref<1x32x8x128xf32, #tpu.memory_space<vmem>>, vector<1x1x8x128xf32>,
    %97 = vector.extract_strided_slice %88 {offsets = [16, 0], sizes = [8, 128], strides = [1, 1]} : vector<64x128xf32> to vector<8x128xf32>
    %c0_36 = arith.constant 0 : index
    %c8 = arith.constant 8 : index
    %c0_37 = arith.constant 0 : index
    %c0_38 = arith.constant 0 : index
    %98 = vector.load %arg6[%c0_36, %c8, %c0_37, %c0_38] : memref<1x32x8x128xf32, #tpu.memory_space<vmem>>, vector<1x1x8x128xf32>
    %99 = vector.shape_cast %98 : vector<1x1x8x128xf32> to vector<8x128xf32>
    %100 = vector.shape_cast %97 : vector<8x128xf32> to vector<1x1x8x128xf32>
    tpu.vector_store %arg6[%c0_36, %c8, %c0_37, %c0_38], %100 {strides = array<i32>} : memref<1x32x8x128xf32, #tpu.memory_space<vmem>>, vector<1x1x8x128xf32>,
    %101 = vector.extract_strided_slice %88 {offsets = [24, 0], sizes = [8, 128], strides = [1, 1]} : vector<64x128xf32> to vector<8x128xf32>
    %c0_39 = arith.constant 0 : index
    %c12 = arith.constant 12 : index
    %c0_40 = arith.constant 0 : index
    %c0_41 = arith.constant 0 : index
    %102 = vector.load %arg6[%c0_39, %c12, %c0_40, %c0_41] : memref<1x32x8x128xf32, #tpu.memory_space<vmem>>, vector<1x1x8x128xf32>
    %103 = vector.shape_cast %102 : vector<1x1x8x128xf32> to vector<8x128xf32>
    %104 = vector.shape_cast %101 : vector<8x128xf32> to vector<1x1x8x128xf32>
    tpu.vector_store %arg6[%c0_39, %c12, %c0_40, %c0_41], %104 {strides = array<i32>} : memref<1x32x8x128xf32, #tpu.memory_space<vmem>>, vector<1x1x8x128xf32>,
    %105 = vector.extract_strided_slice %88 {offsets = [32, 0], sizes = [8, 128], strides = [1, 1]} : vector<64x128xf32> to vector<8x128xf32>
    %c0_42 = arith.constant 0 : index
    %c16 = arith.constant 16 : index
    %c0_43 = arith.constant 0 : index
    %c0_44 = arith.constant 0 : index
    %106 = vector.load %arg6[%c0_42, %c16, %c0_43, %c0_44] : memref<1x32x8x128xf32, #tpu.memory_space<vmem>>, vector<1x1x8x128xf32>
    %107 = vector.shape_cast %106 : vector<1x1x8x128xf32> to vector<8x128xf32>
    %108 = vector.shape_cast %105 : vector<8x128xf32> to vector<1x1x8x128xf32>
    tpu.vector_store %arg6[%c0_42, %c16, %c0_43, %c0_44], %108 {strides = array<i32>} : memref<1x32x8x128xf32, #tpu.memory_space<vmem>>, vector<1x1x8x128xf32>,
    %109 = vector.extract_strided_slice %88 {offsets = [40, 0], sizes = [8, 128], strides = [1, 1]} : vector<64x128xf32> to vector<8x128xf32>
    %c0_45 = arith.constant 0 : index
    %c20 = arith.constant 20 : index
    %c0_46 = arith.constant 0 : index
    %c0_47 = arith.constant 0 : index
    %110 = vector.load %arg6[%c0_45, %c20, %c0_46, %c0_47] : memref<1x32x8x128xf32, #tpu.memory_space<vmem>>, vector<1x1x8x128xf32>
    %111 = vector.shape_cast %110 : vector<1x1x8x128xf32> to vector<8x128xf32>
    %112 = vector.shape_cast %109 : vector<8x128xf32> to vector<1x1x8x128xf32>
    tpu.vector_store %arg6[%c0_45, %c20, %c0_46, %c0_47], %112 {strides = array<i32>} : memref<1x32x8x128xf32, #tpu.memory_space<vmem>>, vector<1x1x8x128xf32>,
    %113 = vector.extract_strided_slice %88 {offsets = [48, 0], sizes = [8, 128], strides = [1, 1]} : vector<64x128xf32> to vector<8x128xf32>
    %c0_48 = arith.constant 0 : index
    %c24 = arith.constant 24 : index
    %c0_49 = arith.constant 0 : index
    %c0_50 = arith.constant 0 : index
    %114 = vector.load %arg6[%c0_48, %c24, %c0_49, %c0_50] : memref<1x32x8x128xf32, #tpu.memory_space<vmem>>, vector<1x1x8x128xf32>
    %115 = vector.shape_cast %114 : vector<1x1x8x128xf32> to vector<8x128xf32>
    %116 = vector.shape_cast %113 : vector<8x128xf32> to vector<1x1x8x128xf32>
    tpu.vector_store %arg6[%c0_48, %c24, %c0_49, %c0_50], %116 {strides = array<i32>} : memref<1x32x8x128xf32, #tpu.memory_space<vmem>>, vector<1x1x8x128xf32>,
    %117 = vector.extract_strided_slice %88 {offsets = [56, 0], sizes = [8, 128], strides = [1, 1]} : vector<64x128xf32> to vector<8x128xf32>
    %c0_51 = arith.constant 0 : index
    %c28 = arith.constant 28 : index
    %c0_52 = arith.constant 0 : index
    %c0_53 = arith.constant 0 : index
    %118 = vector.load %arg6[%c0_51, %c28, %c0_52, %c0_53] : memref<1x32x8x128xf32, #tpu.memory_space<vmem>>, vector<1x1x8x128xf32>
    %119 = vector.shape_cast %118 : vector<1x1x8x128xf32> to vector<8x128xf32>
    %120 = vector.shape_cast %117 : vector<8x128xf32> to vector<1x1x8x128xf32>
    tpu.vector_store %arg6[%c0_51, %c28, %c0_52, %c0_53], %120 {strides = array<i32>} : memref<1x32x8x128xf32, #tpu.memory_space<vmem>>, vector<1x1x8x128xf32>,
    %c1 = arith.constant 1 : index
    %c0_54 = arith.constant 0 : index
    %c0_55 = arith.constant 0 : index
    %121 = vector.load %arg3[%c1, %c0_54, %c0_55] : memref<4x32x128xbf16, #tpu.memory_space<vmem>>, vector<1x32x128xbf16>
    %122 = vector.shape_cast %121 : vector<1x32x128xbf16> to vector<32x128xbf16>
    %cst_56 = arith.constant dense<0.000000e+00> : vector<64x128xf32>
    %123 = tpu.matmul %2, %122, %cst_56 {dimension_numbers = #tpu.dot_dimension_numbers<[1], [0], [0], [1], [0, 0, 1, 1], [], []>} : vector<64x32xbf16>, vector<32x128xbf16>, vector<64x128xf32> -> vector<64x128xf32>
    %124 = vector.extract_strided_slice %123 {offsets = [0, 0], sizes = [64, 32], strides = [1, 1]} : vector<64x128xf32> to vector<64x32xf32>
    %cst_57 = arith.constant dense<0.000000e+00> : vector<64xf32>
    %125 = vector.multi_reduction <add>, %124, %cst_57 [1] : vector<64x32xf32> to vector<64xf32>
    %126 = vector.shape_cast %125 : vector<64xf32> to vector<64x1xf32>
    %127 = arith.mulf %124, %124 : vector<64x32xf32>
    %cst_58 = arith.constant dense<0.000000e+00> : vector<64xf32>
    %128 = vector.multi_reduction <add>, %127, %cst_58 [1] : vector<64x32xf32> to vector<64xf32>
    %129 = vector.shape_cast %128 : vector<64xf32> to vector<64x1xf32>
    %cst_59 = arith.constant 3.125000e-02 : f32
    %130 = vector.broadcast %cst_59 : f32 to vector<64x1xf32>
    %131 = arith.mulf %126, %130 : vector<64x1xf32>
    %cst_60 = arith.constant 3.125000e-02 : f32
    %132 = vector.broadcast %cst_60 : f32 to vector<64x1xf32>
    %133 = arith.mulf %129, %132 : vector<64x1xf32>
    %134 = arith.mulf %131, %131 : vector<64x1xf32>
    %135 = arith.subf %133, %134 : vector<64x1xf32>
    %136 = vector.broadcast %131 : vector<64x1xf32> to vector<64x32xf32>
    %137 = arith.subf %124, %136 : vector<64x32xf32>
    %cst_61 = arith.constant 9.99999974E-6 : f32
    %138 = vector.broadcast %cst_61 : f32 to vector<64x1xf32>
    %139 = arith.addf %135, %138 : vector<64x1xf32>
    %140 = math.rsqrt %139 : vector<64x1xf32>
    %141 = vector.broadcast %140 : vector<64x1xf32> to vector<64x32xf32>
    %142 = arith.mulf %137, %141 : vector<64x32xf32>
    %143 = vector.extract_strided_slice %123 {offsets = [0, 32], sizes = [64, 32], strides = [1, 1]} : vector<64x128xf32> to vector<64x32xf32>
    %cst_62 = arith.constant dense<0.000000e+00> : vector<64xf32>
    %144 = vector.multi_reduction <add>, %143, %cst_62 [1] : vector<64x32xf32> to vector<64xf32>
    %145 = vector.shape_cast %144 : vector<64xf32> to vector<64x1xf32>
    %146 = arith.mulf %143, %143 : vector<64x32xf32>
    %cst_63 = arith.constant dense<0.000000e+00> : vector<64xf32>
    %147 = vector.multi_reduction <add>, %146, %cst_63 [1] : vector<64x32xf32> to vector<64xf32>
    %148 = vector.shape_cast %147 : vector<64xf32> to vector<64x1xf32>
    %cst_64 = arith.constant 3.125000e-02 : f32
    %149 = vector.broadcast %cst_64 : f32 to vector<64x1xf32>
    %150 = arith.mulf %145, %149 : vector<64x1xf32>
    %cst_65 = arith.constant 3.125000e-02 : f32
    %151 = vector.broadcast %cst_65 : f32 to vector<64x1xf32>
    %152 = arith.mulf %148, %151 : vector<64x1xf32>
    %153 = arith.mulf %150, %150 : vector<64x1xf32>
    %154 = arith.subf %152, %153 : vector<64x1xf32>
    %155 = vector.broadcast %150 : vector<64x1xf32> to vector<64x32xf32>
    %156 = arith.subf %143, %155 : vector<64x32xf32>
    %cst_66 = arith.constant 9.99999974E-6 : f32
    %157 = vector.broadcast %cst_66 : f32 to vector<64x1xf32>
    %158 = arith.addf %154, %157 : vector<64x1xf32>
    %159 = math.rsqrt %158 : vector<64x1xf32>
    %160 = vector.broadcast %159 : vector<64x1xf32> to vector<64x32xf32>
    %161 = arith.mulf %156, %160 : vector<64x32xf32>
    %162 = vector.extract_strided_slice %123 {offsets = [0, 64], sizes = [64, 32], strides = [1, 1]} : vector<64x128xf32> to vector<64x32xf32>
    %cst_67 = arith.constant dense<0.000000e+00> : vector<64xf32>
    %163 = vector.multi_reduction <add>, %162, %cst_67 [1] : vector<64x32xf32> to vector<64xf32>
    %164 = vector.shape_cast %163 : vector<64xf32> to vector<64x1xf32>
    %165 = arith.mulf %162, %162 : vector<64x32xf32>
    %cst_68 = arith.constant dense<0.000000e+00> : vector<64xf32>
    %166 = vector.multi_reduction <add>, %165, %cst_68 [1] : vector<64x32xf32> to vector<64xf32>
    %167 = vector.shape_cast %166 : vector<64xf32> to vector<64x1xf32>
    %cst_69 = arith.constant 3.125000e-02 : f32
    %168 = vector.broadcast %cst_69 : f32 to vector<64x1xf32>
    %169 = arith.mulf %164, %168 : vector<64x1xf32>
    %cst_70 = arith.constant 3.125000e-02 : f32
    %170 = vector.broadcast %cst_70 : f32 to vector<64x1xf32>
    %171 = arith.mulf %167, %170 : vector<64x1xf32>
    %172 = arith.mulf %169, %169 : vector<64x1xf32>
    %173 = arith.subf %171, %172 : vector<64x1xf32>
    %174 = vector.broadcast %169 : vector<64x1xf32> to vector<64x32xf32>
    %175 = arith.subf %162, %174 : vector<64x32xf32>
    %cst_71 = arith.constant 9.99999974E-6 : f32
    %176 = vector.broadcast %cst_71 : f32 to vector<64x1xf32>
    %177 = arith.addf %173, %176 : vector<64x1xf32>
    %178 = math.rsqrt %177 : vector<64x1xf32>
    %179 = vector.broadcast %178 : vector<64x1xf32> to vector<64x32xf32>
    %180 = arith.mulf %175, %179 : vector<64x32xf32>
    %181 = vector.extract_strided_slice %123 {offsets = [0, 96], sizes = [64, 32], strides = [1, 1]} : vector<64x128xf32> to vector<64x32xf32>
    %cst_72 = arith.constant dense<0.000000e+00> : vector<64xf32>
    %182 = vector.multi_reduction <add>, %181, %cst_72 [1] : vector<64x32xf32> to vector<64xf32>
    %183 = vector.shape_cast %182 : vector<64xf32> to vector<64x1xf32>
    %184 = arith.mulf %181, %181 : vector<64x32xf32>
    %cst_73 = arith.constant dense<0.000000e+00> : vector<64xf32>
    %185 = vector.multi_reduction <add>, %184, %cst_73 [1] : vector<64x32xf32> to vector<64xf32>
    %186 = vector.shape_cast %185 : vector<64xf32> to vector<64x1xf32>
    %cst_74 = arith.constant 3.125000e-02 : f32
    %187 = vector.broadcast %cst_74 : f32 to vector<64x1xf32>
    %188 = arith.mulf %183, %187 : vector<64x1xf32>
    %cst_75 = arith.constant 3.125000e-02 : f32
    %189 = vector.broadcast %cst_75 : f32 to vector<64x1xf32>
    %190 = arith.mulf %186, %189 : vector<64x1xf32>
    %191 = arith.mulf %188, %188 : vector<64x1xf32>
    %192 = arith.subf %190, %191 : vector<64x1xf32>
    %193 = vector.broadcast %188 : vector<64x1xf32> to vector<64x32xf32>
    %194 = arith.subf %181, %193 : vector<64x32xf32>
    %cst_76 = arith.constant 9.99999974E-6 : f32
    %195 = vector.broadcast %cst_76 : f32 to vector<64x1xf32>
    %196 = arith.addf %192, %195 : vector<64x1xf32>
    %197 = math.rsqrt %196 : vector<64x1xf32>
    %198 = vector.broadcast %197 : vector<64x1xf32> to vector<64x32xf32>
    %199 = arith.mulf %194, %198 : vector<64x32xf32>
    %200 = tpu.concatenate %142, %161, %180, %199 in 1 : vector<64x32xf32>, vector<64x32xf32>, vector<64x32xf32>, vector<64x32xf32> -> vector<64x128xf32>
    %201 = vector.broadcast %3 : vector<1x128xf32> to vector<64x128xf32>
    %202 = arith.mulf %200, %201 : vector<64x128xf32>
    %203 = vector.broadcast %4 : vector<1x128xf32> to vector<64x128xf32>
    %204 = arith.addf %202, %203 : vector<64x128xf32>
    %205 = vector.extract_strided_slice %204 {offsets = [0, 0], sizes = [8, 128], strides = [1, 1]} : vector<64x128xf32> to vector<8x128xf32>
    %c0_77 = arith.constant 0 : index
    %c1_78 = arith.constant 1 : index
    %c0_79 = arith.constant 0 : index
    %c0_80 = arith.constant 0 : index
    %206 = vector.load %arg6[%c0_77, %c1_78, %c0_79, %c0_80] : memref<1x32x8x128xf32, #tpu.memory_space<vmem>>, vector<1x1x8x128xf32>
    %207 = vector.shape_cast %206 : vector<1x1x8x128xf32> to vector<8x128xf32>
    %208 = vector.shape_cast %205 : vector<8x128xf32> to vector<1x1x8x128xf32>
    tpu.vector_store %arg6[%c0_77, %c1_78, %c0_79, %c0_80], %208 {strides = array<i32>} : memref<1x32x8x128xf32, #tpu.memory_space<vmem>>, vector<1x1x8x128xf32>,
    %209 = vector.extract_strided_slice %204 {offsets = [8, 0], sizes = [8, 128], strides = [1, 1]} : vector<64x128xf32> to vector<8x128xf32>
    %c0_81 = arith.constant 0 : index
    %c5 = arith.constant 5 : index
    %c0_82 = arith.constant 0 : index
    %c0_83 = arith.constant 0 : index
    %210 = vector.load %arg6[%c0_81, %c5, %c0_82, %c0_83] : memref<1x32x8x128xf32, #tpu.memory_space<vmem>>, vector<1x1x8x128xf32>
    %211 = vector.shape_cast %210 : vector<1x1x8x128xf32> to vector<8x128xf32>
    %212 = vector.shape_cast %209 : vector<8x128xf32> to vector<1x1x8x128xf32>
    tpu.vector_store %arg6[%c0_81, %c5, %c0_82, %c0_83], %212 {strides = array<i32>} : memref<1x32x8x128xf32, #tpu.memory_space<vmem>>, vector<1x1x8x128xf32>,
    %213 = vector.extract_strided_slice %204 {offsets = [16, 0], sizes = [8, 128], strides = [1, 1]} : vector<64x128xf32> to vector<8x128xf32>
    %c0_84 = arith.constant 0 : index
    %c9 = arith.constant 9 : index
    %c0_85 = arith.constant 0 : index
    %c0_86 = arith.constant 0 : index
    %214 = vector.load %arg6[%c0_84, %c9, %c0_85, %c0_86] : memref<1x32x8x128xf32, #tpu.memory_space<vmem>>, vector<1x1x8x128xf32>
    %215 = vector.shape_cast %214 : vector<1x1x8x128xf32> to vector<8x128xf32>
    %216 = vector.shape_cast %213 : vector<8x128xf32> to vector<1x1x8x128xf32>
    tpu.vector_store %arg6[%c0_84, %c9, %c0_85, %c0_86], %216 {strides = array<i32>} : memref<1x32x8x128xf32, #tpu.memory_space<vmem>>, vector<1x1x8x128xf32>,
    %217 = vector.extract_strided_slice %204 {offsets = [24, 0], sizes = [8, 128], strides = [1, 1]} : vector<64x128xf32> to vector<8x128xf32>
    %c0_87 = arith.constant 0 : index
    %c13 = arith.constant 13 : index
    %c0_88 = arith.constant 0 : index
    %c0_89 = arith.constant 0 : index
    %218 = vector.load %arg6[%c0_87, %c13, %c0_88, %c0_89] : memref<1x32x8x128xf32, #tpu.memory_space<vmem>>, vector<1x1x8x128xf32>
    %219 = vector.shape_cast %218 : vector<1x1x8x128xf32> to vector<8x128xf32>
    %220 = vector.shape_cast %217 : vector<8x128xf32> to vector<1x1x8x128xf32>
    tpu.vector_store %arg6[%c0_87, %c13, %c0_88, %c0_89], %220 {strides = array<i32>} : memref<1x32x8x128xf32, #tpu.memory_space<vmem>>, vector<1x1x8x128xf32>,
    %221 = vector.extract_strided_slice %204 {offsets = [32, 0], sizes = [8, 128], strides = [1, 1]} : vector<64x128xf32> to vector<8x128xf32>
    %c0_90 = arith.constant 0 : index
    %c17 = arith.constant 17 : index
    %c0_91 = arith.constant 0 : index
    %c0_92 = arith.constant 0 : index
    %222 = vector.load %arg6[%c0_90, %c17, %c0_91, %c0_92] : memref<1x32x8x128xf32, #tpu.memory_space<vmem>>, vector<1x1x8x128xf32>
    %223 = vector.shape_cast %222 : vector<1x1x8x128xf32> to vector<8x128xf32>
    %224 = vector.shape_cast %221 : vector<8x128xf32> to vector<1x1x8x128xf32>
    tpu.vector_store %arg6[%c0_90, %c17, %c0_91, %c0_92], %224 {strides = array<i32>} : memref<1x32x8x128xf32, #tpu.memory_space<vmem>>, vector<1x1x8x128xf32>,
    %225 = vector.extract_strided_slice %204 {offsets = [40, 0], sizes = [8, 128], strides = [1, 1]} : vector<64x128xf32> to vector<8x128xf32>
    %c0_93 = arith.constant 0 : index
    %c21 = arith.constant 21 : index
    %c0_94 = arith.constant 0 : index
    %c0_95 = arith.constant 0 : index
    %226 = vector.load %arg6[%c0_93, %c21, %c0_94, %c0_95] : memref<1x32x8x128xf32, #tpu.memory_space<vmem>>, vector<1x1x8x128xf32>
    %227 = vector.shape_cast %226 : vector<1x1x8x128xf32> to vector<8x128xf32>
    %228 = vector.shape_cast %225 : vector<8x128xf32> to vector<1x1x8x128xf32>
    tpu.vector_store %arg6[%c0_93, %c21, %c0_94, %c0_95], %228 {strides = array<i32>} : memref<1x32x8x128xf32, #tpu.memory_space<vmem>>, vector<1x1x8x128xf32>,
    %229 = vector.extract_strided_slice %204 {offsets = [48, 0], sizes = [8, 128], strides = [1, 1]} : vector<64x128xf32> to vector<8x128xf32>
    %c0_96 = arith.constant 0 : index
    %c25 = arith.constant 25 : index
    %c0_97 = arith.constant 0 : index
    %c0_98 = arith.constant 0 : index
    %230 = vector.load %arg6[%c0_96, %c25, %c0_97, %c0_98] : memref<1x32x8x128xf32, #tpu.memory_space<vmem>>, vector<1x1x8x128xf32>
    %231 = vector.shape_cast %230 : vector<1x1x8x128xf32> to vector<8x128xf32>
    %232 = vector.shape_cast %229 : vector<8x128xf32> to vector<1x1x8x128xf32>
    tpu.vector_store %arg6[%c0_96, %c25, %c0_97, %c0_98], %232 {strides = array<i32>} : memref<1x32x8x128xf32, #tpu.memory_space<vmem>>, vector<1x1x8x128xf32>,
    %233 = vector.extract_strided_slice %204 {offsets = [56, 0], sizes = [8, 128], strides = [1, 1]} : vector<64x128xf32> to vector<8x128xf32>
    %c0_99 = arith.constant 0 : index
    %c29 = arith.constant 29 : index
    %c0_100 = arith.constant 0 : index
    %c0_101 = arith.constant 0 : index
    %234 = vector.load %arg6[%c0_99, %c29, %c0_100, %c0_101] : memref<1x32x8x128xf32, #tpu.memory_space<vmem>>, vector<1x1x8x128xf32>
    %235 = vector.shape_cast %234 : vector<1x1x8x128xf32> to vector<8x128xf32>
    %236 = vector.shape_cast %233 : vector<8x128xf32> to vector<1x1x8x128xf32>
    tpu.vector_store %arg6[%c0_99, %c29, %c0_100, %c0_101], %236 {strides = array<i32>} : memref<1x32x8x128xf32, #tpu.memory_space<vmem>>, vector<1x1x8x128xf32>,
    %c2 = arith.constant 2 : index
    %c0_102 = arith.constant 0 : index
    %c0_103 = arith.constant 0 : index
    %237 = vector.load %arg3[%c2, %c0_102, %c0_103] : memref<4x32x128xbf16, #tpu.memory_space<vmem>>, vector<1x32x128xbf16>
    %238 = vector.shape_cast %237 : vector<1x32x128xbf16> to vector<32x128xbf16>
    %cst_104 = arith.constant dense<0.000000e+00> : vector<64x128xf32>
    %239 = tpu.matmul %2, %238, %cst_104 {dimension_numbers = #tpu.dot_dimension_numbers<[1], [0], [0], [1], [0, 0, 1, 1], [], []>} : vector<64x32xbf16>, vector<32x128xbf16>, vector<64x128xf32> -> vector<64x128xf32>
    %240 = vector.extract_strided_slice %239 {offsets = [0, 0], sizes = [64, 32], strides = [1, 1]} : vector<64x128xf32> to vector<64x32xf32>
    %cst_105 = arith.constant dense<0.000000e+00> : vector<64xf32>
    %241 = vector.multi_reduction <add>, %240, %cst_105 [1] : vector<64x32xf32> to vector<64xf32>
    %242 = vector.shape_cast %241 : vector<64xf32> to vector<64x1xf32>
    %243 = arith.mulf %240, %240 : vector<64x32xf32>
    %cst_106 = arith.constant dense<0.000000e+00> : vector<64xf32>
    %244 = vector.multi_reduction <add>, %243, %cst_106 [1] : vector<64x32xf32> to vector<64xf32>
    %245 = vector.shape_cast %244 : vector<64xf32> to vector<64x1xf32>
    %cst_107 = arith.constant 3.125000e-02 : f32
    %246 = vector.broadcast %cst_107 : f32 to vector<64x1xf32>
    %247 = arith.mulf %242, %246 : vector<64x1xf32>
    %cst_108 = arith.constant 3.125000e-02 : f32
    %248 = vector.broadcast %cst_108 : f32 to vector<64x1xf32>
    %249 = arith.mulf %245, %248 : vector<64x1xf32>
    %250 = arith.mulf %247, %247 : vector<64x1xf32>
    %251 = arith.subf %249, %250 : vector<64x1xf32>
    %252 = vector.broadcast %247 : vector<64x1xf32> to vector<64x32xf32>
    %253 = arith.subf %240, %252 : vector<64x32xf32>
    %cst_109 = arith.constant 9.99999974E-6 : f32
    %254 = vector.broadcast %cst_109 : f32 to vector<64x1xf32>
    %255 = arith.addf %251, %254 : vector<64x1xf32>
    %256 = math.rsqrt %255 : vector<64x1xf32>
    %257 = vector.broadcast %256 : vector<64x1xf32> to vector<64x32xf32>
    %258 = arith.mulf %253, %257 : vector<64x32xf32>
    %259 = vector.extract_strided_slice %239 {offsets = [0, 32], sizes = [64, 32], strides = [1, 1]} : vector<64x128xf32> to vector<64x32xf32>
    %cst_110 = arith.constant dense<0.000000e+00> : vector<64xf32>
    %260 = vector.multi_reduction <add>, %259, %cst_110 [1] : vector<64x32xf32> to vector<64xf32>
    %261 = vector.shape_cast %260 : vector<64xf32> to vector<64x1xf32>
    %262 = arith.mulf %259, %259 : vector<64x32xf32>
    %cst_111 = arith.constant dense<0.000000e+00> : vector<64xf32>
    %263 = vector.multi_reduction <add>, %262, %cst_111 [1] : vector<64x32xf32> to vector<64xf32>
    %264 = vector.shape_cast %263 : vector<64xf32> to vector<64x1xf32>
    %cst_112 = arith.constant 3.125000e-02 : f32
    %265 = vector.broadcast %cst_112 : f32 to vector<64x1xf32>
    %266 = arith.mulf %261, %265 : vector<64x1xf32>
    %cst_113 = arith.constant 3.125000e-02 : f32
    %267 = vector.broadcast %cst_113 : f32 to vector<64x1xf32>
    %268 = arith.mulf %264, %267 : vector<64x1xf32>
    %269 = arith.mulf %266, %266 : vector<64x1xf32>
    %270 = arith.subf %268, %269 : vector<64x1xf32>
    %271 = vector.broadcast %266 : vector<64x1xf32> to vector<64x32xf32>
    %272 = arith.subf %259, %271 : vector<64x32xf32>
    %cst_114 = arith.constant 9.99999974E-6 : f32
    %273 = vector.broadcast %cst_114 : f32 to vector<64x1xf32>
    %274 = arith.addf %270, %273 : vector<64x1xf32>
    %275 = math.rsqrt %274 : vector<64x1xf32>
    %276 = vector.broadcast %275 : vector<64x1xf32> to vector<64x32xf32>
    %277 = arith.mulf %272, %276 : vector<64x32xf32>
    %278 = vector.extract_strided_slice %239 {offsets = [0, 64], sizes = [64, 32], strides = [1, 1]} : vector<64x128xf32> to vector<64x32xf32>
    %cst_115 = arith.constant dense<0.000000e+00> : vector<64xf32>
    %279 = vector.multi_reduction <add>, %278, %cst_115 [1] : vector<64x32xf32> to vector<64xf32>
    %280 = vector.shape_cast %279 : vector<64xf32> to vector<64x1xf32>
    %281 = arith.mulf %278, %278 : vector<64x32xf32>
    %cst_116 = arith.constant dense<0.000000e+00> : vector<64xf32>
    %282 = vector.multi_reduction <add>, %281, %cst_116 [1] : vector<64x32xf32> to vector<64xf32>
    %283 = vector.shape_cast %282 : vector<64xf32> to vector<64x1xf32>
    %cst_117 = arith.constant 3.125000e-02 : f32
    %284 = vector.broadcast %cst_117 : f32 to vector<64x1xf32>
    %285 = arith.mulf %280, %284 : vector<64x1xf32>
    %cst_118 = arith.constant 3.125000e-02 : f32
    %286 = vector.broadcast %cst_118 : f32 to vector<64x1xf32>
    %287 = arith.mulf %283, %286 : vector<64x1xf32>
    %288 = arith.mulf %285, %285 : vector<64x1xf32>
    %289 = arith.subf %287, %288 : vector<64x1xf32>
    %290 = vector.broadcast %285 : vector<64x1xf32> to vector<64x32xf32>
    %291 = arith.subf %278, %290 : vector<64x32xf32>
    %cst_119 = arith.constant 9.99999974E-6 : f32
    %292 = vector.broadcast %cst_119 : f32 to vector<64x1xf32>
    %293 = arith.addf %289, %292 : vector<64x1xf32>
    %294 = math.rsqrt %293 : vector<64x1xf32>
    %295 = vector.broadcast %294 : vector<64x1xf32> to vector<64x32xf32>
    %296 = arith.mulf %291, %295 : vector<64x32xf32>
    %297 = vector.extract_strided_slice %239 {offsets = [0, 96], sizes = [64, 32], strides = [1, 1]} : vector<64x128xf32> to vector<64x32xf32>
    %cst_120 = arith.constant dense<0.000000e+00> : vector<64xf32>
    %298 = vector.multi_reduction <add>, %297, %cst_120 [1] : vector<64x32xf32> to vector<64xf32>
    %299 = vector.shape_cast %298 : vector<64xf32> to vector<64x1xf32>
    %300 = arith.mulf %297, %297 : vector<64x32xf32>
    %cst_121 = arith.constant dense<0.000000e+00> : vector<64xf32>
    %301 = vector.multi_reduction <add>, %300, %cst_121 [1] : vector<64x32xf32> to vector<64xf32>
    %302 = vector.shape_cast %301 : vector<64xf32> to vector<64x1xf32>
    %cst_122 = arith.constant 3.125000e-02 : f32
    %303 = vector.broadcast %cst_122 : f32 to vector<64x1xf32>
    %304 = arith.mulf %299, %303 : vector<64x1xf32>
    %cst_123 = arith.constant 3.125000e-02 : f32
    %305 = vector.broadcast %cst_123 : f32 to vector<64x1xf32>
    %306 = arith.mulf %302, %305 : vector<64x1xf32>
    %307 = arith.mulf %304, %304 : vector<64x1xf32>
    %308 = arith.subf %306, %307 : vector<64x1xf32>
    %309 = vector.broadcast %304 : vector<64x1xf32> to vector<64x32xf32>
    %310 = arith.subf %297, %309 : vector<64x32xf32>
    %cst_124 = arith.constant 9.99999974E-6 : f32
    %311 = vector.broadcast %cst_124 : f32 to vector<64x1xf32>
    %312 = arith.addf %308, %311 : vector<64x1xf32>
    %313 = math.rsqrt %312 : vector<64x1xf32>
    %314 = vector.broadcast %313 : vector<64x1xf32> to vector<64x32xf32>
    %315 = arith.mulf %310, %314 : vector<64x32xf32>
    %316 = tpu.concatenate %258, %277, %296, %315 in 1 : vector<64x32xf32>, vector<64x32xf32>, vector<64x32xf32>, vector<64x32xf32> -> vector<64x128xf32>
    %317 = vector.broadcast %3 : vector<1x128xf32> to vector<64x128xf32>
    %318 = arith.mulf %316, %317 : vector<64x128xf32>
    %319 = vector.broadcast %4 : vector<1x128xf32> to vector<64x128xf32>
    %320 = arith.addf %318, %319 : vector<64x128xf32>
    %321 = vector.extract_strided_slice %320 {offsets = [0, 0], sizes = [8, 128], strides = [1, 1]} : vector<64x128xf32> to vector<8x128xf32>
    %c0_125 = arith.constant 0 : index
    %c2_126 = arith.constant 2 : index
    %c0_127 = arith.constant 0 : index
    %c0_128 = arith.constant 0 : index
    %322 = vector.load %arg6[%c0_125, %c2_126, %c0_127, %c0_128] : memref<1x32x8x128xf32, #tpu.memory_space<vmem>>, vector<1x1x8x128xf32>
    %323 = vector.shape_cast %322 : vector<1x1x8x128xf32> to vector<8x128xf32>
    %324 = vector.shape_cast %321 : vector<8x128xf32> to vector<1x1x8x128xf32>
    tpu.vector_store %arg6[%c0_125, %c2_126, %c0_127, %c0_128], %324 {strides = array<i32>} : memref<1x32x8x128xf32, #tpu.memory_space<vmem>>, vector<1x1x8x128xf32>,
    %325 = vector.extract_strided_slice %320 {offsets = [8, 0], sizes = [8, 128], strides = [1, 1]} : vector<64x128xf32> to vector<8x128xf32>
    %c0_129 = arith.constant 0 : index
    %c6 = arith.constant 6 : index
    %c0_130 = arith.constant 0 : index
    %c0_131 = arith.constant 0 : index
    %326 = vector.load %arg6[%c0_129, %c6, %c0_130, %c0_131] : memref<1x32x8x128xf32, #tpu.memory_space<vmem>>, vector<1x1x8x128xf32>
    %327 = vector.shape_cast %326 : vector<1x1x8x128xf32> to vector<8x128xf32>
    %328 = vector.shape_cast %325 : vector<8x128xf32> to vector<1x1x8x128xf32>
    tpu.vector_store %arg6[%c0_129, %c6, %c0_130, %c0_131], %328 {strides = array<i32>} : memref<1x32x8x128xf32, #tpu.memory_space<vmem>>, vector<1x1x8x128xf32>,
    %329 = vector.extract_strided_slice %320 {offsets = [16, 0], sizes = [8, 128], strides = [1, 1]} : vector<64x128xf32> to vector<8x128xf32>
    %c0_132 = arith.constant 0 : index
    %c10 = arith.constant 10 : index
    %c0_133 = arith.constant 0 : index
    %c0_134 = arith.constant 0 : index
    %330 = vector.load %arg6[%c0_132, %c10, %c0_133, %c0_134] : memref<1x32x8x128xf32, #tpu.memory_space<vmem>>, vector<1x1x8x128xf32>
    %331 = vector.shape_cast %330 : vector<1x1x8x128xf32> to vector<8x128xf32>
    %332 = vector.shape_cast %329 : vector<8x128xf32> to vector<1x1x8x128xf32>
    tpu.vector_store %arg6[%c0_132, %c10, %c0_133, %c0_134], %332 {strides = array<i32>} : memref<1x32x8x128xf32, #tpu.memory_space<vmem>>, vector<1x1x8x128xf32>,
    %333 = vector.extract_strided_slice %320 {offsets = [24, 0], sizes = [8, 128], strides = [1, 1]} : vector<64x128xf32> to vector<8x128xf32>
    %c0_135 = arith.constant 0 : index
    %c14 = arith.constant 14 : index
    %c0_136 = arith.constant 0 : index
    %c0_137 = arith.constant 0 : index
    %334 = vector.load %arg6[%c0_135, %c14, %c0_136, %c0_137] : memref<1x32x8x128xf32, #tpu.memory_space<vmem>>, vector<1x1x8x128xf32>
    %335 = vector.shape_cast %334 : vector<1x1x8x128xf32> to vector<8x128xf32>
    %336 = vector.shape_cast %333 : vector<8x128xf32> to vector<1x1x8x128xf32>
    tpu.vector_store %arg6[%c0_135, %c14, %c0_136, %c0_137], %336 {strides = array<i32>} : memref<1x32x8x128xf32, #tpu.memory_space<vmem>>, vector<1x1x8x128xf32>,
    %337 = vector.extract_strided_slice %320 {offsets = [32, 0], sizes = [8, 128], strides = [1, 1]} : vector<64x128xf32> to vector<8x128xf32>
    %c0_138 = arith.constant 0 : index
    %c18 = arith.constant 18 : index
    %c0_139 = arith.constant 0 : index
    %c0_140 = arith.constant 0 : index
    %338 = vector.load %arg6[%c0_138, %c18, %c0_139, %c0_140] : memref<1x32x8x128xf32, #tpu.memory_space<vmem>>, vector<1x1x8x128xf32>
    %339 = vector.shape_cast %338 : vector<1x1x8x128xf32> to vector<8x128xf32>
    %340 = vector.shape_cast %337 : vector<8x128xf32> to vector<1x1x8x128xf32>
    tpu.vector_store %arg6[%c0_138, %c18, %c0_139, %c0_140], %340 {strides = array<i32>} : memref<1x32x8x128xf32, #tpu.memory_space<vmem>>, vector<1x1x8x128xf32>,
    %341 = vector.extract_strided_slice %320 {offsets = [40, 0], sizes = [8, 128], strides = [1, 1]} : vector<64x128xf32> to vector<8x128xf32>
    %c0_141 = arith.constant 0 : index
    %c22 = arith.constant 22 : index
    %c0_142 = arith.constant 0 : index
    %c0_143 = arith.constant 0 : index
    %342 = vector.load %arg6[%c0_141, %c22, %c0_142, %c0_143] : memref<1x32x8x128xf32, #tpu.memory_space<vmem>>, vector<1x1x8x128xf32>
    %343 = vector.shape_cast %342 : vector<1x1x8x128xf32> to vector<8x128xf32>
    %344 = vector.shape_cast %341 : vector<8x128xf32> to vector<1x1x8x128xf32>
    tpu.vector_store %arg6[%c0_141, %c22, %c0_142, %c0_143], %344 {strides = array<i32>} : memref<1x32x8x128xf32, #tpu.memory_space<vmem>>, vector<1x1x8x128xf32>,
    %345 = vector.extract_strided_slice %320 {offsets = [48, 0], sizes = [8, 128], strides = [1, 1]} : vector<64x128xf32> to vector<8x128xf32>
    %c0_144 = arith.constant 0 : index
    %c26 = arith.constant 26 : index
    %c0_145 = arith.constant 0 : index
    %c0_146 = arith.constant 0 : index
    %346 = vector.load %arg6[%c0_144, %c26, %c0_145, %c0_146] : memref<1x32x8x128xf32, #tpu.memory_space<vmem>>, vector<1x1x8x128xf32>
    %347 = vector.shape_cast %346 : vector<1x1x8x128xf32> to vector<8x128xf32>
    %348 = vector.shape_cast %345 : vector<8x128xf32> to vector<1x1x8x128xf32>
    tpu.vector_store %arg6[%c0_144, %c26, %c0_145, %c0_146], %348 {strides = array<i32>} : memref<1x32x8x128xf32, #tpu.memory_space<vmem>>, vector<1x1x8x128xf32>,
    %349 = vector.extract_strided_slice %320 {offsets = [56, 0], sizes = [8, 128], strides = [1, 1]} : vector<64x128xf32> to vector<8x128xf32>
    %c0_147 = arith.constant 0 : index
    %c30 = arith.constant 30 : index
    %c0_148 = arith.constant 0 : index
    %c0_149 = arith.constant 0 : index
    %350 = vector.load %arg6[%c0_147, %c30, %c0_148, %c0_149] : memref<1x32x8x128xf32, #tpu.memory_space<vmem>>, vector<1x1x8x128xf32>
    %351 = vector.shape_cast %350 : vector<1x1x8x128xf32> to vector<8x128xf32>
    %352 = vector.shape_cast %349 : vector<8x128xf32> to vector<1x1x8x128xf32>
    tpu.vector_store %arg6[%c0_147, %c30, %c0_148, %c0_149], %352 {strides = array<i32>} : memref<1x32x8x128xf32, #tpu.memory_space<vmem>>, vector<1x1x8x128xf32>,
    %c3 = arith.constant 3 : index
    %c0_150 = arith.constant 0 : index
    %c0_151 = arith.constant 0 : index
    %353 = vector.load %arg3[%c3, %c0_150, %c0_151] : memref<4x32x128xbf16, #tpu.memory_space<vmem>>, vector<1x32x128xbf16>
    %354 = vector.shape_cast %353 : vector<1x32x128xbf16> to vector<32x128xbf16>
    %cst_152 = arith.constant dense<0.000000e+00> : vector<64x128xf32>
    %355 = tpu.matmul %2, %354, %cst_152 {dimension_numbers = #tpu.dot_dimension_numbers<[1], [0], [0], [1], [0, 0, 1, 1], [], []>} : vector<64x32xbf16>, vector<32x128xbf16>, vector<64x128xf32> -> vector<64x128xf32>
    %356 = vector.extract_strided_slice %355 {offsets = [0, 0], sizes = [64, 32], strides = [1, 1]} : vector<64x128xf32> to vector<64x32xf32>
    %cst_153 = arith.constant dense<0.000000e+00> : vector<64xf32>
    %357 = vector.multi_reduction <add>, %356, %cst_153 [1] : vector<64x32xf32> to vector<64xf32>
    %358 = vector.shape_cast %357 : vector<64xf32> to vector<64x1xf32>
    %359 = arith.mulf %356, %356 : vector<64x32xf32>
    %cst_154 = arith.constant dense<0.000000e+00> : vector<64xf32>
    %360 = vector.multi_reduction <add>, %359, %cst_154 [1] : vector<64x32xf32> to vector<64xf32>
    %361 = vector.shape_cast %360 : vector<64xf32> to vector<64x1xf32>
    %cst_155 = arith.constant 3.125000e-02 : f32
    %362 = vector.broadcast %cst_155 : f32 to vector<64x1xf32>
    %363 = arith.mulf %358, %362 : vector<64x1xf32>
    %cst_156 = arith.constant 3.125000e-02 : f32
    %364 = vector.broadcast %cst_156 : f32 to vector<64x1xf32>
    %365 = arith.mulf %361, %364 : vector<64x1xf32>
    %366 = arith.mulf %363, %363 : vector<64x1xf32>
    %367 = arith.subf %365, %366 : vector<64x1xf32>
    %368 = vector.broadcast %363 : vector<64x1xf32> to vector<64x32xf32>
    %369 = arith.subf %356, %368 : vector<64x32xf32>
    %cst_157 = arith.constant 9.99999974E-6 : f32
    %370 = vector.broadcast %cst_157 : f32 to vector<64x1xf32>
    %371 = arith.addf %367, %370 : vector<64x1xf32>
    %372 = math.rsqrt %371 : vector<64x1xf32>
    %373 = vector.broadcast %372 : vector<64x1xf32> to vector<64x32xf32>
    %374 = arith.mulf %369, %373 : vector<64x32xf32>
    %375 = vector.extract_strided_slice %355 {offsets = [0, 32], sizes = [64, 32], strides = [1, 1]} : vector<64x128xf32> to vector<64x32xf32>
    %cst_158 = arith.constant dense<0.000000e+00> : vector<64xf32>
    %376 = vector.multi_reduction <add>, %375, %cst_158 [1] : vector<64x32xf32> to vector<64xf32>
    %377 = vector.shape_cast %376 : vector<64xf32> to vector<64x1xf32>
    %378 = arith.mulf %375, %375 : vector<64x32xf32>
    %cst_159 = arith.constant dense<0.000000e+00> : vector<64xf32>
    %379 = vector.multi_reduction <add>, %378, %cst_159 [1] : vector<64x32xf32> to vector<64xf32>
    %380 = vector.shape_cast %379 : vector<64xf32> to vector<64x1xf32>
    %cst_160 = arith.constant 3.125000e-02 : f32
    %381 = vector.broadcast %cst_160 : f32 to vector<64x1xf32>
    %382 = arith.mulf %377, %381 : vector<64x1xf32>
    %cst_161 = arith.constant 3.125000e-02 : f32
    %383 = vector.broadcast %cst_161 : f32 to vector<64x1xf32>
    %384 = arith.mulf %380, %383 : vector<64x1xf32>
    %385 = arith.mulf %382, %382 : vector<64x1xf32>
    %386 = arith.subf %384, %385 : vector<64x1xf32>
    %387 = vector.broadcast %382 : vector<64x1xf32> to vector<64x32xf32>
    %388 = arith.subf %375, %387 : vector<64x32xf32>
    %cst_162 = arith.constant 9.99999974E-6 : f32
    %389 = vector.broadcast %cst_162 : f32 to vector<64x1xf32>
    %390 = arith.addf %386, %389 : vector<64x1xf32>
    %391 = math.rsqrt %390 : vector<64x1xf32>
    %392 = vector.broadcast %391 : vector<64x1xf32> to vector<64x32xf32>
    %393 = arith.mulf %388, %392 : vector<64x32xf32>
    %394 = vector.extract_strided_slice %355 {offsets = [0, 64], sizes = [64, 32], strides = [1, 1]} : vector<64x128xf32> to vector<64x32xf32>
    %cst_163 = arith.constant dense<0.000000e+00> : vector<64xf32>
    %395 = vector.multi_reduction <add>, %394, %cst_163 [1] : vector<64x32xf32> to vector<64xf32>
    %396 = vector.shape_cast %395 : vector<64xf32> to vector<64x1xf32>
    %397 = arith.mulf %394, %394 : vector<64x32xf32>
    %cst_164 = arith.constant dense<0.000000e+00> : vector<64xf32>
    %398 = vector.multi_reduction <add>, %397, %cst_164 [1] : vector<64x32xf32> to vector<64xf32>
    %399 = vector.shape_cast %398 : vector<64xf32> to vector<64x1xf32>
    %cst_165 = arith.constant 3.125000e-02 : f32
    %400 = vector.broadcast %cst_165 : f32 to vector<64x1xf32>
    %401 = arith.mulf %396, %400 : vector<64x1xf32>
    %cst_166 = arith.constant 3.125000e-02 : f32
    %402 = vector.broadcast %cst_166 : f32 to vector<64x1xf32>
    %403 = arith.mulf %399, %402 : vector<64x1xf32>
    %404 = arith.mulf %401, %401 : vector<64x1xf32>
    %405 = arith.subf %403, %404 : vector<64x1xf32>
    %406 = vector.broadcast %401 : vector<64x1xf32> to vector<64x32xf32>
    %407 = arith.subf %394, %406 : vector<64x32xf32>
    %cst_167 = arith.constant 9.99999974E-6 : f32
    %408 = vector.broadcast %cst_167 : f32 to vector<64x1xf32>
    %409 = arith.addf %405, %408 : vector<64x1xf32>
    %410 = math.rsqrt %409 : vector<64x1xf32>
    %411 = vector.broadcast %410 : vector<64x1xf32> to vector<64x32xf32>
    %412 = arith.mulf %407, %411 : vector<64x32xf32>
    %413 = vector.extract_strided_slice %355 {offsets = [0, 96], sizes = [64, 32], strides = [1, 1]} : vector<64x128xf32> to vector<64x32xf32>
    %cst_168 = arith.constant dense<0.000000e+00> : vector<64xf32>
    %414 = vector.multi_reduction <add>, %413, %cst_168 [1] : vector<64x32xf32> to vector<64xf32>
    %415 = vector.shape_cast %414 : vector<64xf32> to vector<64x1xf32>
    %416 = arith.mulf %413, %413 : vector<64x32xf32>
    %cst_169 = arith.constant dense<0.000000e+00> : vector<64xf32>
    %417 = vector.multi_reduction <add>, %416, %cst_169 [1] : vector<64x32xf32> to vector<64xf32>
    %418 = vector.shape_cast %417 : vector<64xf32> to vector<64x1xf32>
    %cst_170 = arith.constant 3.125000e-02 : f32
    %419 = vector.broadcast %cst_170 : f32 to vector<64x1xf32>
    %420 = arith.mulf %415, %419 : vector<64x1xf32>
    %cst_171 = arith.constant 3.125000e-02 : f32
    %421 = vector.broadcast %cst_171 : f32 to vector<64x1xf32>
    %422 = arith.mulf %418, %421 : vector<64x1xf32>
    %423 = arith.mulf %420, %420 : vector<64x1xf32>
    %424 = arith.subf %422, %423 : vector<64x1xf32>
    %425 = vector.broadcast %420 : vector<64x1xf32> to vector<64x32xf32>
    %426 = arith.subf %413, %425 : vector<64x32xf32>
    %cst_172 = arith.constant 9.99999974E-6 : f32
    %427 = vector.broadcast %cst_172 : f32 to vector<64x1xf32>
    %428 = arith.addf %424, %427 : vector<64x1xf32>
    %429 = math.rsqrt %428 : vector<64x1xf32>
    %430 = vector.broadcast %429 : vector<64x1xf32> to vector<64x32xf32>
    %431 = arith.mulf %426, %430 : vector<64x32xf32>
    %432 = tpu.concatenate %374, %393, %412, %431 in 1 : vector<64x32xf32>, vector<64x32xf32>, vector<64x32xf32>, vector<64x32xf32> -> vector<64x128xf32>
    %433 = vector.broadcast %3 : vector<1x128xf32> to vector<64x128xf32>
    %434 = arith.mulf %432, %433 : vector<64x128xf32>
    %435 = vector.broadcast %4 : vector<1x128xf32> to vector<64x128xf32>
    %436 = arith.addf %434, %435 : vector<64x128xf32>
    %437 = vector.extract_strided_slice %436 {offsets = [0, 0], sizes = [8, 128], strides = [1, 1]} : vector<64x128xf32> to vector<8x128xf32>
    %c0_173 = arith.constant 0 : index
    %c3_174 = arith.constant 3 : index
    %c0_175 = arith.constant 0 : index
    %c0_176 = arith.constant 0 : index
    %438 = vector.load %arg6[%c0_173, %c3_174, %c0_175, %c0_176] : memref<1x32x8x128xf32, #tpu.memory_space<vmem>>, vector<1x1x8x128xf32>
    %439 = vector.shape_cast %438 : vector<1x1x8x128xf32> to vector<8x128xf32>
    %440 = vector.shape_cast %437 : vector<8x128xf32> to vector<1x1x8x128xf32>
    tpu.vector_store %arg6[%c0_173, %c3_174, %c0_175, %c0_176], %440 {strides = array<i32>} : memref<1x32x8x128xf32, #tpu.memory_space<vmem>>, vector<1x1x8x128xf32>,
    %441 = vector.extract_strided_slice %436 {offsets = [8, 0], sizes = [8, 128], strides = [1, 1]} : vector<64x128xf32> to vector<8x128xf32>
    %c0_177 = arith.constant 0 : index
    %c7 = arith.constant 7 : index
    %c0_178 = arith.constant 0 : index
    %c0_179 = arith.constant 0 : index
    %442 = vector.load %arg6[%c0_177, %c7, %c0_178, %c0_179] : memref<1x32x8x128xf32, #tpu.memory_space<vmem>>, vector<1x1x8x128xf32>
    %443 = vector.shape_cast %442 : vector<1x1x8x128xf32> to vector<8x128xf32>
    %444 = vector.shape_cast %441 : vector<8x128xf32> to vector<1x1x8x128xf32>
    tpu.vector_store %arg6[%c0_177, %c7, %c0_178, %c0_179], %444 {strides = array<i32>} : memref<1x32x8x128xf32, #tpu.memory_space<vmem>>, vector<1x1x8x128xf32>,
    %445 = vector.extract_strided_slice %436 {offsets = [16, 0], sizes = [8, 128], strides = [1, 1]} : vector<64x128xf32> to vector<8x128xf32>
    %c0_180 = arith.constant 0 : index
    %c11 = arith.constant 11 : index
    %c0_181 = arith.constant 0 : index
    %c0_182 = arith.constant 0 : index
    %446 = vector.load %arg6[%c0_180, %c11, %c0_181, %c0_182] : memref<1x32x8x128xf32, #tpu.memory_space<vmem>>, vector<1x1x8x128xf32>
    %447 = vector.shape_cast %446 : vector<1x1x8x128xf32> to vector<8x128xf32>
    %448 = vector.shape_cast %445 : vector<8x128xf32> to vector<1x1x8x128xf32>
    tpu.vector_store %arg6[%c0_180, %c11, %c0_181, %c0_182], %448 {strides = array<i32>} : memref<1x32x8x128xf32, #tpu.memory_space<vmem>>, vector<1x1x8x128xf32>,
    %449 = vector.extract_strided_slice %436 {offsets = [24, 0], sizes = [8, 128], strides = [1, 1]} : vector<64x128xf32> to vector<8x128xf32>
    %c0_183 = arith.constant 0 : index
    %c15 = arith.constant 15 : index
    %c0_184 = arith.constant 0 : index
    %c0_185 = arith.constant 0 : index
    %450 = vector.load %arg6[%c0_183, %c15, %c0_184, %c0_185] : memref<1x32x8x128xf32, #tpu.memory_space<vmem>>, vector<1x1x8x128xf32>
    %451 = vector.shape_cast %450 : vector<1x1x8x128xf32> to vector<8x128xf32>
    %452 = vector.shape_cast %449 : vector<8x128xf32> to vector<1x1x8x128xf32>
    tpu.vector_store %arg6[%c0_183, %c15, %c0_184, %c0_185], %452 {strides = array<i32>} : memref<1x32x8x128xf32, #tpu.memory_space<vmem>>, vector<1x1x8x128xf32>,
    %453 = vector.extract_strided_slice %436 {offsets = [32, 0], sizes = [8, 128], strides = [1, 1]} : vector<64x128xf32> to vector<8x128xf32>
    %c0_186 = arith.constant 0 : index
    %c19 = arith.constant 19 : index
    %c0_187 = arith.constant 0 : index
    %c0_188 = arith.constant 0 : index
    %454 = vector.load %arg6[%c0_186, %c19, %c0_187, %c0_188] : memref<1x32x8x128xf32, #tpu.memory_space<vmem>>, vector<1x1x8x128xf32>
    %455 = vector.shape_cast %454 : vector<1x1x8x128xf32> to vector<8x128xf32>
    %456 = vector.shape_cast %453 : vector<8x128xf32> to vector<1x1x8x128xf32>
    tpu.vector_store %arg6[%c0_186, %c19, %c0_187, %c0_188], %456 {strides = array<i32>} : memref<1x32x8x128xf32, #tpu.memory_space<vmem>>, vector<1x1x8x128xf32>,
    %457 = vector.extract_strided_slice %436 {offsets = [40, 0], sizes = [8, 128], strides = [1, 1]} : vector<64x128xf32> to vector<8x128xf32>
    %c0_189 = arith.constant 0 : index
    %c23 = arith.constant 23 : index
    %c0_190 = arith.constant 0 : index
    %c0_191 = arith.constant 0 : index
    %458 = vector.load %arg6[%c0_189, %c23, %c0_190, %c0_191] : memref<1x32x8x128xf32, #tpu.memory_space<vmem>>, vector<1x1x8x128xf32>
    %459 = vector.shape_cast %458 : vector<1x1x8x128xf32> to vector<8x128xf32>
    %460 = vector.shape_cast %457 : vector<8x128xf32> to vector<1x1x8x128xf32>
    tpu.vector_store %arg6[%c0_189, %c23, %c0_190, %c0_191], %460 {strides = array<i32>} : memref<1x32x8x128xf32, #tpu.memory_space<vmem>>, vector<1x1x8x128xf32>,
    %461 = vector.extract_strided_slice %436 {offsets = [48, 0], sizes = [8, 128], strides = [1, 1]} : vector<64x128xf32> to vector<8x128xf32>
    %c0_192 = arith.constant 0 : index
    %c27 = arith.constant 27 : index
    %c0_193 = arith.constant 0 : index
    %c0_194 = arith.constant 0 : index
    %462 = vector.load %arg6[%c0_192, %c27, %c0_193, %c0_194] : memref<1x32x8x128xf32, #tpu.memory_space<vmem>>, vector<1x1x8x128xf32>
    %463 = vector.shape_cast %462 : vector<1x1x8x128xf32> to vector<8x128xf32>
    %464 = vector.shape_cast %461 : vector<8x128xf32> to vector<1x1x8x128xf32>
    tpu.vector_store %arg6[%c0_192, %c27, %c0_193, %c0_194], %464 {strides = array<i32>} : memref<1x32x8x128xf32, #tpu.memory_space<vmem>>, vector<1x1x8x128xf32>,
    %465 = vector.extract_strided_slice %436 {offsets = [56, 0], sizes = [8, 128], strides = [1, 1]} : vector<64x128xf32> to vector<8x128xf32>
    %c0_195 = arith.constant 0 : index
    %c31 = arith.constant 31 : index
    %c0_196 = arith.constant 0 : index
    %c0_197 = arith.constant 0 : index
    %466 = vector.load %arg6[%c0_195, %c31, %c0_196, %c0_197] : memref<1x32x8x128xf32, #tpu.memory_space<vmem>>, vector<1x1x8x128xf32>
    %467 = vector.shape_cast %466 : vector<1x1x8x128xf32> to vector<8x128xf32>
    %468 = vector.shape_cast %465 : vector<8x128xf32> to vector<1x1x8x128xf32>
    tpu.vector_store %arg6[%c0_195, %c31, %c0_196, %c0_197], %468 {strides = array<i32>} : memref<1x32x8x128xf32, #tpu.memory_space<vmem>>, vector<1x1x8x128xf32>,
    return
  }
  func.func @transform_0(%arg0: i32, %arg1: i32) -> (i32, i32, i32) {
    %c0_i32 = arith.constant 0 : i32
    %c0_i32_0 = arith.constant 0 : i32
    return %arg0, %arg1, %c0_i32 : i32, i32, i32
  }
  func.func @transform_1(%arg0: i32, %arg1: i32) -> (i32, i32, i32) {
    %c0_i32 = arith.constant 0 : i32
    %c0_i32_0 = arith.constant 0 : i32
    %c0_i32_1 = arith.constant 0 : i32
    %c0_i32_2 = arith.constant 0 : i32
    return %c0_i32, %c0_i32_0, %c0_i32_1 : i32, i32, i32
  }
  func.func @transform_2(%arg0: i32, %arg1: i32) -> (i32, i32) {
    %c0_i32 = arith.constant 0 : i32
    %c0_i32_0 = arith.constant 0 : i32
    %c0_i32_1 = arith.constant 0 : i32
    return %c0_i32, %c0_i32_0 : i32, i32
  }
  func.func @transform_3(%arg0: i32, %arg1: i32) -> (i32, i32) {
    %c0_i32 = arith.constant 0 : i32
    %c0_i32_0 = arith.constant 0 : i32
    %c0_i32_1 = arith.constant 0 : i32
    return %c0_i32, %c0_i32_0 : i32, i32
  }
  func.func @transform_4(%arg0: i32, %arg1: i32) -> (i32, i32, i32, i32) {
    %c0_i32 = arith.constant 0 : i32
    %c0_i32_0 = arith.constant 0 : i32
    %c0_i32_1 = arith.constant 0 : i32
    return %arg0, %arg1, %c0_i32, %c0_i32_0 : i32, i32, i32, i32
  }
}

</mosaic_0001>

<bundles_post_ra>
// kernel: tpu_custom_call.1
= control target key start
LH: loop header
LB: loop body
LE: loop exit
PB: predicated region body
PF: predicated region fallthrough
CT: control target
= control target key end

     0   :  { %9 = vsyncpa [#allocation3], 0  ;;  %s6830_s0 = inlined_call_operand.vmem [shape: f32[2,64,32], index: 0, kind: input, shape index: {}]   ;;  %s6831_s1 = inlined_call_operand.vmem [shape: bf16[4,32,128], index: 1, kind: input, shape index: {}]   ;;  %s6832_s2 = inlined_call_operand.vmem [shape: f32[1,128], index: 2, kind: input, shape index: {}]   ;;  %s6833_s3 = inlined_call_operand.vmem [shape: f32[1,128], index: 3, kind: input, shape index: {}]   ;;  %s6834_s4 = inlined_call_operand.hbm [shape: f32[2,32,8,128], index: 4, kind: output, shape index: {}]  }
   0x1   :  { %11 = vsyncpa [#allocation3 + $0x1], 0  ;;  %s3975_s15 = smov 0   ;;  %s3977_s16 = smov 0  }
   0x2   :  { %s3979_s17 = smov 0   ;;  %s3981_s18 = smov 0  }
   0x3   :  { %s3983_s19 = smov 0   ;;  %s3985_s20 = smov 0  }
   0x4 LB: > { %s3378_s21 = sadd.s32 4294967295, %s3942_s20   ;;  %s3379_s22 = sadd.s32 4294967294, %s3942_s20   ;;  %s3942_s20 = sphi %s3985_s20, %s17_s20   ;;  %s3938_s19 = sphi %s3983_s19, %s7190_s19   ;;  %s3934_s18 = sphi %s3981_s18, %s7189_s18   ;;  %s3930_s17 = sphi %s3979_s17, %s7188_s17   ;;  %s3926_s16 = sphi %s3977_s16, %s7187_s16   ;;  %s3922_s15 = sphi %s3975_s15, %s7186_s15  }
   0x5   : > { %s29_s23 = sadd.s32 1, %s3938_s19  ;;  %s129_s24 = sadd.s32 1, %s3930_s17 }
   0x6   : > { %p31_p0 = scmp.ge.s32.totalorder %s29_s23, 2  ;;  %p139_p1 = scmp.ne.s32.totalorder %s3930_s17, %s3926_s16 }
   0x7   : > { %p140_p2 = scmp.eq.s32.totalorder %s3378_s21, 1  ;;  %p145_p3 = scmp.ne.s32.totalorder %s3926_s16, %s3922_s15 }
   0x8   : > { %s7192_s23 = smov (%p31_p0, %s29_s23), 0  ;;  %p146_p5 = scmp.eq.s32.totalorder %s3379_s22, 1 }
   0x9   : > { %p4015_p4 = por %p140_p2, %p139_p1  ;;  %s124_s26 = ssub.s32 %s3938_s19, %s7192_s23 }
   0xa   : > { %p3382_p6 = scmp.ge.s32.totalorder %s3942_s20, 1  ;;  %p127_p7 = scmp.eq.s32.totalorder %s124_s26, 0 }
   0xb   : > { %p4022_p8 = por %p146_p5, %p145_p3  ;;  %p186_p9 = scmp.lt.s32.totalorder %s3942_s20, 3 }
   0xc   : > { %s4028_s28 = scalar_select %p127_p7, %s3930_s17, %s129_s24  }
   0xd   : > { %p187_p10 = pnand %p3382_p6, %p186_p9 }
   0xf   : > { %190 = sbr.rel (%p187_p10) target bundleno = 4037 (0xfc5), region = 36 }
  0x16   : > { %v3594_v0 = vld [vmem:[%s6831_s1] sm:$0xff]   ;;  %p217_p11 = scmp.lt.s32.totalorder %s3934_s18, 1  ;;  %v3595_v1 = vld [vmem:[%s6831_s1 + $0x8] sm:$0xff]   ;;  %vm258_vm0 = vcmask 261120   ;;  %s3944_s12 = smov 96   ;;  %vm960_vm1 = vcmask 523264  }
  0x17   : > { %3486 = vmatprep.subr.bf16.mxu0 %v3594_v0  ;;  %s3945_s13 = smov 64   ;;  %s3946_s14 = smov 32   ;;  %vm969_vm2 = vcmask 785408  }
  0x18   : > { %s218_s7 = scalar_select %p217_p11, %s3934_s18, 1  ;;  %3487 = vmatpush3.bf16.msra.mxu0 %v3594_v0 }
  0x19   : > { %3488 = vmatprep.subr.bf16.mxu0 %v3595_v1  ;;  %s213_s29 = sand.u32 1, %s3926_s16   ;;  %s3461_s30 = sshll.u32 %s3934_s18, 12 }
  0x1a   : > { %s3460_s8 = sshll.u32 %s218_s7, 6  ;;  %s4753_s6 = sshll.u32 %s213_s29, 8 }
  0x1b   : > { %s224_s11 = scalar_lea.vmem %s6830_s0, %s3460_s8  ;;  %s4801_s9 = scalar_lea.vmem [#allocation2], %s4753_s6 }
  0x1c   : > { %v228_v2 = vld [vmem:[%s224_s11] sm:$0xff]  ;;  %v229_v3 = vld [vmem:[%s224_s11 + $0x8] sm:$0xff]  ;;  %v230_v4 = vld [vmem:[%s224_s11 + $0x10] sm:$0xff]  ;;  %3489 = vmatpush3.bf16.msra.mxu0 %v3595_v1  ;;  %s3299_s5 = sshll.u32 %s4801_s9, 4  ;;  %s6776_s8 = scalar_lea.hbm %s6834_s4, %s3461_s30  ;;  %s6778_s5 = int_to_ptr.vmem [resolvable:$true] %s3299_s5 }
  0x1d   : > { %v4041_v5 = vpack.c.bf16 %v229_v3, %v228_v2  ;;  %v231_v6 = vld [vmem:[%s224_s11 + $0x18] sm:$0xff]  ;;  %v232_v7 = vld [vmem:[%s224_s11 + $0x20] sm:$0xff]  ;;  %v233_v8 = vld [vmem:[%s224_s11 + $0x28] sm:$0xff]  ;;  %s6784_s18 = scalar_lea.sflag [#allocation3], %s213_s29  ;;  %s3864_s10 = scalar_lea.vmem %s6778_s5, 4096 }
  0x1e   : > { %v4043_v9 = vpack.c.bf16 %v231_v6, %v230_v4  ;;  %v4045_v10 = vpack.c.bf16 %v233_v8, %v232_v7  ;;  %v234_v11 = vld [vmem:[%s224_s11 + $0x30] sm:$0xff]  ;;  %v235_v12 = vld [vmem:[%s224_s11 + $0x38] sm:$0xff]  ;;  %p3865_p12 = scmp.ne.s32.totalorder %s6778_s5, %s3864_s10  ;;  %s3947_s11 = smov [#allocation2]  }
  0x1f   : > { %3490 = vmatprep.mubr.msk.bf16.mxu0 %vm258_vm0, %v4041_v5  ;;  %3502 = vmatprep.mubr.msk.bf16.mxu1 %vm258_vm0, %v4041_v5  ;;  %v4055_v13 = vpack.c.bf16 %v235_v12, %v234_v11  ;;  %s3868_s21 = sshll.u32 %s3947_s11, 4  ;;  %s3869_s21 = int_to_ptr.vmem [resolvable:$false] %s3868_s21 }
  0x20   : > { %6939 = vst [vmem:[#allocation5_spill] sm:$0xff] %v4043_v9  ;;  %6940 = vst [vmem:[#allocation6_spill] sm:$0xff] %v4045_v10  ;;  %3491 = vmatmul.mubr.msk.bf16.vlgmr.msra.gmra.mrb[0].mxu0 %vm258_vm0, %v4043_v9  ;;  %p3866_p13 = pnand %p3865_p12, %p4015_p4  ;;  %s3870_s22 = scalar_lea.vmem %s3869_s21, 8192 }
  0x21   : > { %3494 = vmatprep.mubr.msk.bf16.mxu0 %vm258_vm0, %v4045_v10  ;;  %6941 = vst [vmem:[#allocation7_spill] sm:$0xff] %v4055_v13  ;;  %p3871_p1 = scmp.lt.s32.totalorder %s6778_s5, %s3869_s21  ;;  %p3872_p2 = scmp.lt.s32.totalorder %s3870_s22, %s3864_s10 }
  0x22   : > { %p3867_p0 = pneg %p3866_p13 }
  0x23   : > { %p3873_p3 = por %p3872_p2, %p3871_p1 }
  0x25   : > { %p3874_p5 = pnand %p3873_p3, %p3867_p0 }
  0x28   : > { %3495 = vmatmul.mubr.msk.bf16.gmra.mrb[4].mxu0 %vm258_vm0, %v4055_v13 }
  0x29   : > { %3514 = vmatprep.mubr.msk.bf16.mxu0 %vm258_vm0, %v4041_v5 }
  0xf3   : > { %v4061_v14 = vpop.f32.mrb[0].mxu0 }
  0xf4   : > { %468 = vrot.lane.b32.xlu1 %v4061_v14, %s3944_s12  ;;  %v4065_v15 = vpop.f32.mrb[1].mxu0  ;;  %v4083_v20 = vmul.f32 %v4061_v14, %v4061_v14  ;;  %v342_v21 = vsel %vm258_vm0, %v4061_v14, 0.0 }
  0xf5   : > { %464 = vrot.lane.b32.xlu0 %v4065_v15, %s3944_s12  ;;  %v4069_v16 = vpop.f32.mrb[2].mxu0  ;;  %v336_v19 = vsel %vm258_vm0, %v4065_v15, 0.0  ;;  %v4095_v24 = vmul.f32 %v4065_v15, %v4065_v15 }
  0xf6   : > { %v4071_v17 = vpop.f32.mrb[3].mxu0  ;;  %v374_v22 = vsel %vm258_vm0, %v4083_v20, 0.0  ;;  %v345_v27 = vsel %vm258_vm0, %v4069_v16, 0.0  ;;  %v4127_v30 = vmul.f32 %v4069_v16, %v4069_v16 }
  0xf7   : > { %v339_v25 = vsel %vm258_vm0, %v4071_v17, 0.0  ;;  %v368_v26 = vsel %vm258_vm0, %v4095_v24, 0.0  ;;  %v4143_v33 = vmul.f32 %v4071_v17, %v4071_v17 }
  0xf8   : > { %636 = vrot.lane.b32.xlu1 %v4061_v14, %s3945_s13  ;;  %v377_v32 = vsel %vm258_vm0, %v4127_v30, 0.0 }
  0xf9   : > { %632 = vrot.lane.b32.xlu0 %v4065_v15, %s3945_s13  ;;  %v371_v35 = vsel %vm258_vm0, %v4143_v33, 0.0 }
  0xfb   : > { %v4077_v18 = vpop.f32.mrb[4].mxu0 }
  0xfc   : > { %v4089_v23 = vpop.f32.mrb[5].mxu0  ;;  %v354_v31 = vsel %vm258_vm0, %v4077_v18, 0.0  ;;  %v4155_v36 = vmul.f32 %v4077_v18, %v4077_v18 }
  0xfd   : > { %v4113_v28 = vpop.f32.mrb[6].mxu0  ;;  %v348_v34 = vsel %vm258_vm0, %v4089_v23, 0.0  ;;  %v4171_v39 = vmul.f32 %v4089_v23, %v4089_v23 }
  0xfe   : > { %v4115_v29 = vpop.f32.mrb[7].mxu0  ;;  %v386_v37 = vsel %vm258_vm0, %v4155_v36, 0.0  ;;  %v357_v38 = vsel %vm258_vm0, %v4113_v28, 0.0  ;;  %v4206_v2 = vmul.f32 %v4113_v28, %v4113_v28 }
  0xff   : > { %6942 = vst [vmem:[#allocation8_spill] sm:$0xff] %v4115_v29  ;;  %v380_v47 = vsel %vm258_vm0, %v4171_v39, 0.0  ;;  %v351_v55 = vsel %vm258_vm0, %v4115_v29, 0.0 }
 0x118   : > { %337 = vadd.xlane.f32.xlu0 %v336_v19 }
 0x11c   : > { %343 = vadd.xlane.f32.xlu1 %v342_v21  ;;  %375 = vadd.xlane.f32.xlu0 %v374_v22 }
 0x12d   : > { %470 = vrot.lane.b32.xlu1 %v4069_v16, %s3944_s12 }
 0x131   : > { %524 = vrot.lane.b32.xlu1 %v4083_v20, %s3944_s12 }
 0x132   : > { %520 = vrot.lane.b32.xlu0 %v4095_v24, %s3944_s12 }
 0x135   : > { %638 = vrot.lane.b32.xlu1 %v4069_v16, %s3945_s13 }
 0x136   : > { %680 = vrot.lane.b32.xlu0 %v4095_v24, %s3945_s13 }
 0x139   : > { %684 = vrot.lane.b32.xlu1 %v4083_v20, %s3945_s13 }
 0x155   : > { %340 = vadd.xlane.f32.xlu0 %v339_v25 }
 0x159   : > { %369 = vadd.xlane.f32.xlu0 %v368_v26 }
 0x15d   : > { %346 = vadd.xlane.f32.xlu1 %v345_v27 }
 0x166   : > { %v469_v40 = vpop.permute.xlu1 %468 }
 0x167   : > { %v465_v41 = vpop.permute.xlu0 %464  ;;  %v494_v49 = vsel %vm258_vm0, %v469_v40, 0.0 }
 0x168   : > { %v488_v54 = vsel %vm258_vm0, %v465_v41, 0.0 }
 0x16a   : > { %v637_v42 = vpop.permute.xlu1 %636 }
 0x16b   : > { %v633_v43 = vpop.permute.xlu0 %632  ;;  %v662_v51 = vsel %vm258_vm0, %v637_v42, 0.0  ;;  %v389_v42 = vsel %vm258_vm0, %v4206_v2, 0.0 }
 0x16c   : > { %v656_v57 = vsel %vm258_vm0, %v633_v43, 0.0 }
 0x16e   : > { %466 = vrot.lane.b32.xlu1 %v4071_v17, %s3944_s12 }
 0x16f   : > { %476 = vrot.lane.b32.xlu0 %v4077_v18, %s3944_s12 }
 0x172   : > { %634 = vrot.lane.b32.xlu1 %v4071_v17, %s3945_s13 }
 0x173   : > { %644 = vrot.lane.b32.xlu0 %v4077_v18, %s3945_s13 }
 0x176   : > { %526 = vrot.lane.b32.xlu1 %v4127_v30, %s3944_s12 }
 0x17a   : > { %686 = vrot.lane.b32.xlu1 %v4127_v30, %s3945_s13 }
 0x192   : > { %355 = vadd.xlane.f32.xlu0 %v354_v31 }
 0x19e   : > { %378 = vadd.xlane.f32.xlu1 %v377_v32 }
 0x1a5   : > { %v4183_v45 = vpop.xlane.xlu0 %337 }
 0x1a8   : > { %472 = vrot.lane.b32.xlu0 %v4089_v23, %s3944_s12 }
 0x1a9   : > { %v4181_v44 = vpop.xlane.xlu1 %343  ;;  %v4187_v48 = vpop.xlane.xlu0 %375 }
 0x1ac   : > { %640 = vrot.lane.b32.xlu0 %v4089_v23, %s3945_s13 }
 0x1ad   : > { %v471_v46 = vpop.permute.xlu1 %470  ;;  %v521_v52 = vpop.permute.xlu0 %520 }
 0x1ae   : > { %v497_v60 = vsel %vm258_vm0, %v471_v46, 0.0  ;;  %v544_v8 = vsel %vm258_vm0, %v521_v52, 0.0 }
 0x1af   : > { %522 = vrot.lane.b32.xlu1 %v4143_v33, %s3944_s12 }
 0x1b1   : > { %v525_v50 = vpop.permute.xlu1 %524  ;;  %v681_v56 = vpop.permute.xlu0 %680 }
 0x1b2   : > { %v550_v62 = vsel %vm258_vm0, %v525_v50, 0.0  ;;  %v704_v12 = vsel %vm258_vm0, %v681_v56, 0.0 }
 0x1b3   : > { %682 = vrot.lane.b32.xlu1 %v4143_v33, %s3945_s13 }
 0x1b5   : > { %v639_v53 = vpop.permute.xlu1 %638 }
 0x1b6   : > { %v665_v1 = vsel %vm258_vm0, %v639_v53, 0.0 }
 0x1b9   : > { %v685_v58 = vpop.permute.xlu1 %684 }
 0x1ba   : > { %v710_v4 = vsel %vm258_vm0, %v685_v58, 0.0 }
 0x1cb   : > { %349 = vadd.xlane.f32.xlu0 %v348_v34 }
 0x1d7   : > { %372 = vadd.xlane.f32.xlu1 %v371_v35 }
 0x1e1   : > { %532 = vrot.lane.b32.xlu0 %v4155_v36, %s3944_s12 }
 0x1e2   : > { %v4195_v59 = vpop.xlane.xlu0 %340 }
 0x1e5   : > { %692 = vrot.lane.b32.xlu0 %v4155_v36, %s3945_s13 }
 0x1e6   : > { %v4201_v63 = vpop.xlane.xlu0 %369 }
 0x1e8   : > { %478 = vrot.lane.b32.xlu1 %v4113_v28, %s3944_s12 }
 0x1ea   : > { %v4198_v61 = vpop.xlane.xlu1 %346  ;;  %v477_v3 = vpop.permute.xlu0 %476 }
 0x1eb   : > { %v506_v31 = vsel %vm258_vm0, %v477_v3, 0.0 }
 0x1ec   : > { %646 = vrot.lane.b32.xlu1 %v4113_v28, %s3945_s13 }
 0x1ee   : > { %v467_v0 = vpop.permute.xlu1 %466  ;;  %v645_v7 = vpop.permute.xlu0 %644 }
 0x1ef   : > { %v674_v32 = vsel %vm258_vm0, %v645_v7, 0.0 }
 0x1f2   : > { %v635_v6 = vpop.permute.xlu1 %634 }
 0x1f6   : > { %v527_v11 = vpop.permute.xlu1 %526 }
 0x1f7   : > { %v553_v21 = vsel %vm258_vm0, %v527_v11, 0.0 }
 0x1fa   : > { %v687_v22 = vpop.permute.xlu1 %686 }
 0x1fb   : > { %v713_v26 = vsel %vm258_vm0, %v687_v22, 0.0 }
 0x204   : > { %387 = vadd.xlane.f32.xlu0 %v386_v37 }
 0x210   : > { %358 = vadd.xlane.f32.xlu1 %v357_v38 }
 0x21a   : > { %528 = vrot.lane.b32.xlu0 %v4171_v39, %s3944_s12 }
 0x21e   : > { %688 = vrot.lane.b32.xlu0 %v4171_v39, %s3945_s13 }
 0x21f   : > { %v4215_v19 = vpop.xlane.xlu0 %355 }
 0x221   : > { %474 = vrot.lane.b32.xlu1 %v4115_v29, %s3944_s12 }
 0x223   : > { %v473_v25 = vpop.permute.xlu0 %472 }
 0x224   : > { %v500_v35 = vsel %vm258_vm0, %v473_v25, 0.0 }
 0x225   : > { %642 = vrot.lane.b32.xlu1 %v4115_v29, %s3945_s13 }
 0x227   : > { %v641_v27 = vpop.permute.xlu0 %640 }
 0x228   : > { %v668_v38 = vsel %vm258_vm0, %v641_v27, 0.0 }
 0x22b   : > { %v4241_v53 = vpop.xlane.xlu1 %378 }
 0x23d   : > { %381 = vadd.xlane.f32.xlu0 %v380_v47  ;;  %v4233_v47 = vmul.f32 %v4115_v29, %v4115_v29 }
 0x241   : > { %495 = vadd.xlane.f32.xlu0 %v494_v49 }
 0x245   : > { %663 = vadd.xlane.f32.xlu0 %v662_v51 }
 0x249   : > { %489 = vadd.xlane.f32.xlu0 %v488_v54  ;;  %352 = vadd.xlane.f32.xlu1 %v351_v55  ;;  %v523_v54 = vpop.permute.xlu1 %522 }
 0x24d   : > { %657 = vadd.xlane.f32.xlu0 %v656_v57  ;;  %v683_v55 = vpop.permute.xlu1 %682  ;;  %v383_v57 = vsel %vm258_vm0, %v4233_v47, 0.0 }
 0x251   : > { %498 = vadd.xlane.f32.xlu0 %v497_v60  ;;  %v491_v60 = vsel %vm258_vm0, %v467_v0, 0.0 }
 0x255   : > { %551 = vadd.xlane.f32.xlu0 %v550_v62 }
 0x258   : > { %v4221_v34 = vpop.xlane.xlu0 %349 }
 0x259   : > { %666 = vadd.xlane.f32.xlu0 %v665_v1  ;;  %v659_v1 = vsel %vm258_vm0, %v635_v6, 0.0 }
 0x25a   : > { %534 = vrot.lane.b32.xlu1 %v4206_v2, %s3944_s12 }
 0x25c   : > { %v533_v37 = vpop.permute.xlu0 %532 }
 0x25d   : > { %711 = vadd.xlane.f32.xlu0 %v710_v4  ;;  %v562_v40 = vsel %vm258_vm0, %v533_v37, 0.0  ;;  %v547_v4 = vsel %vm258_vm0, %v523_v54, 0.0 }
 0x25e   : > { %694 = vrot.lane.b32.xlu1 %v4206_v2, %s3945_s13 }
 0x260   : > { %v693_v41 = vpop.permute.xlu0 %692 }
 0x261   : > { %545 = vadd.xlane.f32.xlu0 %v544_v8  ;;  %v722_v43 = vsel %vm258_vm0, %v693_v41, 0.0  ;;  %v707_v8 = vsel %vm258_vm0, %v683_v55, 0.0  ;;  %v3596_v55 = vld [vmem:[%s6831_s1 + $0x10] sm:$0xff]  }
 0x262   : > { %3498 = vmatprep.subr.bf16.mxu1 %v3596_v55 }
 0x263   : > { %3499 = vmatpush3.bf16.msra.mxu1 %v3596_v55 }
 0x264   : > { %v4247_v56 = vpop.xlane.xlu1 %372 }
 0x265   : > { %705 = vadd.xlane.f32.xlu0 %v704_v12 }
 0x268   : > { %v479_v58 = vpop.permute.xlu1 %478 }
 0x269   : > { %554 = vadd.xlane.f32.xlu0 %v553_v21  ;;  %v509_v0 = vsel %vm258_vm0, %v479_v58, 0.0  ;;  %v3597_v58 = vld [vmem:[%s6831_s1 + $0x18] sm:$0xff]  }
 0x26a   : > { %3500 = vmatprep.subr.bf16.mxu1 %v3597_v58 }
 0x26b   : > { %3501 = vmatpush3.bf16.msra.mxu1 %v3597_v58 }
 0x26c   : > { %v647_v62 = vpop.permute.xlu1 %646 }
 0x26d   : > { %714 = vadd.xlane.f32.xlu0 %v713_v26  ;;  %v677_v6 = vsel %vm258_vm0, %v647_v62, 0.0 }
 0x26e   : > { %3503 = vmatmul.mubr.msk.bf16.vlgmr.msra.gmra.mrb[0].mxu1 %vm258_vm0, %v4043_v9 }
 0x26f   : > { %3506 = vmatprep.mubr.msk.bf16.mxu1 %vm258_vm0, %v4045_v10 }
 0x271   : > { %507 = vadd.xlane.f32.xlu0 %v506_v31 }
 0x275   : > { %675 = vadd.xlane.f32.xlu0 %v674_v32 }
 0x276   : > { %3507 = vmatmul.mubr.msk.bf16.gmra.mrb[4].mxu1 %vm258_vm0, %v4055_v13 }
 0x277   : > { %3526 = vmatprep.mubr.msk.bf16.mxu1 %vm258_vm0, %v4041_v5 }
 0x279   : > { %501 = vadd.xlane.f32.xlu0 %v500_v35 }
 0x27d   : > { %669 = vadd.xlane.f32.xlu0 %v668_v38 }
 0x281   : > { %563 = vadd.xlane.f32.xlu0 %v562_v40 }
 0x282   : > { %390 = vadd.xlane.f32.xlu1 %v389_v42 }
 0x285   : > { %723 = vadd.xlane.f32.xlu0 %v722_v43 }
 0x291   : > { %v4229_v46 = vpop.xlane.xlu0 %387 }
 0x293   : > { %530 = vrot.lane.b32.xlu1 %v4233_v47, %s3944_s12 }
 0x295   : > { %v529_v49 = vpop.permute.xlu0 %528 }
 0x296   : > { %v556_v50 = vsel %vm258_vm0, %v529_v49, 0.0 }
 0x297   : > { %557 = vadd.xlane.f32.xlu0 %v556_v50  ;;  %690 = vrot.lane.b32.xlu1 %v4233_v47, %s3945_s13 }
 0x299   : > { %v689_v51 = vpop.permute.xlu0 %688 }
 0x29a   : > { %v716_v52 = vsel %vm258_vm0, %v689_v51, 0.0 }
 0x29b   : > { %717 = vadd.xlane.f32.xlu0 %v716_v52 }
 0x29d   : > { %v4255_v3 = vpop.xlane.xlu1 %358 }
 0x2a1   : > { %v475_v11 = vpop.permute.xlu1 %474 }
 0x2a2   : > { %v503_v27 = vsel %vm258_vm0, %v475_v11, 0.0 }
 0x2a5   : > { %v643_v21 = vpop.permute.xlu1 %642 }
 0x2a6   : > { %v671_v35 = vsel %vm258_vm0, %v643_v21, 0.0 }
 0x2b1   : > { %792 = vrot.lane.b32.xlu0 %v4065_v15, %s3946_s14 }
 0x2b5   : > { %800 = vrot.lane.b32.xlu0 %v4089_v23, %s3946_s14 }
 0x2b9   : > { %804 = vrot.lane.b32.xlu0 %v4077_v18, %s3946_s14 }
 0x2bb   : > { %384 = vadd.xlane.f32.xlu1 %v383_v57 }
 0x2bf   : > { %492 = vadd.xlane.f32.xlu1 %v491_v60 }
 0x2c3   : > { %660 = vadd.xlane.f32.xlu1 %v659_v1 }
 0x2c7   : > { %548 = vadd.xlane.f32.xlu1 %v547_v4 }
 0x2ca   : > { %v4258_v7 = vpop.xlane.xlu0 %381 }
 0x2cb   : > { %708 = vadd.xlane.f32.xlu1 %v707_v8 }
 0x2ce   : > { %v4261_v12 = vpop.xlane.xlu0 %495 }
 0x2cf   : > { %510 = vadd.xlane.f32.xlu1 %v509_v0 }
 0x2d2   : > { %v4264_v22 = vpop.xlane.xlu0 %663 }
 0x2d3   : > { %678 = vadd.xlane.f32.xlu1 %v677_v6 }
 0x2d6   : > { %v4267_v25 = vpop.xlane.xlu0 %489  ;;  %v4269_v26 = vpop.xlane.xlu1 %352 }
 0x2d7   : > { %6943 = vst [vmem:[#allocation9_spill] sm:$0xff] %v4269_v26  ;;  %504 = vadd.xlane.f32.xlu1 %v503_v27 }
 0x2da   : > { %v4272_v31 = vpop.xlane.xlu0 %657  ;;  %v535_v32 = vpop.permute.xlu1 %534 }
 0x2db   : > { %672 = vadd.xlane.f32.xlu1 %v671_v35  ;;  %v565_v38 = vsel %vm258_vm0, %v535_v32, 0.0 }
 0x2de   : > { %v4275_v37 = vpop.xlane.xlu0 %498  ;;  %v695_v40 = vpop.permute.xlu1 %694 }
 0x2df   : > { %566 = vadd.xlane.f32.xlu1 %v565_v38  ;;  %v725_v42 = vsel %vm258_vm0, %v695_v40, 0.0 }
 0x2e2   : > { %v4278_v41 = vpop.xlane.xlu0 %551 }
 0x2e3   : > { %726 = vadd.xlane.f32.xlu1 %v725_v42 }
 0x2e6   : > { %v4281_v43 = vpop.xlane.xlu0 %666 }
 0x2ea   : > { %v4283_v49 = vpop.xlane.xlu0 %711 }
 0x2ee   : > { %v4285_v50 = vpop.xlane.xlu0 %545 }
 0x2f2   : > { %v4287_v51 = vpop.xlane.xlu0 %705 }
 0x2f6   : > { %v4289_v52 = vpop.xlane.xlu0 %554 }
 0x2fa   : > { %v4291_v54 = vpop.xlane.xlu0 %714 }
 0x2fe   : > { %v4296_v57 = vpop.xlane.xlu0 %507 }
 0x302   : > { %v4301_v60 = vpop.xlane.xlu0 %675 }
 0x306   : > { %v4307_v62 = vpop.xlane.xlu0 %501 }
 0x30a   : > { %v4315_v8 = vpop.xlane.xlu0 %669 }
 0x30b   : > { %6944 = vst [vmem:[#allocation10_spill] sm:$0xff] %v4315_v8 }
 0x30e   : > { %v4319_v6 = vpop.xlane.xlu0 %563 }
 0x30f   : > { %v4309_v1 = vpop.xlane.xlu1 %390 }
 0x312   : > { %v4321_v27 = vpop.xlane.xlu0 %723 }
 0x313   : > { %v531_v4 = vpop.permute.xlu1 %530 }
 0x314   : > { %v559_v11 = vsel %vm258_vm0, %v531_v4, 0.0 }
 0x315   : > { %560 = vadd.xlane.f32.xlu1 %v559_v11 }
 0x317   : > { %v691_v0 = vpop.permute.xlu1 %690 }
 0x318   : > { %v719_v21 = vsel %vm258_vm0, %v691_v0, 0.0 }
 0x319   : > { %720 = vadd.xlane.f32.xlu1 %v719_v21 }
 0x324   : > { %v4323_v32 = vpop.xlane.xlu0 %557 }
 0x328   : > { %v4325_v35 = vpop.xlane.xlu0 %717 }
 0x329   : > { %6945 = vst [vmem:[#allocation11_spill] sm:$0xff] %v4325_v35 }
 0x32a   : > { %794 = vrot.lane.b32.xlu1 %v4071_v17, %s3946_s14 }
 0x32c   : > { %v793_v5 = vpop.permute.xlu0 %792 }
 0x32d   : > { %v816_v38 = vsel %vm258_vm0, %v793_v5, 0.0 }
 0x32e   : > { %817 = vadd.xlane.f32.xlu0 %v816_v38  ;;  %796 = vrot.lane.b32.xlu1 %v4061_v14, %s3946_s14 }
 0x332   : > { %798 = vrot.lane.b32.xlu1 %v4069_v16, %s3946_s14 }
 0x336   : > { %802 = vrot.lane.b32.xlu1 %v4115_v29, %s3946_s14 }
 0x33a   : > { %806 = vrot.lane.b32.xlu1 %v4113_v28, %s3946_s14 }
 0x348   : > { %v4338_v40 = vpop.xlane.xlu1 %384 }
 0x349   : > { %6946 = vst [vmem:[#allocation12_spill] sm:$0xff] %v4338_v40 }
 0x34c   : > { %v4340_v42 = vpop.xlane.xlu1 %492 }
 0x350   : > { %v4342_v55 = vpop.xlane.xlu1 %660 }
 0x354   : > { %v4344_v58 = vpop.xlane.xlu1 %548 }
 0x358   : > { %v4346_v4 = vpop.xlane.xlu1 %708 }
 0x35c   : > { %v4348_v11 = vpop.xlane.xlu1 %510 }
 0x35d   : > { %6947 = vst [vmem:[#allocation13_spill] sm:$0xff] %v4348_v11 }
 0x360   : > { %v4350_v0 = vpop.xlane.xlu1 %678 }
 0x361   : > { %6948 = vst [vmem:[#allocation14_spill] sm:$0xff] %v4350_v0  ;;  %v801_v0 = vpop.permute.xlu0 %800 }
 0x364   : > { %v4352_v21 = vpop.xlane.xlu1 %504 }
 0x365   : > { %6949 = vst [vmem:[#allocation15_spill] sm:$0xff] %v4352_v21  ;;  %v805_v8 = vpop.permute.xlu0 %804 }
 0x368   : > { %v4354_v5 = vpop.xlane.xlu1 %672 }
 0x369   : > { %6950 = vst [vmem:[#allocation16_spill] sm:$0xff] %v4354_v5 }
 0x36c   : > { %v4356_v38 = vpop.xlane.xlu1 %566 }
 0x36d   : > { %6951 = vst [vmem:[#allocation17_spill] sm:$0xff] %v4356_v38 }
 0x370   : > { %v4358_v13 = vpop.xlane.xlu1 %726 }
 0x371   : > { %6952 = vst [vmem:[#allocation18_spill] sm:$0xff] %v4358_v13  ;;  %v828_v13 = vsel %vm258_vm0, %v801_v0, 0.0 }
 0x3a2   : > { %v4360_v10 = vpop.xlane.xlu1 %560 }
 0x3a3   : > { %6953 = vst [vmem:[#allocation19_spill] sm:$0xff] %v4360_v10 }
 0x3a6   : > { %v4362_v9 = vpop.xlane.xlu1 %720 }
 0x3a7   : > { %6954 = vst [vmem:[#allocation20_spill] sm:$0xff] %v4362_v9 }
 0x3aa   : > { %v795_v40 = vpop.permute.xlu1 %794 }
 0x3ab   : > { %v819_v29 = vsel %vm258_vm0, %v795_v40, 0.0 }
 0x3ac   : > { %820 = vadd.xlane.f32.xlu1 %v819_v29  ;;  %v834_v29 = vsel %vm258_vm0, %v805_v8, 0.0 }
 0x3ae   : > { %v797_v35 = vpop.permute.xlu1 %796 }
 0x3af   : > { %v822_v11 = vsel %vm258_vm0, %v797_v35, 0.0 }
 0x3b0   : > { %823 = vadd.xlane.f32.xlu0 %v822_v11 }
 0x3b2   : > { %v799_v21 = vpop.permute.xlu1 %798 }
 0x3b3   : > { %v825_v5 = vsel %vm258_vm0, %v799_v21, 0.0 }
 0x3b4   : > { %826 = vadd.xlane.f32.xlu0 %v825_v5 }
 0x3b6   : > { %v803_v38 = vpop.permute.xlu1 %802 }
 0x3b7   : > { %v831_v10 = vsel %vm258_vm0, %v803_v38, 0.0 }
 0x3b8   : > { %829 = vadd.xlane.f32.xlu0 %v828_v13  ;;  %832 = vadd.xlane.f32.xlu1 %v831_v10 }
 0x3ba   : > { %v807_v9 = vpop.permute.xlu1 %806 }
 0x3bb   : > { %v837_v40 = vsel %vm258_vm0, %v807_v9, 0.0  ;;  %v4385_v9 = vpop.f32.mrb[0].mxu1 }
 0x3bc   : > { %835 = vadd.xlane.f32.xlu0 %v834_v29  ;;  %838 = vadd.xlane.f32.xlu1 %v837_v40  ;;  %6955 = vst [vmem:[#allocation21_spill] sm:$0xff] %v4385_v9  ;;  %v4387_v10 = vpop.f32.mrb[1].mxu1 }
 0x3bd   : > { %6956 = vst [vmem:[#allocation22_spill] sm:$0xff] %v4387_v10  ;;  %v4391_v13 = vpop.f32.mrb[2].mxu1 }
 0x3be   : > { %6957 = vst [vmem:[#allocation23_spill] sm:$0xff] %v4391_v13 }
 0x3cd   : > { %842 = vrot.lane.b32.xlu1 %v4143_v33, %s3946_s14 }
 0x3d1   : > { %844 = vrot.lane.b32.xlu1 %v4083_v20, %s3946_s14  ;;  %v4393_v20 = vpop.f32.mrb[3].mxu1 }
 0x3d2   : > { %840 = vrot.lane.b32.xlu0 %v4095_v24, %s3946_s14  ;;  %6958 = vst [vmem:[#allocation24_spill] sm:$0xff] %v4393_v20  ;;  %v4395_v24 = vpop.f32.mrb[4].mxu1 }
 0x3d3   : > { %6959 = vst [vmem:[#allocation25_spill] sm:$0xff] %v4395_v24 }
 0x3d5   : > { %846 = vrot.lane.b32.xlu1 %v4127_v30, %s3946_s14  ;;  %v4397_v30 = vpop.f32.mrb[5].mxu1 }
 0x3d6   : > { %848 = vrot.lane.b32.xlu0 %v4171_v39, %s3946_s14  ;;  %6960 = vst [vmem:[#allocation26_spill] sm:$0xff] %v4397_v30  ;;  %v4399_v33 = vpop.f32.mrb[6].mxu1 }
 0x3d7   : > { %6961 = vst [vmem:[#allocation27_spill] sm:$0xff] %v4399_v33  ;;  %v4401_v39 = vpop.f32.mrb[7].mxu1 }
 0x3d8   : > { %6962 = vst [vmem:[#allocation28_spill] sm:$0xff] %v4401_v39 }
 0x3d9   : > { %850 = vrot.lane.b32.xlu1 %v4233_v47, %s3946_s14 }
 0x3da   : > { %852 = vrot.lane.b32.xlu0 %v4155_v36, %s3946_s14  ;;  %v4403_v36 = vpop.xlane.xlu0 %817 }
 0x3db   : > { %6963 = vst [vmem:[#allocation29_spill] sm:$0xff] %v4403_v36 }
 0x3dd   : > { %854 = vrot.lane.b32.xlu1 %v4206_v2, %s3946_s14 }
 0x439   : > { %v4407_v8 = vpop.xlane.xlu1 %820 }
 0x43a   : > { %6965 = vst [vmem:[#allocation31_spill] sm:$0xff] %v4407_v8 }
 0x43d   : > { %v4405_v47 = vpop.xlane.xlu0 %823 }
 0x43e   : > { %6964 = vst [vmem:[#allocation30_spill] sm:$0xff] %v4405_v47 }
 0x441   : > { %v4409_v35 = vpop.xlane.xlu0 %826 }
 0x442   : > { %6966 = vst [vmem:[#allocation32_spill] sm:$0xff] %v4409_v35 }
 0x445   : > { %v4411_v2 = vpop.xlane.xlu0 %829  ;;  %v4413_v11 = vpop.xlane.xlu1 %832 }
 0x446   : > { %6967 = vst [vmem:[#allocation33_spill] sm:$0xff] %v4411_v2  ;;  %6968 = vst [vmem:[#allocation34_spill] sm:$0xff] %v4413_v11 }
 0x449   : > { %v4415_v0 = vpop.xlane.xlu0 %835  ;;  %v4417_v21 = vpop.xlane.xlu1 %838 }
 0x44a   : > { %6969 = vst [vmem:[#allocation35_spill] sm:$0xff] %v4415_v0  ;;  %6970 = vst [vmem:[#allocation36_spill] sm:$0xff] %v4417_v21 }
 0x44d   : > { %v841_v5 = vpop.permute.xlu0 %840  ;;  %v843_v38 = vpop.permute.xlu1 %842 }
 0x44e   : > { %v864_v29 = vsel %vm258_vm0, %v841_v5, 0.0  ;;  %v867_v40 = vsel %vm258_vm0, %v843_v38, 0.0 }
 0x44f   : > { %865 = vadd.xlane.f32.xlu0 %v864_v29  ;;  %868 = vadd.xlane.f32.xlu1 %v867_v40  ;;  %v4449_v40 = vmul.f32 %v4393_v20, %v4393_v20 }
 0x451   : > { %v845_v47 = vpop.permute.xlu1 %844  ;;  %v849_v35 = vpop.permute.xlu0 %848 }
 0x452   : > { %v870_v8 = vsel %vm258_vm0, %v845_v47, 0.0  ;;  %v876_v21 = vsel %vm258_vm0, %v849_v35, 0.0  ;;  %v1103_v47 = vsel %vm258_vm0, %v4387_v10, 0.0  ;;  %v1109_v35 = vsel %vm258_vm0, %v4385_v9, 0.0 }
 0x453   : > { %871 = vadd.xlane.f32.xlu0 %v870_v8  ;;  %v1106_v8 = vsel %vm258_vm0, %v4393_v20, 0.0 }
 0x455   : > { %v847_v2 = vpop.permute.xlu1 %846  ;;  %v853_v26 = vpop.permute.xlu0 %852 }
 0x456   : > { %v873_v11 = vsel %vm258_vm0, %v847_v2, 0.0  ;;  %v882_v38 = vsel %vm258_vm0, %v853_v26, 0.0  ;;  %v1115_v26 = vsel %vm258_vm0, %v4397_v30, 0.0  ;;  %v1118_v2 = vsel %vm258_vm0, %v4401_v39, 0.0 }
 0x457   : > { %874 = vadd.xlane.f32.xlu0 %v873_v11  ;;  %v1121_v11 = vsel %vm258_vm0, %v4395_v24, 0.0 }
 0x459   : > { %v851_v0 = vpop.permute.xlu1 %850 }
 0x45a   : > { %v879_v36 = vsel %vm258_vm0, %v851_v0, 0.0  ;;  %v1124_v0 = vsel %vm258_vm0, %v4399_v33, 0.0 }
 0x45b   : > { %877 = vadd.xlane.f32.xlu0 %v876_v21  ;;  %880 = vadd.xlane.f32.xlu1 %v879_v36  ;;  %v1112_v36 = vsel %vm258_vm0, %v4391_v13, 0.0  ;;  %v4445_v21 = vmul.f32 %v4387_v10, %v4387_v10 }
 0x45d   : > { %v855_v5 = vpop.permute.xlu1 %854  ;;  %6971 = vst [vmem:[#allocation37_spill] sm:$0xff] %v4445_v21 }
 0x45e   : > { %v885_v29 = vsel %vm258_vm0, %v855_v5, 0.0  ;;  %v1135_v5 = vsel %vm258_vm0, %v4445_v21, 0.0 }
 0x45f   : > { %883 = vadd.xlane.f32.xlu0 %v882_v38  ;;  %886 = vadd.xlane.f32.xlu1 %v885_v29  ;;  %v1138_v38 = vsel %vm258_vm0, %v4449_v40, 0.0  ;;  %v4457_v29 = vmul.f32 %v4385_v9, %v4385_v9 }
 0x461   : > { %6972 = vst [vmem:[#allocation38_spill] sm:$0xff] %v4457_v29 }
 0x463   : > { %1104 = vadd.xlane.f32.xlu0 %v1103_v47  ;;  %1107 = vadd.xlane.f32.xlu1 %v1106_v8  ;;  %v4461_v47 = vmul.f32 %v4391_v13, %v4391_v13  ;;  %v1141_v8 = vsel %vm258_vm0, %v4457_v29, 0.0 }
 0x465   : > { %6973 = vst [vmem:[#allocation39_spill] sm:$0xff] %v4461_v47 }
 0x467   : > { %1110 = vadd.xlane.f32.xlu0 %v1109_v35  ;;  %1113 = vadd.xlane.f32.xlu1 %v1112_v36  ;;  %v1144_v35 = vsel %vm258_vm0, %v4461_v47, 0.0  ;;  %v4469_v36 = vmul.f32 %v4397_v30, %v4397_v30  ;;  %v6997_v47 = vld [vmem:[#allocation35_spill] sm:$0xff] }
 0x469   : > { %6974 = vst [vmem:[#allocation40_spill] sm:$0xff] %v4469_v36 }
 0x46b   : > { %1116 = vadd.xlane.f32.xlu0 %v1115_v26  ;;  %1119 = vadd.xlane.f32.xlu1 %v1118_v2  ;;  %v4473_v26 = vmul.f32 %v4401_v39, %v4401_v39  ;;  %v1147_v2 = vsel %vm258_vm0, %v4469_v36, 0.0 }
 0x46d   : > { %6975 = vst [vmem:[#allocation41_spill] sm:$0xff] %v4473_v26 }
 0x46f   : > { %1122 = vadd.xlane.f32.xlu0 %v1121_v11  ;;  %1125 = vadd.xlane.f32.xlu1 %v1124_v0  ;;  %v1150_v11 = vsel %vm258_vm0, %v4473_v26, 0.0  ;;  %v4481_v0 = vmul.f32 %v4395_v24, %v4395_v24 }
 0x471   : > { %6976 = vst [vmem:[#allocation42_spill] sm:$0xff] %v4481_v0 }
 0x473   : > { %1136 = vadd.xlane.f32.xlu0 %v1135_v5  ;;  %1139 = vadd.xlane.f32.xlu1 %v1138_v38  ;;  %v4485_v5 = vmul.f32 %v4399_v33, %v4399_v33  ;;  %v1153_v38 = vsel %vm258_vm0, %v4481_v0, 0.0 }
 0x475   : > { %6977 = vst [vmem:[#allocation43_spill] sm:$0xff] %v4485_v5 }
 0x477   : > { %1142 = vadd.xlane.f32.xlu0 %v1141_v8  ;;  %1145 = vadd.xlane.f32.xlu1 %v1144_v35  ;;  %v1156_v8 = vsel %vm258_vm0, %v4485_v5, 0.0  ;;  %v394_v35 = vmul.f32 0.03125, %v4181_v44 }
 0x47b   : > { %1148 = vadd.xlane.f32.xlu0 %v1147_v2  ;;  %1151 = vadd.xlane.f32.xlu1 %v1150_v11  ;;  %v392_v2 = vmul.f32 0.03125, %v4183_v45  ;;  %v410_v11 = vmul.f32 %v394_v35, %v394_v35  ;;  %v398_v45 = vmul.f32 0.03125, %v4215_v19  ;;  %v578_v19 = vmul.f32 0.03125, %v4278_v41 }
 0x47c   : > { %v738_v41 = vmul.f32 0.03125, %v4283_v49  ;;  %v4545_v49 = vmul.f32 0.03125, %v4255_v3 }
 0x47d   : > { %v414_v26 = vmul.f32 %v398_v45, %v398_v45 }
 0x47f   : > { %1154 = vadd.xlane.f32.xlu0 %v1153_v38  ;;  %1157 = vadd.xlane.f32.xlu1 %v1156_v8  ;;  %v395_v38 = vmul.f32 0.03125, %v4198_v61  ;;  %v402_v8 = vmul.f32 0.03125, %v4187_v48  ;;  %v406_v61 = vmul.f32 0.03125, %v4229_v46  ;;  %v4522_v46 = vmul.f32 0.03125, %v4221_v34 }
 0x480   : > { %v426_v34 = vsub.f32 %v4061_v14, %v394_v35 }
 0x490   : > { %1233 = vrot.lane.b32.xlu1 %v4393_v20, %s3944_s12 }
 0x494   : > { %1235 = vrot.lane.b32.xlu1 %v4385_v9, %s3944_s12  ;;  %v401_v9 = vmul.f32 0.03125, %v4247_v56  ;;  %v4518_v56 = vmul.f32 0.03125, %v4261_v12  ;;  %v4533_v12 = vmul.f32 0.03125, %v4267_v25  ;;  %v427_v25 = vsub.f32 %v4069_v16, %v395_v38 }
 0x495   : > { %1231 = vrot.lane.b32.xlu0 %v4387_v10, %s3944_s12  ;;  %v408_v10 = vmul.f32 %v392_v2, %v392_v2 }
 0x496   : > { %v584_v35 = vmul.f32 %v4533_v12, %v4533_v12 }
 0x498   : > { %1237 = vrot.lane.b32.xlu1 %v4391_v13, %s3944_s12  ;;  %v400_v13 = vmul.f32 0.03125, %v4201_v63  ;;  %v422_v63 = vsub.f32 %v406_v61, %v414_v26 }
 0x499   : > { %1239 = vrot.lane.b32.xlu0 %v4397_v30, %s3944_s12  ;;  %v393_v30 = vmul.f32 0.03125, %v4195_v59 }
 0x49a   : > { %v416_v44 = vsub.f32 %v400_v13, %v408_v10  ;;  %v4526_v10 = vmul.f32 0.03125, %v4264_v22  ;;  %v586_v13 = vmul.f32 %v4518_v56, %v4518_v56 }
 0x49b   : > { %v409_v20 = vmul.f32 %v393_v30, %v393_v30  ;;  %v425_v61 = vsub.f32 %v4071_v17, %v393_v30  ;;  %v4563_v30 = vmul.f32 0.03125, %v4275_v37  ;;  %v4577_v37 = vmul.f32 0.03125, %v4296_v57 }
 0x49c   : > { %1241 = vrot.lane.b32.xlu1 %v4401_v39, %s3944_s12  ;;  %v403_v39 = vmul.f32 0.03125, %v4241_v53  ;;  %v432_v59 = vadd.f32 1e-05, %v416_v44  ;;  %v746_v22 = vmul.f32 %v4526_v10, %v4526_v10  ;;  %v4591_v57 = vmul.f32 0.03125, %v4307_v62 }
 0x49d   : > { %1243 = vrot.lane.b32.xlu0 %v4395_v24, %s3944_s12  ;;  %v418_v24 = vsub.f32 %v402_v8, %v410_v11  ;;  %v417_v48 = vsub.f32 %v401_v9, %v409_v20  ;;  %v438_v11 = vadd.f32 1e-05, %v422_v63  ;;  %v404_v9 = vmul.f32 0.03125, %v4258_v7 }
 0x49e   : > { %v754_v44 = vsub.f32 %v738_v41, %v746_v22  ;;  %v579_v41 = vmul.f32 0.03125, %v4289_v52  ;;  %v582_v22 = vmul.f32 0.03125, %v4319_v6 }
 0x49f   : > { %v434_v0 = vadd.f32 1e-05, %v418_v24  ;;  %v433_v53 = vadd.f32 1e-05, %v417_v48  ;;  %v412_v24 = vmul.f32 %v4522_v46, %v4522_v46 }
 0x4a0   : > { %1245 = vrot.lane.b32.xlu1 %v4399_v33, %s3944_s12  ;;  %v411_v33 = vmul.f32 %v395_v38, %v395_v38 }
 0x4a1   : > { %3602 = vrsqrt.f32 %v434_v0  ;;  %v420_v7 = vsub.f32 %v404_v9, %v412_v24  ;;  %v424_v0 = vsub.f32 %v4065_v15, %v392_v2  ;;  %v736_v9 = vmul.f32 0.03125, %v4287_v51 }
 0x4a2   : > { %v419_v5 = vsub.f32 %v403_v39, %v411_v33  ;;  %3604 = vrsqrt.f32 %v432_v59  ;;  %v594_v33 = vsub.f32 %v578_v19, %v586_v13  ;;  %v430_v59 = vsub.f32 %v4077_v18, %v398_v45  ;;  %v6992_v45 = vld [vmem:[#allocation14_spill] sm:$0xff] }
 0x4a3   : > { %v436_v38 = vadd.f32 1e-05, %v420_v7  ;;  %v4571_v13 = vmul.f32 0.03125, %v4281_v43  ;;  %v587_v43 = vmul.f32 %v4563_v30, %v4563_v30  ;;  %v4585_v7 = vmul.f32 0.03125, %v4301_v60 }
 0x4a4   : > { %v435_v36 = vadd.f32 1e-05, %v419_v5  ;;  %v610_v2 = vadd.f32 1e-05, %v594_v33  ;;  %v739_v33 = vmul.f32 0.03125, %v4291_v54  ;;  %v590_v54 = vmul.f32 %v4577_v37, %v4577_v37 }
 0x4a5   : > { %v747_v52 = vmul.f32 %v4571_v13, %v4571_v13  ;;  %v4598_v60 = vmul.f32 0.03125, %v4340_v42  ;;  %v588_v42 = vmul.f32 %v4591_v57, %v4591_v57 }
 0x4a6   : > { %3606 = vrsqrt.f32 %v435_v36  ;;  %v576_v36 = vmul.f32 0.03125, %v4285_v50  ;;  %v4553_v50 = vmul.f32 0.03125, %v4272_v31  ;;  %v415_v31 = vmul.f32 %v4545_v49, %v4545_v49 }
 0x4a7   : > { %3608 = vrsqrt.f32 %v433_v53  ;;  %v755_v6 = vsub.f32 %v739_v33, %v747_v52  ;;  %v600_v33 = vsub.f32 %v4065_v15, %v4533_v12 }
 0x4a8   : > { %3610 = vrsqrt.f32 %v438_v11  ;;  %v592_v53 = vsub.f32 %v576_v36, %v584_v35  ;;  %v428_v11 = vsub.f32 %v4089_v23, %v4522_v46  ;;  %v744_v24 = vmul.f32 %v4553_v50, %v4553_v50  ;;  %v6983_v46 = vld [vmem:[#allocation13_spill] sm:$0xff] }
 0x4a9   : > { %3612 = vrsqrt.f32 %v610_v2  ;;  %v407_v36 = vmul.f32 0.03125, %v4309_v1  ;;  %v750_v1 = vmul.f32 %v4585_v7, %v4585_v7  ;;  %v598_v35 = vsub.f32 %v582_v22, %v590_v54  ;;  %v6993_v54 = vld [vmem:[#allocation32_spill] sm:$0xff] }
 0x4aa   : > { %3614 = vrsqrt.f32 %v436_v38  ;;  %v737_v2 = vmul.f32 0.03125, %v4346_v4  ;;  %v762_v4 = vsub.f32 %v4061_v14, %v4526_v10 }
 0x4ab   : > { %v3603_v20 = vpop.eup %3602 }
 0x4ac   : > { %v3605_v39 = vpop.eup %3604  ;;  %v4541_v5 = vmul.f32 %v3603_v20, %v426_v34  ;;  %v770_v20 = vadd.f32 1e-05, %v754_v44  ;;  %v608_v34 = vadd.f32 1e-05, %v592_v53  ;;  %v577_v44 = vmul.f32 0.03125, %v4344_v58 }
 0x4ad   : > { %v4550_v48 = vmul.f32 %v3605_v39, %v424_v0  ;;  %v752_v39 = vsub.f32 %v736_v9, %v744_v24  ;;  %v742_v0 = vmul.f32 0.03125, %v4321_v27  ;;  %v602_v27 = vsub.f32 %v4061_v14, %v4518_v56  ;;  %v6979_v9 = vld [vmem:[#allocation10_spill] sm:$0xff] }
 0x4ae   : > { %3616 = vrsqrt.f32 %v770_v20  ;;  %v585_v53 = vmul.f32 %v4598_v60, %v4598_v60  ;;  %v4618_v58 = vmul.f32 0.03125, %v6979_v9 }
 0x4af   : > { %3618 = vrsqrt.f32 %v608_v34  ;;  %v768_v62 = vadd.f32 1e-05, %v752_v39  ;;  %v758_v38 = vsub.f32 %v742_v0, %v750_v1  ;;  %v6980_v39 = vld [vmem:[#allocation11_spill] sm:$0xff]  ;;  %v6982_v1 = vld [vmem:[#allocation12_spill] sm:$0xff] }
 0x4b0   : > { %v3607_v26 = vpop.eup %3606  ;;  %v740_v22 = vmul.f32 0.03125, %v6980_v39 }
 0x4b1   : > { %v3609_v8 = vpop.eup %3608  ;;  %v4556_v63 = vmul.f32 %v3607_v26, %v427_v25  ;;  %v595_v26 = vsub.f32 %v579_v41, %v587_v43  ;;  %v4602_v25 = vmul.f32 0.03125, %v4342_v55  ;;  %3620 = vrsqrt.f32 %v768_v62 }
 0x4b2   : > { %v3611_v3 = vpop.eup %3610  ;;  %v4560_v19 = vmul.f32 %v3609_v8, %v425_v61  ;;  %v580_v8 = vmul.f32 0.03125, %v4323_v32  ;;  %v423_v61 = vsub.f32 %v407_v36, %v415_v31  ;;  %v6978_v32 = vld [vmem:[#allocation9_spill] sm:$0xff]  ;;  %v614_v31 = vadd.f32 1e-05, %v598_v35 }
 0x4b3   : > { %v4579_v51 = vmul.f32 %v3611_v3, %v430_v59  ;;  %v4613_v59 = vmul.f32 0.03125, %v6978_v32  ;;  %v611_v55 = vadd.f32 1e-05, %v595_v26  ;;  %v771_v3 = vadd.f32 1e-05, %v755_v6  ;;  %v3613_v24 = vpop.eup %3612  ;;  %v6981_v26 = vld [vmem:[#allocation8_spill] sm:$0xff] }
 0x4b4   : > { %v596_v20 = vsub.f32 %v580_v8, %v588_v42  ;;  %v745_v56 = vmul.f32 %v4602_v25, %v4602_v25  ;;  %v593_v41 = vsub.f32 %v577_v44, %v585_v53  ;;  %v3615_v34 = vpop.eup %3614  ;;  %v439_v43 = vadd.f32 1e-05, %v423_v61  ;;  %v6984_v53 = vld [vmem:[#allocation29_spill] sm:$0xff] }
 0x4b5   : > { %v413_v36 = vmul.f32 %v4613_v59, %v4613_v59  ;;  %3622 = vrsqrt.f32 %v611_v55  ;;  %v774_v0 = vadd.f32 1e-05, %v758_v38  ;;  %v626_v6 = vmul.f32 %v3613_v24, %v602_v27 }
 0x4b6   : > { %v753_v52 = vsub.f32 %v737_v2, %v745_v56  ;;  %3624 = vrsqrt.f32 %v771_v3  ;;  %v748_v8 = vmul.f32 %v4618_v58, %v4618_v58  ;;  %v612_v62 = vadd.f32 1e-05, %v596_v20  ;;  %v6985_v3 = vld [vmem:[#allocation31_spill] sm:$0xff] }
 0x4b7   : > { %v4636_v12 = vmul.f32 %v3615_v34, %v428_v11  ;;  %3626 = vrsqrt.f32 %v614_v31  ;;  %v405_v35 = vmul.f32 0.03125, %v6982_v1  ;;  %v609_v44 = vadd.f32 1e-05, %v593_v41  ;;  %v6986_v56 = vld [vmem:[#allocation15_spill] sm:$0xff]  ;;  %v6987_v31 = vld [vmem:[#allocation17_spill] sm:$0xff] }
 0x4b8   : > { %v3617_v10 = vpop.eup %3616  ;;  %v760_v61 = vsub.f32 %v4065_v15, %v4553_v50  ;;  %3628 = vrsqrt.f32 %v439_v43  ;;  %v756_v27 = vsub.f32 %v740_v22, %v748_v8  ;;  %v769_v2 = vadd.f32 1e-05, %v753_v52  ;;  %v6988_v52 = vld [vmem:[#allocation16_spill] sm:$0xff] }
 0x4b9   : > { %v3619_v42 = vpop.eup %3618  ;;  %3630 = vrsqrt.f32 %v774_v0  ;;  %v4646_v11 = vmul.f32 0.03125, %v6983_v46  ;;  %v954_v38 = vsel %vm258_vm0, %v4541_v5, %v626_v6  ;;  %v4651_v50 = vmul.f32 0.03125, %v6984_v53  ;;  %v6989_v6 = vld [vmem:[#allocation19_spill] sm:$0xff]  ;;  %v6991_v53 = vld [vmem:[#allocation20_spill] sm:$0xff] }
 0x4ba   : > { %3632 = vrsqrt.f32 %v612_v62  ;;  %v4654_v9 = vmul.f32 0.03125, %v6985_v3  ;;  %v421_v20 = vsub.f32 %v405_v35, %v413_v36  ;;  %v4657_v24 = vmul.f32 0.03125, %v6986_v56  ;;  %v6990_v36 = vld [vmem:[#allocation30_spill] sm:$0xff] }
 0x4bb   : > { %3634 = vrsqrt.f32 %v609_v44  ;;  %v583_v41 = vmul.f32 0.03125, %v6987_v31  ;;  %v786_v34 = vmul.f32 %v3617_v10, %v762_v4  ;;  %v624_v43 = vmul.f32 %v3619_v42, %v600_v33  ;;  %v3621_v22 = vpop.eup %3620 }
 0x4bc   : > { %v772_v39 = vadd.f32 1e-05, %v756_v27  ;;  %3636 = vrsqrt.f32 %v769_v2  ;;  %v591_v5 = vmul.f32 %v4646_v11, %v4646_v11  ;;  %v4663_v0 = vmul.f32 0.03125, %v6988_v52 }
 0x4bd   : > { %v581_v8 = vmul.f32 0.03125, %v6989_v6  ;;  %v4667_v62 = vmul.f32 0.03125, %v6990_v36  ;;  %v904_v4 = vmul.f32 %v4651_v50, %v4651_v50  ;;  %v905_v33 = vmul.f32 %v4654_v9, %v4654_v9 }
 0x4be   : > { %v437_v27 = vadd.f32 1e-05, %v421_v20  ;;  %v589_v2 = vmul.f32 %v4657_v24, %v4657_v24  ;;  %v599_v46 = vsub.f32 %v583_v41, %v591_v5  ;;  %v741_v3 = vmul.f32 0.03125, %v6991_v53 }
 0x4bf   : > { %v4673_v42 = vpop.eup %3622  ;;  %v784_v31 = vmul.f32 %v3621_v22, %v760_v61  ;;  %3638 = vrsqrt.f32 %v772_v39  ;;  %v749_v20 = vmul.f32 %v4663_v0, %v4663_v0  ;;  %v906_v41 = vmul.f32 %v4667_v62, %v4667_v62 }
 0x4c0   : > { %v4678_v56 = vpop.eup %3624  ;;  %v4692_v61 = vmul.f32 0.03125, %v6993_v54  ;;  %3640 = vrsqrt.f32 %v437_v27  ;;  %v952_v32 = vsel %vm258_vm0, %v4550_v48, %v624_v43  ;;  %v6995_v27 = vld [vmem:[#allocation33_spill] sm:$0xff]  ;;  %v921_v29 = vsub.f32 %v4071_v17, %v4654_v9 }
 0x4c1   : > { %v4680_v36 = vpop.eup %3626  ;;  %v757_v55 = vsub.f32 %v741_v3, %v749_v20 }
 0x4c2   : > { %v4689_v53 = vpop.eup %3628 }
 0x4dc   : > { %v866_v1 = vpop.xlane.xlu0 %865  ;;  %v869_v35 = vpop.xlane.xlu1 %868 }
 0x4dd   : > { %v896_v10 = vmul.f32 0.03125, %v866_v1  ;;  %v897_v44 = vmul.f32 0.03125, %v869_v35  ;;  %v4683_v1 = vmul.f32 0.03125, %v6992_v45  ;;  %v597_v35 = vsub.f32 %v581_v8, %v589_v2 }
 0x4de   : > { %v615_v45 = vadd.f32 1e-05, %v599_v46  ;;  %v4700_v2 = vsel %vm960_vm1, %v954_v38, %v786_v34  ;;  %v4707_v46 = vmul.f32 0.03125, %v6995_v27  ;;  %v907_v38 = vmul.f32 %v4692_v61, %v4692_v61  ;;  %v6996_v34 = vld [vmem:[#allocation34_spill] sm:$0xff] }
 0x4df   : > { %v912_v52 = vsub.f32 %v896_v10, %v904_v4  ;;  %v913_v6 = vsub.f32 %v897_v44, %v905_v33  ;;  %v4694_v33 = vpop.eup %3630  ;;  %v6994_v10 = vld [vmem:[#allocation18_spill] sm:$0xff] }
 0x4e0   : > { %v872_v5 = vpop.xlane.xlu0 %871  ;;  %v743_v44 = vmul.f32 0.03125, %v6994_v10  ;;  %v4697_v8 = vpop.eup %3632  ;;  %v4712_v10 = vmul.f32 0.03125, %v6996_v34  ;;  %v908_v34 = vmul.f32 %v4707_v46, %v4707_v46 }
 0x4e1   : > { %v928_v39 = vadd.f32 1e-05, %v912_v52  ;;  %v929_v22 = vadd.f32 1e-05, %v913_v6  ;;  %v898_v4 = vmul.f32 0.03125, %v872_v5  ;;  %v3635_v52 = vpop.eup %3634  ;;  %v751_v6 = vmul.f32 %v4683_v1, %v4683_v1 }
 0x4e2   : > { %v613_v5 = vadd.f32 1e-05, %v597_v35  ;;  %v3637_v20 = vpop.eup %3636  ;;  %v601_v35 = vsub.f32 %v4071_v17, %v4598_v60  ;;  %v909_v60 = vmul.f32 %v4712_v10, %v4712_v10 }
 0x4e3   : > { %3642 = vrsqrt.f32 %v928_v39  ;;  %v914_v54 = vsub.f32 %v898_v4, %v906_v41  ;;  %v961_v41 = vsel %vm960_vm1, %v952_v32, %v784_v31  ;;  %v759_v39 = vsub.f32 %v743_v44, %v751_v6 }
 0x4e4   : > { %3644 = vrsqrt.f32 %v929_v22  ;;  %v875_v3 = vpop.xlane.xlu0 %874  ;;  %v773_v4 = vadd.f32 1e-05, %v757_v55  ;;  %v761_v22 = vsub.f32 %v4071_v17, %v4602_v25  ;;  %v604_v17 = vsub.f32 %v4089_v23, %v4591_v57 }
 0x4e5   : > { %v930_v48 = vadd.f32 1e-05, %v914_v54  ;;  %v899_v43 = vmul.f32 0.03125, %v875_v3  ;;  %3646 = vrsqrt.f32 %v615_v45  ;;  %v4722_v54 = vmul.f32 0.03125, %v6997_v47  ;;  %v6998_v3 = vld [vmem:[#allocation36_spill] sm:$0xff]  ;;  %v4727_v45 = vpop.eup %3638 }
 0x4e6   : > { %v4725_v32 = vmul.f32 0.03125, %v6998_v3  ;;  %v920_v47 = vsub.f32 %v4065_v15, %v4651_v50  ;;  %v4733_v21 = vpop.eup %3640 }
 0x4e7   : > { %3648 = vrsqrt.f32 %v930_v48  ;;  %v915_v27 = vsub.f32 %v899_v43, %v907_v38  ;;  %v785_v38 = vmul.f32 %v3637_v20, %v761_v22  ;;  %v775_v48 = vadd.f32 1e-05, %v759_v39 }
 0x4e8   : > { %3650 = vrsqrt.f32 %v613_v5  ;;  %v878_v31 = vpop.xlane.xlu0 %877  ;;  %v881_v55 = vpop.xlane.xlu1 %880  ;;  %v625_v5 = vmul.f32 %v3635_v52, %v601_v35  ;;  %v911_v52 = vmul.f32 %v4725_v32, %v4725_v32 }
 0x4e9   : > { %v931_v25 = vadd.f32 1e-05, %v915_v27  ;;  %v900_v44 = vmul.f32 0.03125, %v878_v31  ;;  %v901_v6 = vmul.f32 0.03125, %v881_v55  ;;  %3652 = vrsqrt.f32 %v773_v4  ;;  %v4749_v31 = vld [vmem:[%s6832_s2] ss:$0 sm:$0xff] }
 0x4ea   : > { %v910_v27 = vmul.f32 %v4722_v54, %v4722_v54  ;;  %v953_v9 = vsel %vm258_vm0, %v4560_v19, %v625_v5  ;;  %v922_v19 = vsub.f32 %v4061_v14, %v4667_v62  ;;  %v4763_v5 = vld [vmem:[%s6833_s3] ss:$0 sm:$0xff]  ;;  %v6999_v62 = vsub.f32 %v4069_v16, %v4563_v30 }
 0x4eb   : > { %3654 = vrsqrt.f32 %v931_v25  ;;  %v916_v43 = vsub.f32 %v900_v44, %v908_v34  ;;  %v917_v3 = vsub.f32 %v901_v6, %v909_v60  ;;  %v962_v57 = vsel %vm960_vm1, %v953_v9, %v785_v38 }
 0x4ec   : > { %v884_v20 = vpop.xlane.xlu0 %883  ;;  %v887_v39 = vpop.xlane.xlu1 %886  ;;  %3656 = vrsqrt.f32 %v775_v48 }
 0x4ed   : > { %v3643_v15 = vpop.eup %3642  ;;  %v932_v50 = vadd.f32 1e-05, %v916_v43  ;;  %v933_v4 = vadd.f32 1e-05, %v917_v3  ;;  %v902_v35 = vmul.f32 0.03125, %v884_v20  ;;  %v903_v22 = vmul.f32 0.03125, %v887_v39 }
 0x4ee   : > { %v3645_v34 = vpop.eup %3644  ;;  %v944_v55 = vmul.f32 %v3643_v15, %v920_v47  ;;  %v627_v20 = vmul.f32 %v4673_v42, %v6999_v62  ;;  %v923_v42 = vsub.f32 %v4069_v16, %v4692_v61 }
 0x4ef   : > { %v945_v60 = vmul.f32 %v3645_v34, %v921_v29  ;;  %3658 = vrsqrt.f32 %v932_v50  ;;  %v918_v25 = vsub.f32 %v902_v35, %v910_v27  ;;  %v919_v44 = vsub.f32 %v903_v22, %v911_v52  ;;  %v4755_v6 = vpop.eup %3646 }
 0x4f0   : > { %v970_v48 = vsel %vm969_vm2, %v961_v41, %v944_v55  ;;  %3660 = vrsqrt.f32 %v933_v4  ;;  %v4766_v47 = vpop.xlane.xlu0 %1104  ;;  %v4768_v29 = vpop.xlane.xlu1 %1107  ;;  %v7000_v41 = vsub.f32 %v4069_v16, %v4571_v13  ;;  %v764_v4 = vsub.f32 %v4089_v23, %v4618_v58 }
 0x4f1   : > { %v3649_v43 = vpop.eup %3648  ;;  %v984_v3 = vmul.f32 %v4749_v31, %v970_v48  ;;  %v971_v38 = vsel %vm969_vm2, %v962_v57, %v945_v60  ;;  %v934_v27 = vadd.f32 1e-05, %v918_v25  ;;  %v935_v52 = vadd.f32 1e-05, %v919_v44 }
 0x4f2   : > { %v3651_v14 = vpop.eup %3650  ;;  %v787_v39 = vmul.f32 %v4678_v56, %v7000_v41  ;;  %v985_v15 = vmul.f32 %v4749_v31, %v971_v38  ;;  %v946_v50 = vmul.f32 %v3649_v43, %v922_v19  ;;  %v628_v35 = vmul.f32 %v4697_v8, %v604_v17 }
 0x4f3   : > { %v998_v22 = vadd.f32 %v4763_v5, %v984_v3  ;;  %3662 = vrsqrt.f32 %v934_v27  ;;  %v3653_v30 = vpop.eup %3652  ;;  %v606_v8 = vsub.f32 %v4077_v18, %v4577_v37  ;;  %v766_v17 = vsub.f32 %v4077_v18, %v4585_v7 }
 0x4f4   : > { %v999_v13 = vadd.f32 %v4763_v5, %v985_v15  ;;  %v972_v56 = vsel %vm969_vm2, %v4700_v2, %v946_v50  ;;  %3664 = vrsqrt.f32 %v935_v52  ;;  %v4790_v34 = vpop.xlane.xlu0 %1110  ;;  %v4792_v9 = vpop.xlane.xlu1 %1113  ;;  %v605_v16 = vsub.f32 %v6981_v26, %v4657_v24 }
 0x4f5   : > { %v3655_v58 = vpop.eup %3654  ;;  %1006 = vst [vmem:[%s4801_s9] sm:$0xff] %v998_v22  ;;  %v986_v61 = vmul.f32 %v4749_v31, %v972_v56  ;;  %v955_v2 = vsel %vm258_vm0, %v4556_v63, %v627_v20  ;;  %v788_v55 = vmul.f32 %v4727_v45, %v764_v4  ;;  %v765_v37 = vsub.f32 %v6981_v26, %v4663_v0 }
 0x4f6   : > { %3394 = vst [vmem:[%s4801_s9 + $0x20] sm:$0xff] %v999_v13  ;;  %v947_v7 = vmul.f32 %v3655_v58, %v923_v42  ;;  %v964_v24 = vsel %vm960_vm1, %v955_v2, %v787_v39  ;;  %v630_v60 = vmul.f32 %v4680_v36, %v606_v8  ;;  %v629_v25 = vmul.f32 %v3651_v14, %v605_v16  ;;  %v3657_v57 = vpop.eup %3656 }
 0x4f7   : > { %v1000_v44 = vadd.f32 %v4763_v5, %v986_v61  ;;  %v956_v19 = vsel %vm258_vm0, %v4636_v12, %v628_v35  ;;  %v789_v63 = vmul.f32 %v3653_v30, %v765_v37  ;;  %v924_v45 = vsub.f32 %v4089_v23, %v4707_v46 }
 0x4f8   : > { %v973_v0 = vsel %vm969_vm2, %v964_v24, %v947_v7  ;;  %v4819_v48 = vpop.xlane.xlu0 %1116  ;;  %v4821_v43 = vpop.xlane.xlu1 %1119  ;;  %v7001_v36 = vsub.f32 %v6981_v26, %v4613_v59  ;;  %v607_v27 = vsub.f32 %v4113_v28, %v4646_v11  ;;  %v925_v12 = vsub.f32 %v6981_v26, %v4712_v10 }
 0x4f9   : > { %v3659_v3 = vpop.eup %3658  ;;  %3395 = vst [vmem:[%s4801_s9 + $0x40] sm:$0xff] %v1000_v44  ;;  %v987_v23 = vmul.f32 %v4749_v31, %v973_v0  ;;  %v790_v52 = vmul.f32 %v4694_v33, %v766_v17  ;;  %v965_v14 = vsel %vm960_vm1, %v956_v19, %v788_v55  ;;  %v767_v59 = vsub.f32 %v4113_v28, %v4683_v1 }
 0x4fa   : > { %v453_v38 = vmul.f32 %v4733_v21, %v7001_v36  ;;  %v3661_v46 = vpop.eup %3660  ;;  %v948_v62 = vmul.f32 %v3659_v3, %v924_v45  ;;  %v631_v21 = vmul.f32 %v4755_v6, %v607_v27  ;;  %v926_v33 = vsub.f32 %v4077_v18, %v4722_v54 }
 0x4fb   : > { %v1001_v20 = vadd.f32 %v4763_v5, %v987_v23  ;;  %v949_v26 = vmul.f32 %v3661_v46, %v925_v12  ;;  %v791_v10 = vmul.f32 %v3657_v57, %v767_v59  ;;  %v7002_v6 = vsub.f32 %v4113_v28, %v4545_v49 }
 0x4fc   : > { %v957_v11 = vsel %vm258_vm0, %v453_v38, %v629_v25  ;;  %v974_v39 = vsel %vm969_vm2, %v965_v14, %v948_v62  ;;  %v4844_v15 = vpop.xlane.xlu0 %1122  ;;  %v4846_v50 = vpop.xlane.xlu1 %1125  ;;  %v927_v35 = vsub.f32 %v4113_v28, %v4725_v32  ;;  %v958_v30 = vsel %vm258_vm0, %v4579_v51, %v630_v60  ;;  %v7003_v62 = vld [vmem:[#allocation38_spill] sm:$0xff] }
 0x4fd   : > { %v966_v41 = vsel %vm960_vm1, %v957_v11, %v789_v63  ;;  %v3663_v1 = vpop.eup %3662  ;;  %v455_v4 = vmul.f32 %v4689_v53, %v7002_v6  ;;  %3396 = vst [vmem:[%s4801_s9 + $0x60] sm:$0xff] %v1001_v20  ;;  %v988_v22 = vmul.f32 %v4749_v31, %v974_v39  ;;  %v967_v49 = vsel %vm960_vm1, %v958_v30, %v790_v52  ;;  %v7005_v11 = vld [vmem:[#allocation39_spill] sm:$0xff]  ;;  %v7006_v20 = vld [vmem:[#allocation40_spill] sm:$0xff] }
 0x4fe   : > { %v975_v18 = vsel %vm969_vm2, %v966_v41, %v949_v26  ;;  %v3665_v54 = vpop.eup %3664  ;;  %v950_v13 = vmul.f32 %v3663_v1, %v926_v33  ;;  %v7007_v26 = vld [vmem:[#allocation41_spill] sm:$0xff]  ;;  %v7009_v41 = vld [vmem:[#allocation43_spill] sm:$0xff] }
 0x4ff   : > { %v989_v42 = vmul.f32 %v4749_v31, %v975_v18  ;;  %v959_v53 = vsel %vm258_vm0, %v455_v4, %v631_v21  ;;  %v1002_v28 = vadd.f32 %v4763_v5, %v988_v22  ;;  %v951_v32 = vmul.f32 %v3665_v54, %v927_v35  ;;  %v7004_v21 = vld [vmem:[#allocation37_spill] sm:$0xff] }
 0x500   : > { %v968_v56 = vsel %vm960_vm1, %v959_v53, %v791_v10  ;;  %v976_v8 = vsel %vm969_vm2, %v967_v49, %v950_v13  ;;  %v4866_v17 = vpop.xlane.xlu0 %1136  ;;  %v4868_v51 = vpop.xlane.xlu1 %1139  ;;  %v7008_v10 = vld [vmem:[#allocation42_spill] sm:$0xff] }
 0x501   : > { %v1003_v58 = vadd.f32 %v4763_v5, %v989_v42  ;;  %3397 = vst [vmem:[%s4801_s9 + $0x80] sm:$0xff] %v1002_v28  ;;  %v990_v16 = vmul.f32 %v4749_v31, %v976_v8  ;;  %v977_v61 = vsel %vm969_vm2, %v968_v56, %v951_v32 }
 0x502   : > { %v991_v2 = vmul.f32 %v4749_v31, %v977_v61 }
 0x503   : > { %3398 = vst [vmem:[%s4801_s9 + $0xa0] sm:$0xff] %v1003_v58  ;;  %v1004_v55 = vadd.f32 %v4763_v5, %v990_v16 }
 0x504   : > { %v1005_v37 = vadd.f32 %v4763_v5, %v991_v2  ;;  %v4877_v7 = vpop.xlane.xlu0 %1142  ;;  %v4879_v24 = vpop.xlane.xlu1 %1145 }
 0x505   : > { %3399 = vst [vmem:[%s4801_s9 + $0xc0] sm:$0xff] %v1004_v55 }
 0x506   : > { %3400 = vst [vmem:[%s4801_s9 + $0xe0] sm:$0xff] %v1005_v37 }
 0x508   : > { %v4883_v60 = vpop.xlane.xlu0 %1148  ;;  %v4885_v25 = vpop.xlane.xlu1 %1151 }
 0x50c   : > { %v4887_v44 = vpop.xlane.xlu0 %1154  ;;  %v4889_v57 = vpop.xlane.xlu1 %1157 }
 0x510   : > { %v1232_v19 = vpop.permute.xlu0 %1231  ;;  %v1234_v31 = vpop.permute.xlu1 %1233 }
 0x511   : > { %v1255_v63 = vsel %vm258_vm0, %v1232_v19, 0.0  ;;  %v1258_v5 = vsel %vm258_vm0, %v1234_v31, 0.0  ;;  %v7010_v19 = vld [vmem:[#allocation24_spill] sm:$0xff]  ;;  %v7011_v31 = vld [vmem:[#allocation21_spill] sm:$0xff] }
 0x512   : > { %1256 = vadd.xlane.f32.xlu0 %v1255_v63  ;;  %1259 = vadd.xlane.f32.xlu1 %v1258_v5  ;;  %v7012_v63 = vld [vmem:[#allocation22_spill] sm:$0xff]  ;;  %v7013_v5 = vld [vmem:[#allocation23_spill] sm:$0xff] }
 0x514   : > { %v1236_v45 = vpop.permute.xlu1 %1235  ;;  %v1240_v3 = vpop.permute.xlu0 %1239 }
 0x515   : > { %v1261_v0 = vsel %vm258_vm0, %v1236_v45, 0.0  ;;  %v1267_v12 = vsel %vm258_vm0, %v1240_v3, 0.0  ;;  %v7014_v45 = vld [vmem:[#allocation26_spill] sm:$0xff]  ;;  %v7016_v3 = vld [vmem:[#allocation25_spill] sm:$0xff] }
 0x516   : > { %1262 = vadd.xlane.f32.xlu0 %v1261_v0  ;;  %v7015_v0 = vld [vmem:[#allocation28_spill] sm:$0xff] }
 0x518   : > { %v1238_v36 = vpop.permute.xlu1 %1237  ;;  %v1244_v46 = vpop.permute.xlu0 %1243 }
 0x519   : > { %v1264_v38 = vsel %vm258_vm0, %v1238_v36, 0.0  ;;  %v1273_v14 = vsel %vm258_vm0, %v1244_v46, 0.0  ;;  %v7017_v36 = vld [vmem:[#allocation27_spill] sm:$0xff] }
 0x51a   : > { %1265 = vadd.xlane.f32.xlu0 %v1264_v38 }
 0x51c   : > { %v1242_v27 = vpop.permute.xlu1 %1241 }
 0x51d   : > { %v1270_v23 = vsel %vm258_vm0, %v1242_v27, 0.0 }
 0x51e   : > { %1268 = vadd.xlane.f32.xlu0 %v1267_v12  ;;  %1271 = vadd.xlane.f32.xlu1 %v1270_v23 }
 0x520   : > { %v1246_v52 = vpop.permute.xlu1 %1245 }
 0x521   : > { %v1276_v59 = vsel %vm258_vm0, %v1246_v52, 0.0 }
 0x522   : > { %1274 = vadd.xlane.f32.xlu0 %v1273_v14  ;;  %1277 = vadd.xlane.f32.xlu1 %v1276_v59 }
 0x533   : > { %1289 = vrot.lane.b32.xlu1 %v4449_v40, %s3944_s12 }
 0x537   : > { %1291 = vrot.lane.b32.xlu1 %v7003_v62, %s3944_s12 }
 0x538   : > { %1287 = vrot.lane.b32.xlu0 %v7004_v21, %s3944_s12 }
 0x53b   : > { %1293 = vrot.lane.b32.xlu1 %v7005_v11, %s3944_s12 }
 0x53c   : > { %1295 = vrot.lane.b32.xlu0 %v7006_v20, %s3944_s12 }
 0x53f   : > { %1297 = vrot.lane.b32.xlu1 %v7007_v26, %s3944_s12 }
 0x540   : > { %1299 = vrot.lane.b32.xlu0 %v7008_v10, %s3944_s12 }
 0x543   : > { %1301 = vrot.lane.b32.xlu1 %v7009_v41, %s3944_s12 }
 0x59f   : > { %v4915_v33 = vpop.xlane.xlu0 %1256  ;;  %v4919_v1 = vpop.xlane.xlu1 %1259 }
 0x5a3   : > { %v4917_v39 = vpop.xlane.xlu0 %1262 }
 0x5a7   : > { %v4921_v6 = vpop.xlane.xlu0 %1265 }
 0x5ab   : > { %v4923_v4 = vpop.xlane.xlu0 %1268  ;;  %v4925_v35 = vpop.xlane.xlu1 %1271 }
 0x5af   : > { %v4927_v22 = vpop.xlane.xlu0 %1274  ;;  %v4929_v18 = vpop.xlane.xlu1 %1277 }
 0x5b3   : > { %v1288_v54 = vpop.permute.xlu0 %1287  ;;  %v1290_v30 = vpop.permute.xlu1 %1289 }
 0x5b4   : > { %v1311_v42 = vsel %vm258_vm0, %v1288_v54, 0.0  ;;  %v1314_v13 = vsel %vm258_vm0, %v1290_v30, 0.0 }
 0x5b5   : > { %1312 = vadd.xlane.f32.xlu0 %v1311_v42  ;;  %1315 = vadd.xlane.f32.xlu1 %v1314_v13 }
 0x5b7   : > { %v1292_v49 = vpop.permute.xlu1 %1291  ;;  %v1296_v28 = vpop.permute.xlu0 %1295 }
 0x5b8   : > { %v1317_v53 = vsel %vm258_vm0, %v1292_v49, 0.0  ;;  %v1323_v8 = vsel %vm258_vm0, %v1296_v28, 0.0 }
 0x5b9   : > { %1318 = vadd.xlane.f32.xlu0 %v1317_v53 }
 0x5bb   : > { %v1294_v32 = vpop.permute.xlu1 %1293  ;;  %v1300_v61 = vpop.permute.xlu0 %1299 }
 0x5bc   : > { %v1320_v56 = vsel %vm258_vm0, %v1294_v32, 0.0  ;;  %v1329_v55 = vsel %vm258_vm0, %v1300_v61, 0.0 }
 0x5bd   : > { %1321 = vadd.xlane.f32.xlu0 %v1320_v56 }
 0x5bf   : > { %v1298_v58 = vpop.permute.xlu1 %1297 }
 0x5c0   : > { %v1326_v16 = vsel %vm258_vm0, %v1298_v58, 0.0 }
 0x5c1   : > { %1324 = vadd.xlane.f32.xlu0 %v1323_v8  ;;  %1327 = vadd.xlane.f32.xlu1 %v1326_v16 }
 0x5c3   : > { %v1302_v2 = vpop.permute.xlu1 %1301 }
 0x5c4   : > { %v1332_v37 = vsel %vm258_vm0, %v1302_v2, 0.0 }
 0x5c5   : > { %1330 = vadd.xlane.f32.xlu0 %v1329_v55  ;;  %1333 = vadd.xlane.f32.xlu1 %v1332_v37 }
 0x5d6   : > { %1401 = vrot.lane.b32.xlu1 %v7010_v19, %s3945_s13 }
 0x5da   : > { %1403 = vrot.lane.b32.xlu1 %v7011_v31, %s3945_s13 }
 0x5db   : > { %1399 = vrot.lane.b32.xlu0 %v7012_v63, %s3945_s13 }
 0x5de   : > { %1405 = vrot.lane.b32.xlu1 %v7013_v5, %s3945_s13 }
 0x5df   : > { %1407 = vrot.lane.b32.xlu0 %v7014_v45, %s3945_s13 }
 0x5e2   : > { %1409 = vrot.lane.b32.xlu1 %v7015_v0, %s3945_s13 }
 0x5e3   : > { %1411 = vrot.lane.b32.xlu0 %v7016_v3, %s3945_s13 }
 0x5e6   : > { %1413 = vrot.lane.b32.xlu1 %v7017_v36, %s3945_s13 }
 0x642   : > { %v4955_v38 = vpop.xlane.xlu0 %1312  ;;  %v4959_v12 = vpop.xlane.xlu1 %1315 }
 0x646   : > { %v4957_v27 = vpop.xlane.xlu0 %1318 }
 0x64a   : > { %v4961_v23 = vpop.xlane.xlu0 %1321 }
 0x64e   : > { %v4963_v46 = vpop.xlane.xlu0 %1324  ;;  %v4965_v52 = vpop.xlane.xlu1 %1327 }
 0x652   : > { %v4967_v14 = vpop.xlane.xlu0 %1330  ;;  %v4969_v59 = vpop.xlane.xlu1 %1333 }
 0x656   : > { %v1400_v54 = vpop.permute.xlu0 %1399  ;;  %v1402_v30 = vpop.permute.xlu1 %1401 }
 0x657   : > { %v1423_v42 = vsel %vm258_vm0, %v1400_v54, 0.0  ;;  %v1426_v13 = vsel %vm258_vm0, %v1402_v30, 0.0  ;;  %v3598_v54 = vld [vmem:[%s6831_s1 + $0x20] sm:$0xff]   ;;  %v3599_v30 = vld [vmem:[%s6831_s1 + $0x28] sm:$0xff]  }
 0x658   : > { %1424 = vadd.xlane.f32.xlu0 %v1423_v42  ;;  %1427 = vadd.xlane.f32.xlu1 %v1426_v13  ;;  %v7018_v42 = vld [vmem:[#allocation5_spill] sm:$0xff]  ;;  %v7019_v13 = vld [vmem:[#allocation6_spill] sm:$0xff] }
 0x659   : > { %3510 = vmatprep.subr.bf16.mxu0 %v3598_v54 }
 0x65a   : > { %v1404_v49 = vpop.permute.xlu1 %1403  ;;  %v1408_v28 = vpop.permute.xlu0 %1407  ;;  %3511 = vmatpush3.bf16.msra.mxu0 %v3598_v54 }
 0x65b   : > { %v1429_v53 = vsel %vm258_vm0, %v1404_v49, 0.0  ;;  %v1435_v8 = vsel %vm258_vm0, %v1408_v28, 0.0  ;;  %3512 = vmatprep.subr.bf16.mxu0 %v3599_v30  ;;  %v7020_v49 = vld [vmem:[#allocation7_spill] sm:$0xff] }
 0x65c   : > { %1430 = vadd.xlane.f32.xlu0 %v1429_v53 }
 0x65e   : > { %v1406_v32 = vpop.permute.xlu1 %1405  ;;  %v1412_v61 = vpop.permute.xlu0 %1411  ;;  %3513 = vmatpush3.bf16.msra.mxu0 %v3599_v30 }
 0x65f   : > { %v1432_v56 = vsel %vm258_vm0, %v1406_v32, 0.0  ;;  %v1441_v55 = vsel %vm258_vm0, %v1412_v61, 0.0 }
 0x660   : > { %1433 = vadd.xlane.f32.xlu0 %v1432_v56 }
 0x661   : > { %3515 = vmatmul.mubr.msk.bf16.vlgmr.msra.gmra.mrb[8].mxu0 %vm258_vm0, %v7018_v42 }
 0x662   : > { %v1410_v58 = vpop.permute.xlu1 %1409  ;;  %3518 = vmatprep.mubr.msk.bf16.mxu0 %vm258_vm0, %v7019_v13 }
 0x663   : > { %v1438_v16 = vsel %vm258_vm0, %v1410_v58, 0.0 }
 0x664   : > { %1436 = vadd.xlane.f32.xlu0 %v1435_v8  ;;  %1439 = vadd.xlane.f32.xlu1 %v1438_v16 }
 0x666   : > { %v1414_v2 = vpop.permute.xlu1 %1413 }
 0x667   : > { %v1444_v37 = vsel %vm258_vm0, %v1414_v2, 0.0 }
 0x668   : > { %1442 = vadd.xlane.f32.xlu0 %v1441_v55  ;;  %1445 = vadd.xlane.f32.xlu1 %v1444_v37 }
 0x669   : > { %3519 = vmatmul.mubr.msk.bf16.gmra.mrb[12].mxu0 %vm258_vm0, %v7020_v49 }
 0x679   : > { %1449 = vrot.lane.b32.xlu1 %v4449_v40, %s3945_s13 }
 0x67d   : > { %1451 = vrot.lane.b32.xlu1 %v7003_v62, %s3945_s13 }
 0x67e   : > { %1447 = vrot.lane.b32.xlu0 %v7004_v21, %s3945_s13 }
 0x681   : > { %1453 = vrot.lane.b32.xlu1 %v7005_v11, %s3945_s13 }
 0x682   : > { %1455 = vrot.lane.b32.xlu0 %v7006_v20, %s3945_s13 }
 0x685   : > { %1457 = vrot.lane.b32.xlu1 %v7007_v26, %s3945_s13 }
 0x686   : > { %1459 = vrot.lane.b32.xlu0 %v7008_v10, %s3945_s13 }
 0x689   : > { %1461 = vrot.lane.b32.xlu1 %v7009_v41, %s3945_s13 }
 0x6e5   : > { %v5007_v53 = vpop.xlane.xlu0 %1424  ;;  %v5011_v32 = vpop.xlane.xlu1 %1427 }
 0x6e9   : > { %v5009_v28 = vpop.xlane.xlu0 %1430 }
 0x6ea   : > { %7021 = vst [vmem:[#allocation9_spill] sm:$0xff] %v5009_v28 }
 0x6ed   : > { %v5013_v56 = vpop.xlane.xlu0 %1433 }
 0x6ee   : > { %7022 = vst [vmem:[#allocation10_spill] sm:$0xff] %v5013_v56 }
 0x6f1   : > { %v5015_v58 = vpop.xlane.xlu0 %1436  ;;  %v5017_v8 = vpop.xlane.xlu1 %1439 }
 0x6f2   : > { %7023 = vst [vmem:[#allocation11_spill] sm:$0xff] %v5015_v58  ;;  %7024 = vst [vmem:[#allocation8_spill] sm:$0xff] %v5017_v8 }
 0x6f5   : > { %v5019_v16 = vpop.xlane.xlu0 %1442  ;;  %v5021_v61 = vpop.xlane.xlu1 %1445 }
 0x6f6   : > { %7025 = vst [vmem:[#allocation12_spill] sm:$0xff] %v5019_v16  ;;  %7026 = vst [vmem:[#allocation13_spill] sm:$0xff] %v5021_v61 }
 0x6f9   : > { %v1448_v2 = vpop.permute.xlu0 %1447  ;;  %v1450_v55 = vpop.permute.xlu1 %1449 }
 0x6fa   : > { %v1471_v37 = vsel %vm258_vm0, %v1448_v2, 0.0  ;;  %v1474_v54 = vsel %vm258_vm0, %v1450_v55, 0.0 }
 0x6fb   : > { %1472 = vadd.xlane.f32.xlu0 %v1471_v37  ;;  %1475 = vadd.xlane.f32.xlu1 %v1474_v54 }
 0x6fd   : > { %v1452_v30 = vpop.permute.xlu1 %1451  ;;  %v1456_v13 = vpop.permute.xlu0 %1455 }
 0x6fe   : > { %v1477_v49 = vsel %vm258_vm0, %v1452_v30, 0.0  ;;  %v1483_v61 = vsel %vm258_vm0, %v1456_v13, 0.0 }
 0x6ff   : > { %1478 = vadd.xlane.f32.xlu0 %v1477_v49 }
 0x701   : > { %v1454_v42 = vpop.permute.xlu1 %1453  ;;  %v1460_v56 = vpop.permute.xlu0 %1459 }
 0x702   : > { %v1480_v8 = vsel %vm258_vm0, %v1454_v42, 0.0  ;;  %v1489_v55 = vsel %vm258_vm0, %v1460_v56, 0.0 }
 0x703   : > { %1481 = vadd.xlane.f32.xlu0 %v1480_v8 }
 0x705   : > { %v1458_v16 = vpop.permute.xlu1 %1457 }
 0x706   : > { %v1486_v58 = vsel %vm258_vm0, %v1458_v16, 0.0 }
 0x707   : > { %1484 = vadd.xlane.f32.xlu0 %v1483_v61  ;;  %1487 = vadd.xlane.f32.xlu1 %v1486_v58 }
 0x709   : > { %v1462_v2 = vpop.permute.xlu1 %1461 }
 0x70a   : > { %v1492_v37 = vsel %vm258_vm0, %v1462_v2, 0.0 }
 0x70b   : > { %1490 = vadd.xlane.f32.xlu0 %v1489_v55  ;;  %1493 = vadd.xlane.f32.xlu1 %v1492_v37 }
 0x71c   : > { %1561 = vrot.lane.b32.xlu1 %v7010_v19, %s3946_s14 }
 0x720   : > { %1563 = vrot.lane.b32.xlu1 %v7011_v31, %s3946_s14 }
 0x721   : > { %1559 = vrot.lane.b32.xlu0 %v7012_v63, %s3946_s14 }
 0x724   : > { %1565 = vrot.lane.b32.xlu1 %v7013_v5, %s3946_s14 }
 0x725   : > { %1567 = vrot.lane.b32.xlu0 %v7014_v45, %s3946_s14 }
 0x728   : > { %1569 = vrot.lane.b32.xlu1 %v7015_v0, %s3946_s14 }
 0x729   : > { %1571 = vrot.lane.b32.xlu0 %v7016_v3, %s3946_s14 }
 0x72c   : > { %1573 = vrot.lane.b32.xlu1 %v7017_v36, %s3946_s14 }
 0x788   : > { %v5047_v42 = vpop.xlane.xlu0 %1472  ;;  %v5051_v49 = vpop.xlane.xlu1 %1475 }
 0x789   : > { %7028 = vst [vmem:[#allocation31_spill] sm:$0xff] %v5051_v49 }
 0x78c   : > { %v5049_v13 = vpop.xlane.xlu0 %1478 }
 0x78d   : > { %7027 = vst [vmem:[#allocation29_spill] sm:$0xff] %v5049_v13 }
 0x790   : > { %v5053_v56 = vpop.xlane.xlu0 %1481 }
 0x791   : > { %7029 = vst [vmem:[#allocation15_spill] sm:$0xff] %v5053_v56 }
 0x794   : > { %v5055_v58 = vpop.xlane.xlu0 %1484  ;;  %v5057_v8 = vpop.xlane.xlu1 %1487 }
 0x795   : > { %7030 = vst [vmem:[#allocation17_spill] sm:$0xff] %v5055_v58  ;;  %7031 = vst [vmem:[#allocation16_spill] sm:$0xff] %v5057_v8 }
 0x798   : > { %v5059_v16 = vpop.xlane.xlu0 %1490  ;;  %v5061_v61 = vpop.xlane.xlu1 %1493 }
 0x799   : > { %7032 = vst [vmem:[#allocation19_spill] sm:$0xff] %v5059_v16  ;;  %7033 = vst [vmem:[#allocation30_spill] sm:$0xff] %v5061_v61 }
 0x79c   : > { %v1560_v54 = vpop.permute.xlu0 %1559  ;;  %v1562_v30 = vpop.permute.xlu1 %1561 }
 0x79d   : > { %v1583_v2 = vsel %vm258_vm0, %v1560_v54, 0.0  ;;  %v1586_v55 = vsel %vm258_vm0, %v1562_v30, 0.0 }
 0x79e   : > { %1584 = vadd.xlane.f32.xlu0 %v1583_v2  ;;  %1587 = vadd.xlane.f32.xlu1 %v1586_v55 }
 0x7a0   : > { %v1564_v37 = vpop.permute.xlu1 %1563  ;;  %v1568_v56 = vpop.permute.xlu0 %1567 }
 0x7a1   : > { %v1589_v13 = vsel %vm258_vm0, %v1564_v37, 0.0  ;;  %v1595_v61 = vsel %vm258_vm0, %v1568_v56, 0.0 }
 0x7a2   : > { %1590 = vadd.xlane.f32.xlu0 %v1589_v13 }
 0x7a4   : > { %v1566_v58 = vpop.permute.xlu1 %1565  ;;  %v1572_v28 = vpop.permute.xlu0 %1571 }
 0x7a5   : > { %v1592_v8 = vsel %vm258_vm0, %v1566_v58, 0.0  ;;  %v1601_v30 = vsel %vm258_vm0, %v1572_v28, 0.0  ;;  %v5083_v28 = vpop.f32.mrb[8].mxu0 }
 0x7a6   : > { %1593 = vadd.xlane.f32.xlu0 %v1592_v8  ;;  %7034 = vst [vmem:[#allocation20_spill] sm:$0xff] %v5083_v28 }
 0x7a8   : > { %v1570_v16 = vpop.permute.xlu1 %1569 }
 0x7a9   : > { %v1598_v49 = vsel %vm258_vm0, %v1570_v16, 0.0 }
 0x7aa   : > { %1596 = vadd.xlane.f32.xlu0 %v1595_v61  ;;  %1599 = vadd.xlane.f32.xlu1 %v1598_v49 }
 0x7ac   : > { %v1574_v54 = vpop.permute.xlu1 %1573 }
 0x7ad   : > { %v1604_v2 = vsel %vm258_vm0, %v1574_v54, 0.0 }
 0x7ae   : > { %1602 = vadd.xlane.f32.xlu0 %v1601_v30  ;;  %1605 = vadd.xlane.f32.xlu1 %v1604_v2 }
 0x7bf   : > { %1609 = vrot.lane.b32.xlu1 %v4449_v40, %s3946_s14  ;;  %v5087_v40 = vpop.f32.mrb[9].mxu0 }
 0x7c0   : > { %7035 = vst [vmem:[#allocation14_spill] sm:$0xff] %v5087_v40 }
 0x7c3   : > { %1611 = vrot.lane.b32.xlu1 %v7003_v62, %s3946_s14  ;;  %v5089_v62 = vpop.f32.mrb[10].mxu0 }
 0x7c4   : > { %1607 = vrot.lane.b32.xlu0 %v7004_v21, %s3946_s14  ;;  %7036 = vst [vmem:[#allocation32_spill] sm:$0xff] %v5089_v62  ;;  %v5093_v21 = vpop.f32.mrb[11].mxu0 }
 0x7c5   : > { %7037 = vst [vmem:[#allocation18_spill] sm:$0xff] %v5093_v21 }
 0x7c7   : > { %1613 = vrot.lane.b32.xlu1 %v7005_v11, %s3946_s14  ;;  %v5095_v11 = vpop.f32.mrb[12].mxu0 }
 0x7c8   : > { %1615 = vrot.lane.b32.xlu0 %v7006_v20, %s3946_s14  ;;  %7038 = vst [vmem:[#allocation33_spill] sm:$0xff] %v5095_v11  ;;  %v5097_v20 = vpop.f32.mrb[13].mxu0 }
 0x7c9   : > { %7039 = vst [vmem:[#allocation34_spill] sm:$0xff] %v5097_v20  ;;  %v5099_v13 = vpop.f32.mrb[14].mxu0 }
 0x7ca   : > { %7040 = vst [vmem:[#allocation35_spill] sm:$0xff] %v5099_v13 }
 0x7cb   : > { %1617 = vrot.lane.b32.xlu1 %v7007_v26, %s3946_s14  ;;  %v5101_v26 = vpop.f32.mrb[15].mxu0 }
 0x7cc   : > { %1619 = vrot.lane.b32.xlu0 %v7008_v10, %s3946_s14  ;;  %7041 = vst [vmem:[#allocation36_spill] sm:$0xff] %v5101_v26 }
 0x7cf   : > { %1621 = vrot.lane.b32.xlu1 %v7009_v41, %s3946_s14 }
 0x82b   : > { %v5103_v49 = vpop.xlane.xlu0 %1584  ;;  %v5107_v56 = vpop.xlane.xlu1 %1587 }
 0x82c   : > { %7042 = vst [vmem:[#allocation38_spill] sm:$0xff] %v5103_v49  ;;  %7044 = vst [vmem:[#allocation39_spill] sm:$0xff] %v5107_v56 }
 0x82f   : > { %v5105_v10 = vpop.xlane.xlu0 %1590 }
 0x830   : > { %7043 = vst [vmem:[#allocation37_spill] sm:$0xff] %v5105_v10 }
 0x833   : > { %v5109_v58 = vpop.xlane.xlu0 %1593 }
 0x834   : > { %7045 = vst [vmem:[#allocation40_spill] sm:$0xff] %v5109_v58 }
 0x837   : > { %v5111_v8 = vpop.xlane.xlu0 %1596  ;;  %v5113_v41 = vpop.xlane.xlu1 %1599 }
 0x838   : > { %7046 = vst [vmem:[#allocation41_spill] sm:$0xff] %v5111_v8  ;;  %7047 = vst [vmem:[#allocation42_spill] sm:$0xff] %v5113_v41 }
 0x83b   : > { %v5115_v16 = vpop.xlane.xlu0 %1602  ;;  %v5117_v61 = vpop.xlane.xlu1 %1605 }
 0x83c   : > { %7048 = vst [vmem:[#allocation43_spill] sm:$0xff] %v5115_v16  ;;  %7049 = vst [vmem:[#allocation24_spill] sm:$0xff] %v5117_v61 }
 0x83f   : > { %v1608_v55 = vpop.permute.xlu0 %1607  ;;  %v1610_v37 = vpop.permute.xlu1 %1609 }
 0x840   : > { %v1631_v54 = vsel %vm258_vm0, %v1608_v55, 0.0  ;;  %v1634_v30 = vsel %vm258_vm0, %v1610_v37, 0.0 }
 0x841   : > { %1632 = vadd.xlane.f32.xlu0 %v1631_v54  ;;  %1635 = vadd.xlane.f32.xlu1 %v1634_v30  ;;  %v5145_v30 = vmul.f32 %v5087_v40, %v5087_v40 }
 0x843   : > { %v1612_v2 = vpop.permute.xlu1 %1611  ;;  %v1616_v58 = vpop.permute.xlu0 %1615  ;;  %7050 = vst [vmem:[#allocation21_spill] sm:$0xff] %v5145_v30 }
 0x844   : > { %v1637_v10 = vsel %vm258_vm0, %v1612_v2, 0.0  ;;  %v1643_v61 = vsel %vm258_vm0, %v1616_v58, 0.0  ;;  %v1863_v58 = vsel %vm258_vm0, %v5083_v28, 0.0  ;;  %v5149_v2 = vmul.f32 %v5093_v21, %v5093_v21 }
 0x845   : > { %1638 = vadd.xlane.f32.xlu0 %v1637_v10  ;;  %v1857_v10 = vsel %vm258_vm0, %v5087_v40, 0.0 }
 0x846   : > { %7051 = vst [vmem:[#allocation22_spill] sm:$0xff] %v5149_v2 }
 0x847   : > { %v1614_v8 = vpop.permute.xlu1 %1613  ;;  %v1620_v49 = vpop.permute.xlu0 %1619 }
 0x848   : > { %v1640_v41 = vsel %vm258_vm0, %v1614_v8, 0.0  ;;  %v1649_v37 = vsel %vm258_vm0, %v1620_v49, 0.0  ;;  %v1860_v8 = vsel %vm258_vm0, %v5093_v21, 0.0  ;;  %v1869_v49 = vsel %vm258_vm0, %v5097_v20, 0.0 }
 0x849   : > { %1641 = vadd.xlane.f32.xlu0 %v1640_v41  ;;  %v1872_v41 = vsel %vm258_vm0, %v5101_v26, 0.0 }
 0x84b   : > { %v1618_v16 = vpop.permute.xlu1 %1617 }
 0x84c   : > { %v1646_v56 = vsel %vm258_vm0, %v1618_v16, 0.0  ;;  %v1875_v16 = vsel %vm258_vm0, %v5095_v11, 0.0 }
 0x84d   : > { %1644 = vadd.xlane.f32.xlu0 %v1643_v61  ;;  %1647 = vadd.xlane.f32.xlu1 %v1646_v56  ;;  %v1866_v56 = vsel %vm258_vm0, %v5089_v62, 0.0  ;;  %v1878_v61 = vsel %vm258_vm0, %v5099_v13, 0.0 }
 0x84f   : > { %v1622_v55 = vpop.permute.xlu1 %1621 }
 0x850   : > { %v1652_v54 = vsel %vm258_vm0, %v1622_v55, 0.0  ;;  %v1889_v55 = vsel %vm258_vm0, %v5145_v30, 0.0 }
 0x851   : > { %1650 = vadd.xlane.f32.xlu0 %v1649_v37  ;;  %1653 = vadd.xlane.f32.xlu1 %v1652_v54  ;;  %v1892_v37 = vsel %vm258_vm0, %v5149_v2, 0.0  ;;  %v5157_v54 = vmul.f32 %v5083_v28, %v5083_v28 }
 0x853   : > { %7052 = vst [vmem:[#allocation23_spill] sm:$0xff] %v5157_v54 }
 0x855   : > { %1858 = vadd.xlane.f32.xlu0 %v1857_v10  ;;  %1861 = vadd.xlane.f32.xlu1 %v1860_v8  ;;  %v5161_v10 = vmul.f32 %v5089_v62, %v5089_v62  ;;  %v1895_v8 = vsel %vm258_vm0, %v5157_v54, 0.0 }
 0x857   : > { %7053 = vst [vmem:[#allocation26_spill] sm:$0xff] %v5161_v10 }
 0x859   : > { %1864 = vadd.xlane.f32.xlu0 %v1863_v58  ;;  %1867 = vadd.xlane.f32.xlu1 %v1866_v56  ;;  %v1898_v58 = vsel %vm258_vm0, %v5161_v10, 0.0  ;;  %v5169_v56 = vmul.f32 %v5097_v20, %v5097_v20 }
 0x85b   : > { %7054 = vst [vmem:[#allocation28_spill] sm:$0xff] %v5169_v56 }
 0x85d   : > { %1870 = vadd.xlane.f32.xlu0 %v1869_v49  ;;  %1873 = vadd.xlane.f32.xlu1 %v1872_v41  ;;  %v5173_v49 = vmul.f32 %v5101_v26, %v5101_v26  ;;  %v1901_v41 = vsel %vm258_vm0, %v5169_v56, 0.0 }
 0x85f   : > { %7055 = vst [vmem:[#allocation25_spill] sm:$0xff] %v5173_v49 }
 0x861   : > { %1876 = vadd.xlane.f32.xlu0 %v1875_v16  ;;  %1879 = vadd.xlane.f32.xlu1 %v1878_v61  ;;  %v1904_v16 = vsel %vm258_vm0, %v5173_v49, 0.0  ;;  %v5181_v61 = vmul.f32 %v5095_v11, %v5095_v11 }
 0x863   : > { %7056 = vst [vmem:[#allocation27_spill] sm:$0xff] %v5181_v61 }
 0x865   : > { %1890 = vadd.xlane.f32.xlu0 %v1889_v55  ;;  %1893 = vadd.xlane.f32.xlu1 %v1892_v37  ;;  %v5185_v55 = vmul.f32 %v5099_v13, %v5099_v13  ;;  %v1907_v37 = vsel %vm258_vm0, %v5181_v61, 0.0 }
 0x867   : > { %7057 = vst [vmem:[#allocation44_spill] sm:$0xff] %v5185_v55 }
 0x869   : > { %1896 = vadd.xlane.f32.xlu0 %v1895_v8  ;;  %1899 = vadd.xlane.f32.xlu1 %v1898_v58  ;;  %v1910_v8 = vsel %vm258_vm0, %v5185_v55, 0.0  ;;  %v5208_v58 = vmul.f32 0.03125, %v4766_v47  ;;  %v1169_v47 = vmul.f32 0.03125, %v4877_v7 }
 0x86d   : > { %1902 = vadd.xlane.f32.xlu0 %v1901_v41  ;;  %1905 = vadd.xlane.f32.xlu1 %v1904_v16  ;;  %v5211_v41 = vmul.f32 0.03125, %v4768_v29  ;;  %v5214_v16 = vmul.f32 0.03125, %v4790_v34  ;;  %v1170_v34 = vmul.f32 0.03125, %v4879_v24 }
 0x86f   : > { %v1176_v29 = vmul.f32 %v5211_v41, %v5211_v41 }
 0x871   : > { %1908 = vadd.xlane.f32.xlu0 %v1907_v37  ;;  %1911 = vadd.xlane.f32.xlu1 %v1910_v8  ;;  %v1167_v37 = vmul.f32 0.03125, %v4866_v17  ;;  %v5218_v8 = vmul.f32 0.03125, %v4792_v9  ;;  %v1177_v17 = vmul.f32 %v5214_v16, %v5214_v16  ;;  %v5233_v9 = vmul.f32 0.03125, %v4821_v43 }
 0x882   : > { %1987 = vrot.lane.b32.xlu1 %v5093_v21, %s3944_s12  ;;  %v1180_v21 = vmul.f32 %v5233_v9, %v5233_v9 }
 0x886   : > { %1989 = vrot.lane.b32.xlu1 %v5083_v28, %s3944_s12  ;;  %v1172_v28 = vmul.f32 0.03125, %v4885_v25  ;;  %v5251_v25 = vmul.f32 0.03125, %v4844_v15 }
 0x887   : > { %1985 = vrot.lane.b32.xlu0 %v5087_v40, %s3944_s12  ;;  %v1185_v40 = vsub.f32 %v1169_v47, %v1177_v17  ;;  %v5248_v47 = vmul.f32 0.03125, %v4919_v1  ;;  %v1174_v1 = vmul.f32 0.03125, %v4889_v57 }
 0x889   : > { %v1352_v15 = vmul.f32 %v5248_v47, %v5248_v47 }
 0x88a   : > { %1991 = vrot.lane.b32.xlu1 %v5089_v62, %s3944_s12 }
 0x88b   : > { %1993 = vrot.lane.b32.xlu0 %v5097_v20, %s3944_s12  ;;  %v1171_v20 = vmul.f32 0.03125, %v4883_v60  ;;  %v1201_v60 = vadd.f32 1e-05, %v1185_v40  ;;  %v1344_v40 = vmul.f32 0.03125, %v4959_v12 }
 0x88d   : > { %v1360_v12 = vsub.f32 %v1344_v40, %v1352_v15  ;;  %v5289_v40 = vmul.f32 0.03125, %v4923_v4  ;;  %v1347_v15 = vmul.f32 0.03125, %v4963_v46 }
 0x88e   : > { %1995 = vrot.lane.b32.xlu1 %v5101_v26, %s3944_s12  ;;  %v1168_v26 = vmul.f32 0.03125, %v4868_v51 }
 0x88f   : > { %1997 = vrot.lane.b32.xlu0 %v5095_v11, %s3944_s12  ;;  %v1175_v11 = vmul.f32 %v5208_v58, %v5208_v58 }
 0x890   : > { %v1184_v62 = vsub.f32 %v1168_v26, %v1176_v29  ;;  %v1343_v26 = vmul.f32 0.03125, %v4955_v38  ;;  %v1173_v38 = vmul.f32 0.03125, %v4887_v44  ;;  %v1345_v44 = vmul.f32 0.03125, %v4957_v27 }
 0x891   : > { %v1183_v51 = vsub.f32 %v1167_v37, %v1175_v11  ;;  %v5244_v11 = vmul.f32 0.03125, %v4915_v33  ;;  %v1188_v37 = vsub.f32 %v1172_v28, %v1180_v21  ;;  %v5256_v33 = vmul.f32 0.03125, %v4846_v50 }
 0x892   : > { %1999 = vrot.lane.b32.xlu1 %v5099_v13, %s3944_s12  ;;  %v5224_v13 = vmul.f32 0.03125, %v4819_v48  ;;  %v1178_v48 = vmul.f32 %v5218_v8, %v5218_v8  ;;  %v1200_v61 = vadd.f32 1e-05, %v1184_v62  ;;  %v1181_v50 = vmul.f32 %v5251_v25, %v5251_v25 }
 0x893   : > { %v1199_v55 = vadd.f32 1e-05, %v1183_v51  ;;  %v1351_v62 = vmul.f32 %v5244_v11, %v5244_v11  ;;  %v1204_v28 = vadd.f32 1e-05, %v1188_v37  ;;  %v1376_v51 = vadd.f32 1e-05, %v1360_v12 }
 0x894   : > { %v1179_v7 = vmul.f32 %v5224_v13, %v5224_v13  ;;  %v1186_v24 = vsub.f32 %v1170_v34, %v1178_v48  ;;  %v1193_v27 = vsub.f32 %v7011_v31, %v5214_v16  ;;  %v1355_v12 = vmul.f32 %v5289_v40, %v5289_v40 }
 0x895   : > { %3666 = vrsqrt.f32 %v1199_v55  ;;  %v1359_v21 = vsub.f32 %v1343_v26, %v1351_v62  ;;  %v5280_v26 = vmul.f32 0.03125, %v4921_v6  ;;  %v1194_v62 = vsub.f32 %v7013_v5, %v5218_v8 }
 0x896   : > { %v1187_v43 = vsub.f32 %v1171_v20, %v1179_v7  ;;  %v1202_v49 = vadd.f32 1e-05, %v1186_v24  ;;  %3668 = vrsqrt.f32 %v1200_v61  ;;  %v5264_v20 = vmul.f32 0.03125, %v4917_v39 }
 0x897   : > { %3670 = vrsqrt.f32 %v1201_v60  ;;  %v1182_v61 = vmul.f32 %v5256_v33, %v5256_v33  ;;  %v1375_v55 = vadd.f32 1e-05, %v1359_v21  ;;  %v1191_v7 = vsub.f32 %v7012_v63, %v5208_v58 }
 0x898   : > { %v1203_v29 = vadd.f32 1e-05, %v1187_v43  ;;  %3672 = vrsqrt.f32 %v1202_v49  ;;  %v1189_v49 = vsub.f32 %v1173_v38, %v1181_v50  ;;  %v1353_v57 = vmul.f32 %v5264_v20, %v5264_v20 }
 0x899   : > { %v1190_v34 = vsub.f32 %v1174_v1, %v1182_v61  ;;  %v1192_v60 = vsub.f32 %v7010_v19, %v5211_v41  ;;  %v1195_v58 = vsub.f32 %v7014_v45, %v5224_v13  ;;  %v1346_v38 = vmul.f32 0.03125, %v4961_v23 }
 0x89a   : > { %3674 = vrsqrt.f32 %v1203_v29  ;;  %v1361_v39 = vsub.f32 %v1345_v44, %v1353_v57  ;;  %v1205_v24 = vadd.f32 1e-05, %v1189_v49  ;;  %v1354_v4 = vmul.f32 %v5280_v26, %v5280_v26 }
 0x89b   : > { %3676 = vrsqrt.f32 %v1204_v28  ;;  %v1206_v37 = vadd.f32 1e-05, %v1190_v34  ;;  %v1196_v28 = vsub.f32 %v7015_v0, %v5233_v9  ;;  %v5301_v9 = vmul.f32 0.03125, %v4925_v35 }
 0x89c   : > { %3678 = vrsqrt.f32 %v1375_v55  ;;  %v1377_v6 = vadd.f32 1e-05, %v1361_v39  ;;  %v5313_v44 = vmul.f32 0.03125, %v4927_v22  ;;  %v1362_v49 = vsub.f32 %v1346_v38, %v1354_v4  ;;  %v7061_v4 = vld [vmem:[#allocation29_spill] sm:$0xff] }
 0x89d   : > { %3680 = vrsqrt.f32 %v1376_v51  ;;  %v1348_v55 = vmul.f32 0.03125, %v4965_v52  ;;  %v1367_v46 = vsub.f32 %v7012_v63, %v5244_v11  ;;  %v1368_v34 = vsub.f32 %v7010_v19, %v5248_v47 }
 0x89e   : > { %3682 = vrsqrt.f32 %v1205_v24  ;;  %v5323_v57 = vmul.f32 0.03125, %v5007_v53  ;;  %v5328_v22 = vmul.f32 0.03125, %v4929_v18  ;;  %v1363_v51 = vsub.f32 %v1347_v15, %v1355_v12 }
 0x89f   : > { %v3667_v17 = vpop.eup %3666  ;;  %3684 = vrsqrt.f32 %v1206_v37  ;;  %v1349_v52 = vmul.f32 0.03125, %v4967_v14  ;;  %v5336_v47 = vmul.f32 0.03125, %v5011_v32  ;;  %v1503_v53 = vmul.f32 0.03125, %v5047_v42  ;;  %v7059_v32 = vld [vmem:[#allocation31_spill] sm:$0xff] }
 0x8a0   : > { %v3669_v48 = vpop.eup %3668  ;;  %v1215_v21 = vmul.f32 %v3667_v17, %v1191_v7  ;;  %3686 = vrsqrt.f32 %v1377_v6  ;;  %v1356_v17 = vmul.f32 %v5301_v9, %v5301_v9  ;;  %v1357_v7 = vmul.f32 %v5313_v44, %v5313_v44  ;;  %v7060_v6 = vld [vmem:[#allocation10_spill] sm:$0xff] }
 0x8a1   : > { %v3671_v43 = vpop.eup %3670  ;;  %v5296_v1 = vmul.f32 %v3669_v48, %v1192_v60  ;;  %v1369_v48 = vsub.f32 %v7011_v31, %v5264_v20  ;;  %v1378_v18 = vadd.f32 1e-05, %v1362_v49  ;;  %v1511_v20 = vmul.f32 %v5323_v57, %v5323_v57  ;;  %v7058_v60 = vld [vmem:[#allocation9_spill] sm:$0xff] }
 0x8a2   : > { %v3673_v29 = vpop.eup %3672  ;;  %v5304_v50 = vmul.f32 %v3671_v43, %v1193_v27  ;;  %v1364_v24 = vsub.f32 %v1348_v55, %v1356_v17  ;;  %v1350_v43 = vmul.f32 0.03125, %v4969_v59  ;;  %v5347_v27 = vmul.f32 0.03125, %v7058_v60 }
 0x8a3   : > { %v5306_v23 = vmul.f32 %v3673_v29, %v1194_v62  ;;  %v1504_v37 = vmul.f32 0.03125, %v7059_v32  ;;  %v1358_v42 = vmul.f32 %v5328_v22, %v5328_v22  ;;  %v1512_v59 = vmul.f32 %v5336_v47, %v5336_v47 }
 0x8a4   : > { %v3675_v41 = vpop.eup %3674  ;;  %v5357_v38 = vmul.f32 0.03125, %v7060_v6  ;;  %v1505_v15 = vmul.f32 0.03125, %v7061_v4  ;;  %3688 = vrsqrt.f32 %v1378_v18  ;;  %v1380_v55 = vadd.f32 1e-05, %v1364_v24  ;;  %v7065_v6 = vld [vmem:[#allocation8_spill] sm:$0xff] }
 0x8a5   : > { %v3677_v13 = vpop.eup %3676  ;;  %v5308_v61 = vmul.f32 %v3675_v41, %v1195_v58  ;;  %v1379_v58 = vadd.f32 1e-05, %v1363_v51  ;;  %v1513_v51 = vmul.f32 %v5347_v27, %v5347_v27  ;;  %v5371_v4 = vmul.f32 0.03125, %v7065_v6  ;;  %v7068_v6 = vld [vmem:[#allocation17_spill] sm:$0xff] }
 0x8a6   : > { %v5316_v35 = vmul.f32 %v3677_v13, %v1196_v28  ;;  %v3679_v39 = vpop.eup %3678  ;;  %v1365_v28 = vsub.f32 %v1349_v52, %v1357_v7  ;;  %v1519_v13 = vsub.f32 %v1503_v53, %v1511_v20  ;;  %v1520_v52 = vsub.f32 %v1504_v37, %v1512_v59  ;;  %v7064_v20 = vld [vmem:[#allocation11_spill] sm:$0xff] }
 0x8a7   : > { %v3681_v29 = vpop.eup %3680  ;;  %v1391_v62 = vmul.f32 %v3679_v39, %v1367_v46  ;;  %v1366_v46 = vsub.f32 %v1350_v43, %v1358_v42  ;;  %v7063_v39 = vld [vmem:[#allocation15_spill] sm:$0xff]  ;;  %3690 = vrsqrt.f32 %v1379_v58  ;;  %v5368_v32 = vmul.f32 0.03125, %v7064_v20 }
 0x8a8   : > { %v5352_v41 = vpop.eup %3682  ;;  %v1392_v17 = vmul.f32 %v3681_v29, %v1368_v34  ;;  %v1506_v7 = vmul.f32 0.03125, %v7063_v39  ;;  %v1381_v53 = vadd.f32 1e-05, %v1365_v28  ;;  %v1514_v34 = vmul.f32 %v5357_v38, %v5357_v38  ;;  %v7066_v29 = vld [vmem:[#allocation38_spill] sm:$0xff]  ;;  %v7067_v58 = vld [vmem:[#allocation39_spill] sm:$0xff] }
 0x8a9   : > { %v5360_v12 = vpop.eup %3684  ;;  %v5374_v18 = vsel %vm258_vm0, %v1215_v21, %v1391_v62  ;;  %v1535_v24 = vadd.f32 1e-05, %v1519_v13  ;;  %v1521_v43 = vsub.f32 %v1505_v15, %v1513_v51  ;;  %3692 = vrsqrt.f32 %v1380_v55  ;;  %v7069_v13 = vld [vmem:[#allocation12_spill] sm:$0xff] }
 0x8aa   : > { %7062 = vst [vmem:[#allocation9_spill] sm:$0xff] %v5360_v12  ;;  %v3687_v60 = vpop.eup %3686  ;;  %v1382_v37 = vadd.f32 1e-05, %v1366_v46  ;;  %v5379_v42 = vmul.f32 0.03125, %v7066_v29  ;;  %v5382_v28 = vmul.f32 0.03125, %v7067_v58  ;;  %v1522_v20 = vsub.f32 %v1506_v7, %v1514_v34  ;;  %v7070_v46 = vld [vmem:[#allocation16_spill] sm:$0xff] }
 0x8ab   : > { %v1393_v59 = vmul.f32 %v3687_v60, %v1369_v48  ;;  %v1536_v39 = vadd.f32 1e-05, %v1520_v52  ;;  %v1507_v8 = vmul.f32 0.03125, %v7068_v6  ;;  %3694 = vrsqrt.f32 %v1381_v53  ;;  %v7071_v29 = vld [vmem:[#allocation37_spill] sm:$0xff] }
 0x8ac   : > { %v1515_v21 = vmul.f32 %v5368_v32, %v5368_v32  ;;  %v1516_v62 = vmul.f32 %v5371_v4, %v5371_v4  ;;  %v5390_v15 = vmul.f32 0.03125, %v7069_v13  ;;  %3696 = vrsqrt.f32 %v1535_v24  ;;  %v7072_v24 = vld [vmem:[#allocation19_spill] sm:$0xff] }
 0x8ad   : > { %v1537_v55 = vadd.f32 1e-05, %v1521_v43  ;;  %v1508_v51 = vmul.f32 0.03125, %v7070_v46  ;;  %v5394_v48 = vmul.f32 0.03125, %v7071_v29  ;;  %v1671_v60 = vmul.f32 %v5379_v42, %v5379_v42  ;;  %v7073_v46 = vld [vmem:[#allocation13_spill] sm:$0xff] }
 0x8ae   : > { %v1672_v53 = vmul.f32 %v5382_v28, %v5382_v28  ;;  %3698 = vrsqrt.f32 %v1536_v39  ;;  %v1538_v6 = vadd.f32 1e-05, %v1522_v20  ;;  %v1523_v13 = vsub.f32 %v1507_v8, %v1515_v21  ;;  %v5401_v49 = vpop.eup %3688  ;;  %v7074_v21 = vld [vmem:[#allocation40_spill] sm:$0xff] }
 0x8af   : > { %v1509_v43 = vmul.f32 0.03125, %v7072_v24  ;;  %3700 = vrsqrt.f32 %v1382_v37  ;;  %v5404_v29 = vmul.f32 0.03125, %v7073_v46  ;;  %v1517_v11 = vmul.f32 %v5390_v15, %v5390_v15 }
 0x8b0   : > { %3702 = vrsqrt.f32 %v1537_v55  ;;  %v1524_v56 = vsub.f32 %v1508_v51, %v1516_v62  ;;  %v1673_v39 = vmul.f32 %v5394_v48, %v5394_v48  ;;  %v5420_v62 = vsel %vm258_vm0, %v5296_v1, %v1392_v17  ;;  %v7077_v17 = vld [vmem:[#allocation42_spill] sm:$0xff] }
 0x8b1   : > { %v5410_v8 = vpop.eup %3690  ;;  %3704 = vrsqrt.f32 %v1538_v6  ;;  %v5424_v55 = vsel %vm258_vm0, %v5304_v50, %v1393_v59  ;;  %v7076_v6 = vld [vmem:[#allocation41_spill] sm:$0xff]  ;;  %v1687_v12 = vsub.f32 %v7012_v63, %v5379_v42 }
 0x8b3   : > { %v5416_v46 = vpop.eup %3692 }
 0x8ce   : > { %v1633_v52 = vpop.xlane.xlu0 %1632  ;;  %v1636_v7 = vpop.xlane.xlu1 %1635 }
 0x8cf   : > { %v1663_v34 = vmul.f32 0.03125, %v1633_v52  ;;  %v1664_v58 = vmul.f32 0.03125, %v1636_v7  ;;  %v5413_v52 = vmul.f32 0.03125, %v7074_v21  ;;  %v1527_v21 = vsub.f32 %v7012_v63, %v5323_v57  ;;  %v7079_v57 = vld [vmem:[#allocation24_spill] sm:$0xff] }
 0x8d1   : > { %v1679_v16 = vsub.f32 %v1663_v34, %v1671_v60  ;;  %v1680_v14 = vsub.f32 %v1664_v58, %v1672_v53  ;;  %v1539_v60 = vadd.f32 1e-05, %v1523_v13  ;;  %v1525_v53 = vsub.f32 %v1509_v43, %v1517_v11  ;;  %v7075_v34 = vld [vmem:[#allocation30_spill] sm:$0xff]  ;;  %v5431_v43 = vpop.eup %3694 }
 0x8d2   : > { %v1639_v20 = vpop.xlane.xlu0 %1638  ;;  %v1510_v58 = vmul.f32 0.03125, %v7075_v34  ;;  %v5429_v11 = vmul.f32 0.03125, %v7076_v6  ;;  %v1674_v1 = vmul.f32 %v5413_v52, %v5413_v52 }
 0x8d3   : > { %v1695_v37 = vadd.f32 1e-05, %v1679_v16  ;;  %v1696_v7 = vadd.f32 1e-05, %v1680_v14  ;;  %v1665_v24 = vmul.f32 0.03125, %v1639_v20  ;;  %v1518_v16 = vmul.f32 %v5404_v29, %v5404_v29 }
 0x8d4   : > { %v1540_v14 = vadd.f32 1e-05, %v1524_v56  ;;  %v5436_v20 = vmul.f32 0.03125, %v7077_v17  ;;  %v1541_v56 = vadd.f32 1e-05, %v1525_v53 }
 0x8d5   : > { %3706 = vrsqrt.f32 %v1695_v37  ;;  %v1681_v51 = vsub.f32 %v1665_v24, %v1673_v39  ;;  %v3697_v39 = vpop.eup %3696  ;;  %v1526_v37 = vsub.f32 %v1510_v58, %v1518_v16  ;;  %v1529_v24 = vsub.f32 %v7011_v31, %v5347_v27 }
 0x8d6   : > { %3708 = vrsqrt.f32 %v1696_v7  ;;  %v1642_v13 = vpop.xlane.xlu0 %1641  ;;  %v1528_v7 = vsub.f32 %v7010_v19, %v5336_v47  ;;  %v3699_v6 = vpop.eup %3698  ;;  %v1676_v47 = vmul.f32 %v5436_v20, %v5436_v20  ;;  %v1551_v10 = vmul.f32 %v3697_v39, %v1527_v21 }
 0x8d7   : > { %v1697_v50 = vadd.f32 1e-05, %v1681_v51  ;;  %v1666_v59 = vmul.f32 0.03125, %v1642_v13  ;;  %3710 = vrsqrt.f32 %v1539_v60  ;;  %v1675_v51 = vmul.f32 %v5429_v11, %v5429_v11  ;;  %v7078_v13 = vld [vmem:[#allocation43_spill] sm:$0xff]  ;;  %v5452_v16 = vpop.eup %3700 }
 0x8d8   : > { %v5447_v17 = vmul.f32 0.03125, %v7078_v13  ;;  %v5450_v60 = vmul.f32 0.03125, %v7079_v57  ;;  %v1542_v13 = vadd.f32 1e-05, %v1526_v37  ;;  %v1552_v30 = vmul.f32 %v3699_v6, %v1528_v7 }
 0x8d9   : > { %3712 = vrsqrt.f32 %v1697_v50  ;;  %v1682_v34 = vsub.f32 %v1666_v59, %v1674_v1  ;;  %v1530_v59 = vsub.f32 %v7013_v5, %v5357_v38  ;;  %v1727_v63 = vsel %vm960_vm1, %v5374_v18, %v1551_v10 }
 0x8da   : > { %3714 = vrsqrt.f32 %v1540_v14  ;;  %v1645_v53 = vpop.xlane.xlu0 %1644  ;;  %v1648_v58 = vpop.xlane.xlu1 %1647  ;;  %v1678_v38 = vmul.f32 %v5450_v60, %v5450_v60 }
 0x8db   : > { %v1698_v27 = vadd.f32 1e-05, %v1682_v34  ;;  %v1667_v1 = vmul.f32 0.03125, %v1645_v53  ;;  %v1668_v50 = vmul.f32 0.03125, %v1648_v58  ;;  %v3703_v14 = vpop.eup %3702  ;;  %3716 = vrsqrt.f32 %v1541_v56 }
 0x8dc   : > { %v3705_v2 = vpop.eup %3704  ;;  %v1688_v34 = vsub.f32 %v7010_v19, %v5382_v28  ;;  %v1677_v53 = vmul.f32 %v5447_v17, %v5447_v17  ;;  %v1553_v42 = vmul.f32 %v3703_v14, %v1529_v24 }
 0x8dd   : > { %3718 = vrsqrt.f32 %v1698_v27  ;;  %v1683_v57 = vsub.f32 %v1667_v1, %v1675_v51  ;;  %v1684_v54 = vsub.f32 %v1668_v50, %v1676_v47  ;;  %v1728_v50 = vsel %vm960_vm1, %v5420_v62, %v1552_v30 }
 0x8de   : > { %v1651_v39 = vpop.xlane.xlu0 %1650  ;;  %v1654_v21 = vpop.xlane.xlu1 %1653  ;;  %3720 = vrsqrt.f32 %v1542_v13 }
 0x8df   : > { %v3707_v56 = vpop.eup %3706  ;;  %v1699_v37 = vadd.f32 1e-05, %v1683_v57  ;;  %v1700_v7 = vadd.f32 1e-05, %v1684_v54  ;;  %v1669_v6 = vmul.f32 0.03125, %v1651_v39  ;;  %v1670_v51 = vmul.f32 0.03125, %v1654_v21 }
 0x8e0   : > { %v3709_v58 = vpop.eup %3708  ;;  %v1711_v19 = vmul.f32 %v3707_v56, %v1687_v12  ;;  %v1689_v54 = vsub.f32 %v7011_v31, %v5394_v48  ;;  %v5480_v12 = vld [vmem:[%s6832_s2] ss:$0 sm:$0xff]  ;;  %v7080_v48 = vsub.f32 %v7013_v5, %v5280_v26  ;;  %v1729_v56 = vsel %vm960_vm1, %v5424_v55, %v1553_v42 }
 0x8e1   : > { %v1712_v28 = vmul.f32 %v3709_v58, %v1688_v34  ;;  %3722 = vrsqrt.f32 %v1699_v37  ;;  %v1685_v47 = vsub.f32 %v1669_v6, %v1677_v53  ;;  %v1686_v27 = vsub.f32 %v1670_v51, %v1678_v38  ;;  %v3711_v1 = vpop.eup %3710 }
 0x8e2   : > { %v1735_v57 = vsel %vm969_vm2, %v1727_v63, %v1711_v19  ;;  %3724 = vrsqrt.f32 %v1700_v7  ;;  %v5473_v39 = vpop.xlane.xlu0 %1858  ;;  %v5475_v10 = vpop.xlane.xlu1 %1861  ;;  %v1394_v13 = vmul.f32 %v5401_v49, %v7080_v48  ;;  %v7081_v34 = vsub.f32 %v7014_v45, %v5289_v40  ;;  %v5498_v7 = vld [vmem:[%s6833_s3] ss:$0 sm:$0xff] }
 0x8e3   : > { %v3713_v18 = vpop.eup %3712  ;;  %v1743_v24 = vmul.f32 %v5480_v12, %v1735_v57  ;;  %v1736_v30 = vsel %vm969_vm2, %v1728_v50, %v1712_v28  ;;  %v1701_v62 = vadd.f32 1e-05, %v1685_v47  ;;  %v1702_v14 = vadd.f32 1e-05, %v1686_v27 }
 0x8e4   : > { %v3715_v31 = vpop.eup %3714  ;;  %v1395_v53 = vmul.f32 %v5410_v8, %v7081_v34  ;;  %v1744_v38 = vmul.f32 %v5480_v12, %v1736_v30  ;;  %v1713_v21 = vmul.f32 %v3713_v18, %v1689_v54  ;;  %v1554_v37 = vmul.f32 %v3705_v2, %v1530_v59 }
 0x8e5   : > { %v1751_v26 = vadd.f32 %v5498_v7, %v1743_v24  ;;  %3726 = vrsqrt.f32 %v1701_v62  ;;  %v3717_v49 = vpop.eup %3716  ;;  %v1690_v40 = vsub.f32 %v7013_v5, %v5413_v52  ;;  %v7082_v51 = vsub.f32 %v7016_v3, %v5251_v25 }
 0x8e6   : > { %v1752_v8 = vadd.f32 %v5498_v7, %v1744_v38  ;;  %v1737_v6 = vsel %vm969_vm2, %v1729_v56, %v1713_v21  ;;  %3728 = vrsqrt.f32 %v1702_v14  ;;  %v5505_v55 = vpop.xlane.xlu0 %1864  ;;  %v5507_v2 = vpop.xlane.xlu1 %1867  ;;  %v7083_v63 = vsub.f32 %v7015_v0, %v5301_v9  ;;  %v7085_v38 = vld [vmem:[#allocation9_spill] sm:$0xff] }
 0x8e7   : > { %v3719_v59 = vpop.eup %3718  ;;  %v1221_v58 = vmul.f32 %v5352_v41, %v7082_v51  ;;  %v1531_v52 = vsub.f32 %v7014_v45, %v5368_v32  ;;  %3411 = vst [vmem:[%s4801_s9 + $0x8] sm:$0xff] %v1751_v26  ;;  %v1745_v42 = vmul.f32 %v5480_v12, %v1737_v6  ;;  %v1373_v19 = vsub.f32 %v7016_v3, %v5313_v44 }
 0x8e8   : > { %v1396_v5 = vmul.f32 %v5416_v46, %v7083_v63  ;;  %v1722_v28 = vsel %vm258_vm0, %v5306_v23, %v1394_v13  ;;  %v1532_v25 = vsub.f32 %v7015_v0, %v5371_v4  ;;  %3412 = vst [vmem:[%s4801_s9 + $0x28] sm:$0xff] %v1752_v8  ;;  %v1714_v41 = vmul.f32 %v3719_v59, %v1690_v40  ;;  %v3721_v27 = vpop.eup %3720 }
 0x8e9   : > { %v1374_v9 = vsub.f32 %v7017_v36, %v5328_v22  ;;  %v1730_v32 = vsel %vm960_vm1, %v1722_v28, %v1554_v37  ;;  %v1555_v46 = vmul.f32 %v3711_v1, %v1531_v52  ;;  %v1753_v47 = vadd.f32 %v5498_v7, %v1745_v42 }
 0x8ea   : > { %v1723_v44 = vsel %vm258_vm0, %v5308_v61, %v1395_v53  ;;  %v1556_v50 = vmul.f32 %v3715_v31, %v1532_v25  ;;  %v1691_v23 = vsub.f32 %v7014_v45, %v5429_v11  ;;  %v1738_v4 = vsel %vm969_vm2, %v1730_v32, %v1714_v41  ;;  %v5537_v54 = vpop.xlane.xlu0 %1870  ;;  %v5539_v57 = vpop.xlane.xlu1 %1873 }
 0x8eb   : > { %v3723_v22 = vpop.eup %3722  ;;  %v1724_v1 = vsel %vm258_vm0, %v5316_v35, %v1396_v5  ;;  %v1533_v18 = vsub.f32 %v7016_v3, %v5390_v15  ;;  %v1692_v61 = vsub.f32 %v7015_v0, %v5436_v20  ;;  %3413 = vst [vmem:[%s4801_s9 + $0x48] sm:$0xff] %v1753_v47  ;;  %v1746_v24 = vmul.f32 %v5480_v12, %v1738_v4 }
 0x8ec   : > { %v3725_v45 = vpop.eup %3724  ;;  %v1397_v11 = vmul.f32 %v5431_v43, %v1373_v19  ;;  %v1398_v30 = vmul.f32 %v5452_v16, %v1374_v9  ;;  %v1534_v62 = vsub.f32 %v7017_v36, %v5404_v29  ;;  %v1715_v14 = vmul.f32 %v3723_v22, %v1691_v23 }
 0x8ed   : > { %v1731_v35 = vsel %vm960_vm1, %v1723_v44, %v1555_v46  ;;  %v1557_v31 = vmul.f32 %v3717_v49, %v1533_v18  ;;  %v1754_v15 = vadd.f32 %v5498_v7, %v1746_v24  ;;  %v1716_v48 = vmul.f32 %v3725_v45, %v1692_v61 }
 0x8ee   : > { %v1732_v0 = vsel %vm960_vm1, %v1724_v1, %v1556_v50  ;;  %v1558_v20 = vmul.f32 %v3721_v27, %v1534_v62  ;;  %v1693_v13 = vsub.f32 %v7016_v3, %v5447_v17  ;;  %v1739_v43 = vsel %vm969_vm2, %v1731_v35, %v1715_v14  ;;  %v5559_v16 = vpop.xlane.xlu0 %1876  ;;  %v5561_v34 = vpop.xlane.xlu1 %1879  ;;  %v7086_v14 = vld [vmem:[#allocation22_spill] sm:$0xff]  ;;  %v7087_v35 = vld [vmem:[#allocation23_spill] sm:$0xff] }
 0x8ef   : > { %v3727_v29 = vpop.eup %3726  ;;  %v7084_v53 = vsub.f32 %v7017_v36, %v5256_v33  ;;  %v1694_v56 = vsub.f32 %v7017_v36, %v5450_v60  ;;  %3414 = vst [vmem:[%s4801_s9 + $0x68] sm:$0xff] %v1754_v15  ;;  %v1747_v37 = vmul.f32 %v5480_v12, %v1739_v43  ;;  %v1740_v3 = vsel %vm969_vm2, %v1732_v0, %v1716_v48  ;;  %v7089_v15 = vld [vmem:[#allocation26_spill] sm:$0xff]  ;;  %v7090_v48 = vld [vmem:[#allocation28_spill] sm:$0xff]  ;;  %v7091_v0 = vld [vmem:[#allocation25_spill] sm:$0xff] }
 0x8f0   : > { %v3729_v17 = vpop.eup %3728  ;;  %v1725_v26 = vsel %vm258_vm0, %v1221_v58, %v1397_v11  ;;  %v1748_v49 = vmul.f32 %v5480_v12, %v1740_v3  ;;  %v1717_v40 = vmul.f32 %v3727_v29, %v1693_v13  ;;  %v7093_v13 = vld [vmem:[#allocation44_spill] sm:$0xff] }
 0x8f1   : > { %v1222_v21 = vmul.f32 %v7085_v38, %v7084_v53  ;;  %v1733_v8 = vsel %vm960_vm1, %v1725_v26, %v1557_v31  ;;  %v1755_v6 = vadd.f32 %v5498_v7, %v1747_v37  ;;  %v1718_v36 = vmul.f32 %v3729_v17, %v1694_v56  ;;  %v7088_v31 = vld [vmem:[#allocation21_spill] sm:$0xff] }
 0x8f2   : > { %v1756_v59 = vadd.f32 %v5498_v7, %v1748_v49  ;;  %v1741_v51 = vsel %vm969_vm2, %v1733_v8, %v1717_v40  ;;  %v5580_v63 = vpop.xlane.xlu0 %1890  ;;  %v5582_v58 = vpop.xlane.xlu1 %1893 }
 0x8f3   : > { %v1726_v33 = vsel %vm258_vm0, %v1222_v21, %v1398_v30  ;;  %3415 = vst [vmem:[%s4801_s9 + $0x88] sm:$0xff] %v1755_v6  ;;  %v1749_v5 = vmul.f32 %v5480_v12, %v1741_v51 }
 0x8f4   : > { %v1734_v60 = vsel %vm960_vm1, %v1726_v33, %v1558_v20  ;;  %3416 = vst [vmem:[%s4801_s9 + $0xa8] sm:$0xff] %v1756_v59  ;;  %v7092_v20 = vld [vmem:[#allocation27_spill] sm:$0xff] }
 0x8f5   : > { %v1742_v52 = vsel %vm969_vm2, %v1734_v60, %v1718_v36  ;;  %v1757_v19 = vadd.f32 %v5498_v7, %v1749_v5 }
 0x8f6   : > { %v1750_v42 = vmul.f32 %v5480_v12, %v1742_v52  ;;  %v5591_v25 = vpop.xlane.xlu0 %1896  ;;  %v5593_v41 = vpop.xlane.xlu1 %1899 }
 0x8f7   : > { %3417 = vst [vmem:[%s4801_s9 + $0xc8] sm:$0xff] %v1757_v19 }
 0x8f8   : > { %v1758_v28 = vadd.f32 %v5498_v7, %v1750_v42 }
 0x8fa   : > { %3418 = vst [vmem:[%s4801_s9 + $0xe8] sm:$0xff] %v1758_v28  ;;  %v5597_v9 = vpop.xlane.xlu0 %1902  ;;  %v5599_v32 = vpop.xlane.xlu1 %1905 }
 0x8fe   : > { %v5601_v46 = vpop.xlane.xlu0 %1908  ;;  %v5603_v47 = vpop.xlane.xlu1 %1911 }
 0x902   : > { %v1986_v27 = vpop.permute.xlu0 %1985  ;;  %v1988_v12 = vpop.permute.xlu1 %1987 }
 0x903   : > { %v2009_v44 = vsel %vm258_vm0, %v1986_v27, 0.0  ;;  %v2012_v7 = vsel %vm258_vm0, %v1988_v12, 0.0  ;;  %v7094_v27 = vld [vmem:[#allocation18_spill] sm:$0xff]  ;;  %v7095_v12 = vld [vmem:[#allocation20_spill] sm:$0xff] }
 0x904   : > { %2010 = vadd.xlane.f32.xlu0 %v2009_v44  ;;  %2013 = vadd.xlane.f32.xlu1 %v2012_v7  ;;  %v7096_v44 = vld [vmem:[#allocation14_spill] sm:$0xff]  ;;  %v7097_v7 = vld [vmem:[#allocation32_spill] sm:$0xff] }
 0x906   : > { %v1990_v50 = vpop.permute.xlu1 %1989  ;;  %v1994_v4 = vpop.permute.xlu0 %1993 }
 0x907   : > { %v2015_v23 = vsel %vm258_vm0, %v1990_v50, 0.0  ;;  %v2021_v61 = vsel %vm258_vm0, %v1994_v4, 0.0  ;;  %v7098_v50 = vld [vmem:[#allocation34_spill] sm:$0xff]  ;;  %v7100_v4 = vld [vmem:[#allocation33_spill] sm:$0xff] }
 0x908   : > { %2016 = vadd.xlane.f32.xlu0 %v2015_v23  ;;  %v7099_v23 = vld [vmem:[#allocation36_spill] sm:$0xff] }
 0x90a   : > { %v1992_v22 = vpop.permute.xlu1 %1991  ;;  %v1998_v45 = vpop.permute.xlu0 %1997 }
 0x90b   : > { %v2018_v1 = vsel %vm258_vm0, %v1992_v22, 0.0  ;;  %v2027_v30 = vsel %vm258_vm0, %v1998_v45, 0.0  ;;  %v7101_v22 = vld [vmem:[#allocation35_spill] sm:$0xff] }
 0x90c   : > { %2019 = vadd.xlane.f32.xlu0 %v2018_v1 }
 0x90e   : > { %v1996_v18 = vpop.permute.xlu1 %1995 }
 0x90f   : > { %v2024_v24 = vsel %vm258_vm0, %v1996_v18, 0.0 }
 0x910   : > { %2022 = vadd.xlane.f32.xlu0 %v2021_v61  ;;  %2025 = vadd.xlane.f32.xlu1 %v2024_v24 }
 0x912   : > { %v2000_v11 = vpop.permute.xlu1 %1999 }
 0x913   : > { %v2030_v62 = vsel %vm258_vm0, %v2000_v11, 0.0 }
 0x914   : > { %2028 = vadd.xlane.f32.xlu0 %v2027_v30  ;;  %2031 = vadd.xlane.f32.xlu1 %v2030_v62 }
 0x925   : > { %2043 = vrot.lane.b32.xlu1 %v7086_v14, %s3944_s12 }
 0x929   : > { %2045 = vrot.lane.b32.xlu1 %v7087_v35, %s3944_s12 }
 0x92a   : > { %2041 = vrot.lane.b32.xlu0 %v7088_v31, %s3944_s12 }
 0x92d   : > { %2047 = vrot.lane.b32.xlu1 %v7089_v15, %s3944_s12 }
 0x92e   : > { %2049 = vrot.lane.b32.xlu0 %v7090_v48, %s3944_s12 }
 0x931   : > { %2051 = vrot.lane.b32.xlu1 %v7091_v0, %s3944_s12 }
 0x932   : > { %2053 = vrot.lane.b32.xlu0 %v7092_v20, %s3944_s12 }
 0x935   : > { %2055 = vrot.lane.b32.xlu1 %v7093_v13, %s3944_s12 }
 0x991   : > { %v5629_v43 = vpop.xlane.xlu0 %2010  ;;  %v5633_v53 = vpop.xlane.xlu1 %2013 }
 0x995   : > { %v5631_v29 = vpop.xlane.xlu0 %2016 }
 0x999   : > { %v5635_v38 = vpop.xlane.xlu0 %2019 }
 0x99d   : > { %v5637_v21 = vpop.xlane.xlu0 %2022  ;;  %v5639_v56 = vpop.xlane.xlu1 %2025 }
 0x9a1   : > { %v5641_v37 = vpop.xlane.xlu0 %2028  ;;  %v5643_v3 = vpop.xlane.xlu1 %2031 }
 0x9a5   : > { %v2042_v17 = vpop.permute.xlu0 %2041  ;;  %v2044_v26 = vpop.permute.xlu1 %2043 }
 0x9a6   : > { %v2065_v49 = vsel %vm258_vm0, %v2042_v17, 0.0  ;;  %v2068_v40 = vsel %vm258_vm0, %v2044_v26, 0.0 }
 0x9a7   : > { %2066 = vadd.xlane.f32.xlu0 %v2065_v49  ;;  %2069 = vadd.xlane.f32.xlu1 %v2068_v40 }
 0x9a9   : > { %v2046_v33 = vpop.permute.xlu1 %2045  ;;  %v2050_v6 = vpop.permute.xlu0 %2049 }
 0x9aa   : > { %v2071_v8 = vsel %vm258_vm0, %v2046_v33, 0.0  ;;  %v2077_v51 = vsel %vm258_vm0, %v2050_v6, 0.0 }
 0x9ab   : > { %2072 = vadd.xlane.f32.xlu0 %v2071_v8 }
 0x9ad   : > { %v2048_v36 = vpop.permute.xlu1 %2047  ;;  %v2054_v52 = vpop.permute.xlu0 %2053 }
 0x9ae   : > { %v2074_v60 = vsel %vm258_vm0, %v2048_v36, 0.0  ;;  %v2083_v19 = vsel %vm258_vm0, %v2054_v52, 0.0 }
 0x9af   : > { %2075 = vadd.xlane.f32.xlu0 %v2074_v60 }
 0x9b1   : > { %v2052_v59 = vpop.permute.xlu1 %2051 }
 0x9b2   : > { %v2080_v5 = vsel %vm258_vm0, %v2052_v59, 0.0 }
 0x9b3   : > { %2078 = vadd.xlane.f32.xlu0 %v2077_v51  ;;  %2081 = vadd.xlane.f32.xlu1 %v2080_v5 }
 0x9b5   : > { %v2056_v42 = vpop.permute.xlu1 %2055 }
 0x9b6   : > { %v2086_v28 = vsel %vm258_vm0, %v2056_v42, 0.0 }
 0x9b7   : > { %2084 = vadd.xlane.f32.xlu0 %v2083_v19  ;;  %2087 = vadd.xlane.f32.xlu1 %v2086_v28 }
 0x9c8   : > { %2155 = vrot.lane.b32.xlu1 %v7094_v27, %s3945_s13 }
 0x9cc   : > { %2157 = vrot.lane.b32.xlu1 %v7095_v12, %s3945_s13 }
 0x9cd   : > { %2153 = vrot.lane.b32.xlu0 %v7096_v44, %s3945_s13 }
 0x9d0   : > { %2159 = vrot.lane.b32.xlu1 %v7097_v7, %s3945_s13 }
 0x9d1   : > { %2161 = vrot.lane.b32.xlu0 %v7098_v50, %s3945_s13 }
 0x9d4   : > { %2163 = vrot.lane.b32.xlu1 %v7099_v23, %s3945_s13 }
 0x9d5   : > { %2165 = vrot.lane.b32.xlu0 %v7100_v4, %s3945_s13 }
 0x9d8   : > { %2167 = vrot.lane.b32.xlu1 %v7101_v22, %s3945_s13 }
 0xa34   : > { %v5669_v1 = vpop.xlane.xlu0 %2066  ;;  %v5673_v61 = vpop.xlane.xlu1 %2069 }
 0xa38   : > { %v5671_v18 = vpop.xlane.xlu0 %2072 }
 0xa3c   : > { %v5675_v24 = vpop.xlane.xlu0 %2075 }
 0xa40   : > { %v5677_v45 = vpop.xlane.xlu0 %2078  ;;  %v5679_v11 = vpop.xlane.xlu1 %2081 }
 0xa44   : > { %v5681_v30 = vpop.xlane.xlu0 %2084  ;;  %v5683_v62 = vpop.xlane.xlu1 %2087 }
 0xa48   : > { %v2154_v17 = vpop.permute.xlu0 %2153  ;;  %v2156_v26 = vpop.permute.xlu1 %2155 }
 0xa49   : > { %v2177_v49 = vsel %vm258_vm0, %v2154_v17, 0.0  ;;  %v2180_v40 = vsel %vm258_vm0, %v2156_v26, 0.0  ;;  %v3600_v17 = vld [vmem:[%s6831_s1 + $0x30] sm:$0xff]   ;;  %v3601_v26 = vld [vmem:[%s6831_s1 + $0x38] sm:$0xff]  }
 0xa4a   : > { %2178 = vadd.xlane.f32.xlu0 %v2177_v49  ;;  %2181 = vadd.xlane.f32.xlu1 %v2180_v40  ;;  %v7102_v49 = vld [vmem:[#allocation5_spill] sm:$0xff]  ;;  %v7103_v40 = vld [vmem:[#allocation6_spill] sm:$0xff] }
 0xa4b   : > { %3522 = vmatprep.subr.bf16.mxu1 %v3600_v17 }
 0xa4c   : > { %v2158_v33 = vpop.permute.xlu1 %2157  ;;  %v2162_v6 = vpop.permute.xlu0 %2161  ;;  %3523 = vmatpush3.bf16.msra.mxu1 %v3600_v17 }
 0xa4d   : > { %v2183_v8 = vsel %vm258_vm0, %v2158_v33, 0.0  ;;  %v2189_v51 = vsel %vm258_vm0, %v2162_v6, 0.0  ;;  %3524 = vmatprep.subr.bf16.mxu1 %v3601_v26  ;;  %v7104_v33 = vld [vmem:[#allocation7_spill] sm:$0xff] }
 0xa4e   : > { %2184 = vadd.xlane.f32.xlu0 %v2183_v8 }
 0xa50   : > { %v2160_v36 = vpop.permute.xlu1 %2159  ;;  %v2166_v52 = vpop.permute.xlu0 %2165  ;;  %3525 = vmatpush3.bf16.msra.mxu1 %v3601_v26 }
 0xa51   : > { %v2186_v60 = vsel %vm258_vm0, %v2160_v36, 0.0  ;;  %v2195_v19 = vsel %vm258_vm0, %v2166_v52, 0.0 }
 0xa52   : > { %2187 = vadd.xlane.f32.xlu0 %v2186_v60 }
 0xa53   : > { %3527 = vmatmul.mubr.msk.bf16.vlgmr.msra.gmra.mrb[8].mxu1 %vm258_vm0, %v7102_v49 }
 0xa54   : > { %v2164_v59 = vpop.permute.xlu1 %2163  ;;  %3530 = vmatprep.mubr.msk.bf16.mxu1 %vm258_vm0, %v7103_v40 }
 0xa55   : > { %v2192_v5 = vsel %vm258_vm0, %v2164_v59, 0.0 }
 0xa56   : > { %2190 = vadd.xlane.f32.xlu0 %v2189_v51  ;;  %2193 = vadd.xlane.f32.xlu1 %v2192_v5 }
 0xa58   : > { %v2168_v42 = vpop.permute.xlu1 %2167 }
 0xa59   : > { %v2198_v28 = vsel %vm258_vm0, %v2168_v42, 0.0 }
 0xa5a   : > { %2196 = vadd.xlane.f32.xlu0 %v2195_v19  ;;  %2199 = vadd.xlane.f32.xlu1 %v2198_v28 }
 0xa5b   : > { %3531 = vmatmul.mubr.msk.bf16.gmra.mrb[12].mxu1 %vm258_vm0, %v7104_v33 }
 0xa6b   : > { %2203 = vrot.lane.b32.xlu1 %v7086_v14, %s3945_s13 }
 0xa6f   : > { %2205 = vrot.lane.b32.xlu1 %v7087_v35, %s3945_s13 }
 0xa70   : > { %2201 = vrot.lane.b32.xlu0 %v7088_v31, %s3945_s13 }
 0xa73   : > { %2207 = vrot.lane.b32.xlu1 %v7089_v15, %s3945_s13 }
 0xa74   : > { %2209 = vrot.lane.b32.xlu0 %v7090_v48, %s3945_s13 }
 0xa77   : > { %2211 = vrot.lane.b32.xlu1 %v7091_v0, %s3945_s13 }
 0xa78   : > { %2213 = vrot.lane.b32.xlu0 %v7092_v20, %s3945_s13 }
 0xa7b   : > { %2215 = vrot.lane.b32.xlu1 %v7093_v13, %s3945_s13 }
 0xad7   : > { %v5721_v8 = vpop.xlane.xlu0 %2178  ;;  %v5725_v36 = vpop.xlane.xlu1 %2181 }
 0xadb   : > { %v5723_v6 = vpop.xlane.xlu0 %2184 }
 0xadc   : > { %7105 = vst [vmem:[#allocation31_spill] sm:$0xff] %v5723_v6 }
 0xadf   : > { %v5727_v60 = vpop.xlane.xlu0 %2187 }
 0xae0   : > { %7106 = vst [vmem:[#allocation10_spill] sm:$0xff] %v5727_v60 }
 0xae3   : > { %v5729_v59 = vpop.xlane.xlu0 %2190  ;;  %v5731_v51 = vpop.xlane.xlu1 %2193 }
 0xae4   : > { %7107 = vst [vmem:[#allocation29_spill] sm:$0xff] %v5729_v59  ;;  %7108 = vst [vmem:[#allocation15_spill] sm:$0xff] %v5731_v51 }
 0xae7   : > { %v5733_v5 = vpop.xlane.xlu0 %2196  ;;  %v5735_v52 = vpop.xlane.xlu1 %2199 }
 0xae8   : > { %7109 = vst [vmem:[#allocation11_spill] sm:$0xff] %v5733_v5  ;;  %7110 = vst [vmem:[#allocation8_spill] sm:$0xff] %v5735_v52 }
 0xaeb   : > { %v2202_v42 = vpop.permute.xlu0 %2201  ;;  %v2204_v19 = vpop.permute.xlu1 %2203 }
 0xaec   : > { %v2225_v28 = vsel %vm258_vm0, %v2202_v42, 0.0  ;;  %v2228_v17 = vsel %vm258_vm0, %v2204_v19, 0.0 }
 0xaed   : > { %2226 = vadd.xlane.f32.xlu0 %v2225_v28  ;;  %2229 = vadd.xlane.f32.xlu1 %v2228_v17 }
 0xaef   : > { %v2206_v26 = vpop.permute.xlu1 %2205  ;;  %v2210_v40 = vpop.permute.xlu0 %2209 }
 0xaf0   : > { %v2231_v49 = vsel %vm258_vm0, %v2206_v26, 0.0  ;;  %v2237_v52 = vsel %vm258_vm0, %v2210_v40, 0.0 }
 0xaf1   : > { %2232 = vadd.xlane.f32.xlu0 %v2231_v49 }
 0xaf3   : > { %v2208_v33 = vpop.permute.xlu1 %2207  ;;  %v2214_v60 = vpop.permute.xlu0 %2213 }
 0xaf4   : > { %v2234_v51 = vsel %vm258_vm0, %v2208_v33, 0.0  ;;  %v2243_v19 = vsel %vm258_vm0, %v2214_v60, 0.0 }
 0xaf5   : > { %2235 = vadd.xlane.f32.xlu0 %v2234_v51 }
 0xaf7   : > { %v2212_v5 = vpop.permute.xlu1 %2211 }
 0xaf8   : > { %v2240_v59 = vsel %vm258_vm0, %v2212_v5, 0.0 }
 0xaf9   : > { %2238 = vadd.xlane.f32.xlu0 %v2237_v52  ;;  %2241 = vadd.xlane.f32.xlu1 %v2240_v59 }
 0xafb   : > { %v2216_v42 = vpop.permute.xlu1 %2215 }
 0xafc   : > { %v2246_v28 = vsel %vm258_vm0, %v2216_v42, 0.0 }
 0xafd   : > { %2244 = vadd.xlane.f32.xlu0 %v2243_v19  ;;  %2247 = vadd.xlane.f32.xlu1 %v2246_v28 }
 0xb0e   : > { %2315 = vrot.lane.b32.xlu1 %v7094_v27, %s3946_s14 }
 0xb12   : > { %2317 = vrot.lane.b32.xlu1 %v7095_v12, %s3946_s14 }
 0xb13   : > { %2313 = vrot.lane.b32.xlu0 %v7096_v44, %s3946_s14 }
 0xb16   : > { %2319 = vrot.lane.b32.xlu1 %v7097_v7, %s3946_s14 }
 0xb17   : > { %2321 = vrot.lane.b32.xlu0 %v7098_v50, %s3946_s14 }
 0xb1a   : > { %2323 = vrot.lane.b32.xlu1 %v7099_v23, %s3946_s14 }
 0xb1b   : > { %2325 = vrot.lane.b32.xlu0 %v7100_v4, %s3946_s14 }
 0xb1e   : > { %2327 = vrot.lane.b32.xlu1 %v7101_v22, %s3946_s14 }
 0xb7a   : > { %v5761_v60 = vpop.xlane.xlu0 %2226  ;;  %v5765_v51 = vpop.xlane.xlu1 %2229 }
 0xb7b   : > { %7112 = vst [vmem:[#allocation39_spill] sm:$0xff] %v5765_v51 }
 0xb7e   : > { %v5763_v59 = vpop.xlane.xlu0 %2232 }
 0xb7f   : > { %7111 = vst [vmem:[#allocation38_spill] sm:$0xff] %v5763_v59 }
 0xb82   : > { %v5767_v5 = vpop.xlane.xlu0 %2235 }
 0xb83   : > { %7113 = vst [vmem:[#allocation17_spill] sm:$0xff] %v5767_v5 }
 0xb86   : > { %v5769_v52 = vpop.xlane.xlu0 %2238  ;;  %v5771_v17 = vpop.xlane.xlu1 %2241 }
 0xb87   : > { %7114 = vst [vmem:[#allocation12_spill] sm:$0xff] %v5769_v52  ;;  %7115 = vst [vmem:[#allocation16_spill] sm:$0xff] %v5771_v17 }
 0xb8a   : > { %v5773_v26 = vpop.xlane.xlu0 %2244  ;;  %v5775_v49 = vpop.xlane.xlu1 %2247 }
 0xb8b   : > { %7116 = vst [vmem:[#allocation37_spill] sm:$0xff] %v5773_v26  ;;  %7117 = vst [vmem:[#allocation19_spill] sm:$0xff] %v5775_v49 }
 0xb8e   : > { %v2314_v40 = vpop.permute.xlu0 %2313  ;;  %v2316_v33 = vpop.permute.xlu1 %2315 }
 0xb8f   : > { %v2337_v42 = vsel %vm258_vm0, %v2314_v40, 0.0  ;;  %v2340_v19 = vsel %vm258_vm0, %v2316_v33, 0.0 }
 0xb90   : > { %2338 = vadd.xlane.f32.xlu0 %v2337_v42  ;;  %2341 = vadd.xlane.f32.xlu1 %v2340_v19 }
 0xb92   : > { %v2318_v28 = vpop.permute.xlu1 %2317  ;;  %v2322_v5 = vpop.permute.xlu0 %2321 }
 0xb93   : > { %v2343_v59 = vsel %vm258_vm0, %v2318_v28, 0.0  ;;  %v2349_v49 = vsel %vm258_vm0, %v2322_v5, 0.0 }
 0xb94   : > { %2344 = vadd.xlane.f32.xlu0 %v2343_v59 }
 0xb96   : > { %v2320_v52 = vpop.permute.xlu1 %2319  ;;  %v2326_v6 = vpop.permute.xlu0 %2325 }
 0xb97   : > { %v2346_v17 = vsel %vm258_vm0, %v2320_v52, 0.0  ;;  %v2355_v33 = vsel %vm258_vm0, %v2326_v6, 0.0  ;;  %v5797_v6 = vpop.f32.mrb[8].mxu1 }
 0xb98   : > { %2347 = vadd.xlane.f32.xlu0 %v2346_v17  ;;  %7118 = vst [vmem:[#allocation13_spill] sm:$0xff] %v5797_v6 }
 0xb9a   : > { %v2324_v26 = vpop.permute.xlu1 %2323 }
 0xb9b   : > { %v2352_v51 = vsel %vm258_vm0, %v2324_v26, 0.0 }
 0xb9c   : > { %2350 = vadd.xlane.f32.xlu0 %v2349_v49  ;;  %2353 = vadd.xlane.f32.xlu1 %v2352_v51 }
 0xb9e   : > { %v2328_v40 = vpop.permute.xlu1 %2327 }
 0xb9f   : > { %v2358_v42 = vsel %vm258_vm0, %v2328_v40, 0.0 }
 0xba0   : > { %2356 = vadd.xlane.f32.xlu0 %v2355_v33  ;;  %2359 = vadd.xlane.f32.xlu1 %v2358_v42 }
 0xbb1   : > { %2363 = vrot.lane.b32.xlu1 %v7086_v14, %s3946_s14  ;;  %v5801_v14 = vpop.f32.mrb[9].mxu1 }
 0xbb2   : > { %7119 = vst [vmem:[#allocation40_spill] sm:$0xff] %v5801_v14 }
 0xbb5   : > { %2365 = vrot.lane.b32.xlu1 %v7087_v35, %s3946_s14  ;;  %v5803_v35 = vpop.f32.mrb[10].mxu1 }
 0xbb6   : > { %2361 = vrot.lane.b32.xlu0 %v7088_v31, %s3946_s14  ;;  %7120 = vst [vmem:[#allocation30_spill] sm:$0xff] %v5803_v35  ;;  %v5807_v31 = vpop.f32.mrb[11].mxu1 }
 0xbb7   : > { %7121 = vst [vmem:[#allocation41_spill] sm:$0xff] %v5807_v31 }
 0xbb9   : > { %2367 = vrot.lane.b32.xlu1 %v7089_v15, %s3946_s14  ;;  %v5809_v15 = vpop.f32.mrb[12].mxu1 }
 0xbba   : > { %2369 = vrot.lane.b32.xlu0 %v7090_v48, %s3946_s14  ;;  %7122 = vst [vmem:[#allocation42_spill] sm:$0xff] %v5809_v15  ;;  %v5811_v48 = vpop.f32.mrb[13].mxu1 }
 0xbbb   : > { %7123 = vst [vmem:[#allocation43_spill] sm:$0xff] %v5811_v48  ;;  %v5813_v59 = vpop.f32.mrb[14].mxu1 }
 0xbbc   : > { %7124 = vst [vmem:[#allocation24_spill] sm:$0xff] %v5813_v59 }
 0xbbd   : > { %2371 = vrot.lane.b32.xlu1 %v7091_v0, %s3946_s14  ;;  %v5815_v0 = vpop.f32.mrb[15].mxu1 }
 0xbbe   : > { %2373 = vrot.lane.b32.xlu0 %v7092_v20, %s3946_s14  ;;  %7125 = vst [vmem:[#allocation9_spill] sm:$0xff] %v5815_v0 }
 0xbc1   : > { %2375 = vrot.lane.b32.xlu1 %v7093_v13, %s3946_s14 }
 0xc1d   : > { %v5817_v51 = vpop.xlane.xlu0 %2338  ;;  %v5821_v5 = vpop.xlane.xlu1 %2341 }
 0xc1e   : > { %7126 = vst [vmem:[#allocation22_spill] sm:$0xff] %v5817_v51  ;;  %7128 = vst [vmem:[#allocation21_spill] sm:$0xff] %v5821_v5 }
 0xc21   : > { %v5819_v20 = vpop.xlane.xlu0 %2344 }
 0xc22   : > { %7127 = vst [vmem:[#allocation23_spill] sm:$0xff] %v5819_v20 }
 0xc25   : > { %v5823_v52 = vpop.xlane.xlu0 %2347 }
 0xc26   : > { %7129 = vst [vmem:[#allocation26_spill] sm:$0xff] %v5823_v52 }
 0xc29   : > { %v5825_v17 = vpop.xlane.xlu0 %2350  ;;  %v5827_v13 = vpop.xlane.xlu1 %2353 }
 0xc2a   : > { %7130 = vst [vmem:[#allocation28_spill] sm:$0xff] %v5825_v17  ;;  %7131 = vst [vmem:[#allocation25_spill] sm:$0xff] %v5827_v13 }
 0xc2d   : > { %v5829_v26 = vpop.xlane.xlu0 %2356  ;;  %v5831_v49 = vpop.xlane.xlu1 %2359 }
 0xc2e   : > { %7132 = vst [vmem:[#allocation27_spill] sm:$0xff] %v5829_v26  ;;  %7133 = vst [vmem:[#allocation44_spill] sm:$0xff] %v5831_v49 }
 0xc31   : > { %v2362_v19 = vpop.permute.xlu0 %2361  ;;  %v2364_v28 = vpop.permute.xlu1 %2363 }
 0xc32   : > { %v2385_v40 = vsel %vm258_vm0, %v2362_v19, 0.0  ;;  %v2388_v33 = vsel %vm258_vm0, %v2364_v28, 0.0 }
 0xc33   : > { %2386 = vadd.xlane.f32.xlu0 %v2385_v40  ;;  %2389 = vadd.xlane.f32.xlu1 %v2388_v33  ;;  %v5859_v33 = vmul.f32 %v5801_v14, %v5801_v14 }
 0xc35   : > { %v2366_v42 = vpop.permute.xlu1 %2365  ;;  %v2370_v52 = vpop.permute.xlu0 %2369  ;;  %7134 = vst [vmem:[#allocation18_spill] sm:$0xff] %v5859_v33 }
 0xc36   : > { %v2391_v20 = vsel %vm258_vm0, %v2366_v42, 0.0  ;;  %v2397_v49 = vsel %vm258_vm0, %v2370_v52, 0.0  ;;  %v2617_v52 = vsel %vm258_vm0, %v5797_v6, 0.0  ;;  %v5863_v42 = vmul.f32 %v5807_v31, %v5807_v31 }
 0xc37   : > { %2392 = vadd.xlane.f32.xlu0 %v2391_v20  ;;  %v2611_v20 = vsel %vm258_vm0, %v5801_v14, 0.0 }
 0xc38   : > { %7135 = vst [vmem:[#allocation20_spill] sm:$0xff] %v5863_v42 }
 0xc39   : > { %v2368_v17 = vpop.permute.xlu1 %2367  ;;  %v2374_v51 = vpop.permute.xlu0 %2373 }
 0xc3a   : > { %v2394_v13 = vsel %vm258_vm0, %v2368_v17, 0.0  ;;  %v2403_v28 = vsel %vm258_vm0, %v2374_v51, 0.0  ;;  %v2614_v17 = vsel %vm258_vm0, %v5807_v31, 0.0  ;;  %v2623_v51 = vsel %vm258_vm0, %v5811_v48, 0.0 }
 0xc3b   : > { %2395 = vadd.xlane.f32.xlu0 %v2394_v13  ;;  %v2626_v13 = vsel %vm258_vm0, %v5815_v0, 0.0 }
 0xc3d   : > { %v2372_v26 = vpop.permute.xlu1 %2371 }
 0xc3e   : > { %v2400_v5 = vsel %vm258_vm0, %v2372_v26, 0.0  ;;  %v2629_v26 = vsel %vm258_vm0, %v5809_v15, 0.0 }
 0xc3f   : > { %2398 = vadd.xlane.f32.xlu0 %v2397_v49  ;;  %2401 = vadd.xlane.f32.xlu1 %v2400_v5  ;;  %v2620_v5 = vsel %vm258_vm0, %v5803_v35, 0.0  ;;  %v2632_v49 = vsel %vm258_vm0, %v5813_v59, 0.0 }
 0xc41   : > { %v2376_v19 = vpop.permute.xlu1 %2375 }
 0xc42   : > { %v2406_v40 = vsel %vm258_vm0, %v2376_v19, 0.0  ;;  %v2643_v19 = vsel %vm258_vm0, %v5859_v33, 0.0 }
 0xc43   : > { %2404 = vadd.xlane.f32.xlu0 %v2403_v28  ;;  %2407 = vadd.xlane.f32.xlu1 %v2406_v40  ;;  %v2646_v28 = vsel %vm258_vm0, %v5863_v42, 0.0  ;;  %v5871_v40 = vmul.f32 %v5797_v6, %v5797_v6 }
 0xc45   : > { %7136 = vst [vmem:[#allocation14_spill] sm:$0xff] %v5871_v40 }
 0xc47   : > { %2612 = vadd.xlane.f32.xlu0 %v2611_v20  ;;  %2615 = vadd.xlane.f32.xlu1 %v2614_v17  ;;  %v5875_v20 = vmul.f32 %v5803_v35, %v5803_v35  ;;  %v2649_v17 = vsel %vm258_vm0, %v5871_v40, 0.0 }
 0xc49   : > { %7137 = vst [vmem:[#allocation32_spill] sm:$0xff] %v5875_v20 }
 0xc4b   : > { %2618 = vadd.xlane.f32.xlu0 %v2617_v52  ;;  %2621 = vadd.xlane.f32.xlu1 %v2620_v5  ;;  %v2652_v52 = vsel %vm258_vm0, %v5875_v20, 0.0  ;;  %v5883_v5 = vmul.f32 %v5811_v48, %v5811_v48 }
 0xc4d   : > { %7138 = vst [vmem:[#allocation34_spill] sm:$0xff] %v5883_v5 }
 0xc4f   : > { %2624 = vadd.xlane.f32.xlu0 %v2623_v51  ;;  %2627 = vadd.xlane.f32.xlu1 %v2626_v13  ;;  %v5887_v51 = vmul.f32 %v5815_v0, %v5815_v0  ;;  %v2655_v13 = vsel %vm258_vm0, %v5883_v5, 0.0 }
 0xc51   : > { %7139 = vst [vmem:[#allocation36_spill] sm:$0xff] %v5887_v51 }
 0xc53   : > { %2630 = vadd.xlane.f32.xlu0 %v2629_v26  ;;  %2633 = vadd.xlane.f32.xlu1 %v2632_v49  ;;  %v2658_v26 = vsel %vm258_vm0, %v5887_v51, 0.0  ;;  %v5895_v49 = vmul.f32 %v5809_v15, %v5809_v15 }
 0xc55   : > { %7140 = vst [vmem:[#allocation33_spill] sm:$0xff] %v5895_v49 }
 0xc57   : > { %2644 = vadd.xlane.f32.xlu0 %v2643_v19  ;;  %2647 = vadd.xlane.f32.xlu1 %v2646_v28  ;;  %v5899_v19 = vmul.f32 %v5813_v59, %v5813_v59  ;;  %v2661_v28 = vsel %vm258_vm0, %v5895_v49, 0.0 }
 0xc59   : > { %7141 = vst [vmem:[#allocation35_spill] sm:$0xff] %v5899_v19 }
 0xc5b   : > { %2650 = vadd.xlane.f32.xlu0 %v2649_v17  ;;  %2653 = vadd.xlane.f32.xlu1 %v2652_v52  ;;  %v2664_v17 = vsel %vm258_vm0, %v5899_v19, 0.0  ;;  %v5922_v52 = vmul.f32 0.03125, %v5473_v39  ;;  %v1923_v39 = vmul.f32 0.03125, %v5591_v25  ;;  %v1926_v19 = vmul.f32 0.03125, %v5599_v32 }
 0xc5c   : > { %v5965_v32 = vmul.f32 0.03125, %v5559_v16 }
 0xc5f   : > { %2656 = vadd.xlane.f32.xlu0 %v2655_v13  ;;  %2659 = vadd.xlane.f32.xlu1 %v2658_v26  ;;  %v5925_v13 = vmul.f32 0.03125, %v5475_v10  ;;  %v5928_v26 = vmul.f32 0.03125, %v5505_v55  ;;  %v1924_v55 = vmul.f32 0.03125, %v5593_v41 }
 0xc61   : > { %v1930_v10 = vmul.f32 %v5925_v13, %v5925_v13 }
 0xc63   : > { %2662 = vadd.xlane.f32.xlu0 %v2661_v28  ;;  %2665 = vadd.xlane.f32.xlu1 %v2664_v17  ;;  %v1921_v28 = vmul.f32 0.03125, %v5580_v63  ;;  %v5932_v17 = vmul.f32 0.03125, %v5507_v2  ;;  %v1931_v63 = vmul.f32 %v5928_v26, %v5928_v26  ;;  %v5947_v2 = vmul.f32 0.03125, %v5539_v57 }
 0xc65   : > { %v1934_v49 = vmul.f32 %v5947_v2, %v5947_v2 }
 0xc74   : > { %2741 = vrot.lane.b32.xlu1 %v5807_v31, %s3944_s12 }
 0xc78   : > { %2743 = vrot.lane.b32.xlu1 %v5797_v6, %s3944_s12  ;;  %v1925_v6 = vmul.f32 0.03125, %v5597_v9 }
 0xc79   : > { %2739 = vrot.lane.b32.xlu0 %v5801_v14, %s3944_s12  ;;  %v1939_v14 = vsub.f32 %v1923_v39, %v1931_v63  ;;  %v5962_v39 = vmul.f32 0.03125, %v5633_v53  ;;  %v1928_v53 = vmul.f32 0.03125, %v5603_v47 }
 0xc7b   : > { %v1955_v9 = vadd.f32 1e-05, %v1939_v14  ;;  %v2106_v16 = vmul.f32 %v5962_v39, %v5962_v39 }
 0xc7c   : > { %2745 = vrot.lane.b32.xlu1 %v5803_v35, %s3944_s12  ;;  %v5938_v35 = vmul.f32 0.03125, %v5537_v54  ;;  %v1932_v54 = vmul.f32 %v5932_v17, %v5932_v17 }
 0xc7d   : > { %2747 = vrot.lane.b32.xlu0 %v5811_v48, %s3944_s12  ;;  %v1929_v48 = vmul.f32 %v5922_v52, %v5922_v52 }
 0xc7e   : > { %v1933_v25 = vmul.f32 %v5938_v35, %v5938_v35  ;;  %v1940_v41 = vsub.f32 %v1924_v55, %v1932_v54 }
 0xc80   : > { %2749 = vrot.lane.b32.xlu1 %v5815_v0, %s3944_s12  ;;  %v1922_v0 = vmul.f32 0.03125, %v5582_v58  ;;  %v1937_v58 = vsub.f32 %v1921_v28, %v1929_v48  ;;  %v1941_v57 = vsub.f32 %v1925_v6, %v1933_v25  ;;  %v5958_v48 = vmul.f32 0.03125, %v5629_v43 }
 0xc81   : > { %2751 = vrot.lane.b32.xlu0 %v5809_v15, %s3944_s12  ;;  %v1942_v28 = vsub.f32 %v1926_v19, %v1934_v49  ;;  %v1956_v20 = vadd.f32 1e-05, %v1940_v41  ;;  %v5970_v43 = vmul.f32 0.03125, %v5561_v34  ;;  %v1935_v34 = vmul.f32 %v5965_v32, %v5965_v32 }
 0xc82   : > { %v1938_v31 = vsub.f32 %v1922_v0, %v1930_v10  ;;  %v1953_v51 = vadd.f32 1e-05, %v1937_v58  ;;  %v2097_v0 = vmul.f32 0.03125, %v5669_v1  ;;  %v1957_v10 = vadd.f32 1e-05, %v1941_v57 }
 0xc83   : > { %v2105_v6 = vmul.f32 %v5958_v48, %v5958_v48  ;;  %v1958_v14 = vadd.f32 1e-05, %v1942_v28  ;;  %v1927_v1 = vmul.f32 0.03125, %v5601_v46  ;;  %v1936_v49 = vmul.f32 %v5970_v43, %v5970_v43 }
 0xc84   : > { %2753 = vrot.lane.b32.xlu1 %v5813_v59, %s3944_s12  ;;  %v1954_v5 = vadd.f32 1e-05, %v1938_v31  ;;  %3730 = vrsqrt.f32 %v1953_v51  ;;  %v2098_v31 = vmul.f32 0.03125, %v5673_v61  ;;  %v2099_v46 = vmul.f32 0.03125, %v5671_v18 }
 0xc85   : > { %v2113_v51 = vsub.f32 %v2097_v0, %v2105_v6  ;;  %v1944_v55 = vsub.f32 %v1928_v53, %v1936_v49  ;;  %v1945_v25 = vsub.f32 %v7096_v44, %v5922_v52  ;;  %v1947_v18 = vsub.f32 %v7095_v12, %v5928_v26 }
 0xc86   : > { %3732 = vrsqrt.f32 %v1954_v5  ;;  %v5978_v5 = vmul.f32 0.03125, %v5631_v29  ;;  %v2114_v61 = vsub.f32 %v2098_v31, %v2106_v16  ;;  %v5994_v0 = vmul.f32 0.03125, %v5635_v38 }
 0xc87   : > { %3734 = vrsqrt.f32 %v1955_v9  ;;  %v2129_v19 = vadd.f32 1e-05, %v2113_v51  ;;  %v1946_v9 = vsub.f32 %v7094_v27, %v5925_v13  ;;  %v1960_v28 = vadd.f32 1e-05, %v1944_v55 }
 0xc88   : > { %3736 = vrsqrt.f32 %v1956_v20  ;;  %v1943_v20 = vsub.f32 %v1927_v1, %v1935_v34  ;;  %v2107_v47 = vmul.f32 %v5978_v5, %v5978_v5  ;;  %v2130_v58 = vadd.f32 1e-05, %v2114_v61 }
 0xc89   : > { %3738 = vrsqrt.f32 %v1957_v10  ;;  %v1948_v6 = vsub.f32 %v7097_v7, %v5932_v17  ;;  %v1949_v52 = vsub.f32 %v7098_v50, %v5938_v35  ;;  %v6003_v31 = vmul.f32 0.03125, %v5637_v21 }
 0xc8a   : > { %3740 = vrsqrt.f32 %v1958_v14  ;;  %v2115_v29 = vsub.f32 %v2099_v46, %v2107_v47  ;;  %v1959_v41 = vadd.f32 1e-05, %v1943_v20  ;;  %v1950_v14 = vsub.f32 %v7099_v23, %v5947_v2 }
 0xc8b   : > { %3742 = vrsqrt.f32 %v2129_v19  ;;  %v2100_v1 = vmul.f32 0.03125, %v5675_v24  ;;  %v2108_v21 = vmul.f32 %v5994_v0, %v5994_v0  ;;  %v6015_v2 = vmul.f32 0.03125, %v5639_v56 }
 0xc8c   : > { %3744 = vrsqrt.f32 %v2130_v58  ;;  %v2131_v38 = vadd.f32 1e-05, %v2115_v29  ;;  %v2101_v16 = vmul.f32 0.03125, %v5677_v45  ;;  %v2109_v61 = vmul.f32 %v6003_v31, %v6003_v31 }
 0xc8d   : > { %3746 = vrsqrt.f32 %v1959_v41  ;;  %v6027_v46 = vmul.f32 0.03125, %v5641_v37  ;;  %v2116_v20 = vsub.f32 %v2100_v1, %v2108_v21  ;;  %v2102_v19 = vmul.f32 0.03125, %v5679_v11  ;;  %v7145_v21 = vld [vmem:[#allocation38_spill] sm:$0xff] }
 0xc8e   : > { %v3731_v63 = vpop.eup %3730  ;;  %3748 = vrsqrt.f32 %v1960_v28  ;;  %v2121_v45 = vsub.f32 %v7096_v44, %v5958_v48  ;;  %v2122_v55 = vsub.f32 %v7094_v27, %v5962_v39  ;;  %v6037_v47 = vmul.f32 0.03125, %v5721_v8 }
 0xc8f   : > { %v1969_v51 = vmul.f32 %v3731_v63, %v1945_v25  ;;  %3750 = vrsqrt.f32 %v2131_v38  ;;  %v2110_v63 = vmul.f32 %v6015_v2, %v6015_v2  ;;  %v6042_v37 = vmul.f32 0.03125, %v5643_v3  ;;  %v7144_v38 = vld [vmem:[#allocation10_spill] sm:$0xff] }
 0xc90   : > { %v3733_v54 = vpop.eup %3732  ;;  %v2117_v58 = vsub.f32 %v2101_v16, %v2109_v61  ;;  %v2103_v11 = vmul.f32 0.03125, %v5681_v30  ;;  %v6050_v39 = vmul.f32 0.03125, %v5725_v36  ;;  %v2257_v8 = vmul.f32 0.03125, %v5761_v60  ;;  %v7143_v36 = vld [vmem:[#allocation39_spill] sm:$0xff] }
 0xc91   : > { %v3735_v57 = vpop.eup %3734  ;;  %v6010_v53 = vmul.f32 %v3733_v54, %v1946_v9  ;;  %v2123_v54 = vsub.f32 %v7095_v12, %v5978_v5  ;;  %v2111_v25 = vmul.f32 %v6027_v46, %v6027_v46  ;;  %v2132_v3 = vadd.f32 1e-05, %v2116_v20  ;;  %v7142_v9 = vld [vmem:[#allocation31_spill] sm:$0xff] }
 0xc92   : > { %v3737_v10 = vpop.eup %3736  ;;  %v6018_v34 = vmul.f32 %v3735_v57, %v1947_v18  ;;  %v2118_v41 = vsub.f32 %v2102_v19, %v2110_v63  ;;  %v2104_v57 = vmul.f32 0.03125, %v5683_v62  ;;  %v2265_v5 = vmul.f32 %v6037_v47, %v6037_v47 }
 0xc93   : > { %v3739_v13 = vpop.eup %3738  ;;  %v6020_v24 = vmul.f32 %v3737_v10, %v1948_v6  ;;  %v6061_v18 = vmul.f32 0.03125, %v7142_v9  ;;  %v2258_v28 = vmul.f32 0.03125, %v7143_v36  ;;  %v2112_v60 = vmul.f32 %v6042_v37, %v6042_v37 }
 0xc94   : > { %v3741_v35 = vpop.eup %3740  ;;  %v6022_v49 = vmul.f32 %v3739_v13, %v1949_v52  ;;  %v2133_v52 = vadd.f32 1e-05, %v2117_v58  ;;  %v2266_v62 = vmul.f32 %v6050_v39, %v6050_v39  ;;  %v6071_v1 = vmul.f32 0.03125, %v7144_v38  ;;  %v7149_v38 = vld [vmem:[#allocation15_spill] sm:$0xff] }
 0xc95   : > { %v6030_v56 = vmul.f32 %v3741_v35, %v1950_v14  ;;  %v3743_v29 = vpop.eup %3742  ;;  %v2119_v14 = vsub.f32 %v2103_v11, %v2111_v25  ;;  %v2273_v35 = vsub.f32 %v2257_v8, %v2265_v5  ;;  %v2259_v16 = vmul.f32 0.03125, %v7145_v21  ;;  %v7148_v5 = vld [vmem:[#allocation29_spill] sm:$0xff] }
 0xc96   : > { %v3745_v10 = vpop.eup %3744  ;;  %v2145_v6 = vmul.f32 %v3743_v29, %v2121_v45  ;;  %3752 = vrsqrt.f32 %v2132_v3  ;;  %v2134_v19 = vadd.f32 1e-05, %v2118_v41  ;;  %v2120_v45 = vsub.f32 %v2104_v57, %v2112_v60  ;;  %v7147_v29 = vld [vmem:[#allocation17_spill] sm:$0xff] }
 0xc97   : > { %v6066_v13 = vpop.eup %3746  ;;  %v2146_v63 = vmul.f32 %v3745_v10, %v2122_v55  ;;  %v2267_v58 = vmul.f32 %v6061_v18, %v6061_v18  ;;  %v2274_v11 = vsub.f32 %v2258_v28, %v2266_v62  ;;  %v2260_v25 = vmul.f32 0.03125, %v7147_v29  ;;  %v7150_v10 = vld [vmem:[#allocation22_spill] sm:$0xff] }
 0xc98   : > { %v6074_v61 = vpop.eup %3748  ;;  %3754 = vrsqrt.f32 %v2133_v52  ;;  %v2135_v8 = vadd.f32 1e-05, %v2119_v14  ;;  %v6082_v36 = vmul.f32 0.03125, %v7148_v5  ;;  %v6085_v21 = vmul.f32 0.03125, %v7149_v38  ;;  %v7151_v52 = vld [vmem:[#allocation21_spill] sm:$0xff]  ;;  %v7152_v38 = vld [vmem:[#allocation12_spill] sm:$0xff] }
 0xc99   : > { %7146 = vst [vmem:[#allocation5_spill] sm:$0xff] %v6074_v61  ;;  %v3751_v9 = vpop.eup %3750  ;;  %v6088_v3 = vsel %vm258_vm0, %v1969_v51, %v2145_v6  ;;  %v2268_v55 = vmul.f32 %v6071_v1, %v6071_v1  ;;  %v2289_v41 = vadd.f32 1e-05, %v2273_v35  ;;  %v2275_v57 = vsub.f32 %v2259_v16, %v2267_v58  ;;  %v7153_v35 = vld [vmem:[#allocation11_spill] sm:$0xff] }
 0xc9a   : > { %3756 = vrsqrt.f32 %v2134_v19  ;;  %v2136_v28 = vadd.f32 1e-05, %v2120_v45  ;;  %v6093_v60 = vmul.f32 0.03125, %v7150_v10  ;;  %v6096_v14 = vmul.f32 0.03125, %v7151_v52  ;;  %v7154_v45 = vld [vmem:[#allocation16_spill] sm:$0xff]  ;;  %v7155_v10 = vld [vmem:[#allocation23_spill] sm:$0xff] }
 0xc9b   : > { %v2147_v62 = vmul.f32 %v3751_v9, %v2123_v54  ;;  %v2290_v29 = vadd.f32 1e-05, %v2274_v11  ;;  %v2276_v5 = vsub.f32 %v2260_v25, %v2268_v55  ;;  %v2261_v17 = vmul.f32 0.03125, %v7152_v38 }
 0xc9c   : > { %3758 = vrsqrt.f32 %v2135_v8  ;;  %v2269_v51 = vmul.f32 %v6082_v36, %v6082_v36  ;;  %v2270_v6 = vmul.f32 %v6085_v21, %v6085_v21  ;;  %v6104_v16 = vmul.f32 0.03125, %v7153_v35 }
 0xc9d   : > { %3760 = vrsqrt.f32 %v2289_v41  ;;  %v2291_v19 = vadd.f32 1e-05, %v2275_v57  ;;  %v2262_v58 = vmul.f32 0.03125, %v7154_v45  ;;  %v6108_v54 = vmul.f32 0.03125, %v7155_v10  ;;  %v7156_v41 = vld [vmem:[#allocation37_spill] sm:$0xff]  ;;  %v7157_v45 = vld [vmem:[#allocation8_spill] sm:$0xff] }
 0xc9e   : > { %v2425_v9 = vmul.f32 %v6093_v60, %v6093_v60  ;;  %v2426_v8 = vmul.f32 %v6096_v14, %v6096_v14  ;;  %3762 = vrsqrt.f32 %v2290_v29  ;;  %v2292_v38 = vadd.f32 1e-05, %v2276_v5 }
 0xc9f   : > { %v2277_v35 = vsub.f32 %v2261_v17, %v2269_v51  ;;  %v2263_v57 = vmul.f32 0.03125, %v7156_v41  ;;  %3764 = vrsqrt.f32 %v2136_v28  ;;  %v6118_v10 = vmul.f32 0.03125, %v7157_v45  ;;  %v7158_v51 = vld [vmem:[#allocation26_spill] sm:$0xff] }
 0xca0   : > { %v6115_v20 = vpop.eup %3752  ;;  %v2271_v48 = vmul.f32 %v6104_v16, %v6104_v16  ;;  %3766 = vrsqrt.f32 %v2291_v19  ;;  %v2278_v33 = vsub.f32 %v2262_v58, %v2270_v6  ;;  %v2427_v29 = vmul.f32 %v6108_v54, %v6108_v54 }
 0xca1   : > { %3768 = vrsqrt.f32 %v2292_v38  ;;  %v6134_v6 = vsel %vm258_vm0, %v6010_v53, %v2146_v63  ;;  %v6138_v19 = vsel %vm258_vm0, %v6018_v34, %v2147_v62  ;;  %v7160_v38 = vld [vmem:[#allocation28_spill] sm:$0xff]  ;;  %v7161_v63 = vld [vmem:[#allocation25_spill] sm:$0xff]  ;;  %v2441_v61 = vsub.f32 %v7096_v44, %v6093_v60 }
 0xca2   : > { %v6124_v17 = vpop.eup %3754 }
 0xca4   : > { %v6130_v45 = vpop.eup %3756 }
 0xcc0   : > { %v2387_v11 = vpop.xlane.xlu0 %2386  ;;  %v2390_v25 = vpop.xlane.xlu1 %2389 }
 0xcc1   : > { %v2417_v55 = vmul.f32 0.03125, %v2387_v11  ;;  %v2418_v52 = vmul.f32 0.03125, %v2390_v25  ;;  %v6127_v11 = vmul.f32 0.03125, %v7158_v51  ;;  %v2281_v51 = vsub.f32 %v7096_v44, %v6037_v47  ;;  %v7163_v47 = vld [vmem:[#allocation44_spill] sm:$0xff] }
 0xcc3   : > { %v2433_v26 = vsub.f32 %v2417_v55, %v2425_v9  ;;  %v2434_v30 = vsub.f32 %v2418_v52, %v2426_v8  ;;  %v2293_v9 = vadd.f32 1e-05, %v2277_v35  ;;  %v2279_v8 = vsub.f32 %v2263_v57, %v2271_v48  ;;  %v7159_v55 = vld [vmem:[#allocation19_spill] sm:$0xff]  ;;  %v6145_v57 = vpop.eup %3758 }
 0xcc4   : > { %v2393_v5 = vpop.xlane.xlu0 %2392  ;;  %v2264_v52 = vmul.f32 0.03125, %v7159_v55  ;;  %v6143_v48 = vmul.f32 0.03125, %v7160_v38  ;;  %v2428_v53 = vmul.f32 %v6127_v11, %v6127_v11 }
 0xcc5   : > { %v2449_v28 = vadd.f32 1e-05, %v2433_v26  ;;  %v2450_v25 = vadd.f32 1e-05, %v2434_v30  ;;  %v2419_v41 = vmul.f32 0.03125, %v2393_v5  ;;  %v2272_v26 = vmul.f32 %v6118_v10, %v6118_v10 }
 0xcc6   : > { %v2294_v30 = vadd.f32 1e-05, %v2278_v33  ;;  %v6150_v5 = vmul.f32 0.03125, %v7161_v63  ;;  %v2295_v33 = vadd.f32 1e-05, %v2279_v8 }
 0xcc7   : > { %3770 = vrsqrt.f32 %v2449_v28  ;;  %v2435_v58 = vsub.f32 %v2419_v41, %v2427_v29  ;;  %v3761_v29 = vpop.eup %3760  ;;  %v2280_v28 = vsub.f32 %v2264_v52, %v2272_v26  ;;  %v2283_v41 = vsub.f32 %v7095_v12, %v6061_v18 }
 0xcc8   : > { %3772 = vrsqrt.f32 %v2450_v25  ;;  %v2396_v35 = vpop.xlane.xlu0 %2395  ;;  %v2282_v25 = vsub.f32 %v7094_v27, %v6050_v39  ;;  %v3763_v38 = vpop.eup %3762  ;;  %v2430_v39 = vmul.f32 %v6150_v5, %v6150_v5  ;;  %v2305_v40 = vmul.f32 %v3761_v29, %v2281_v51 }
 0xcc9   : > { %v2451_v34 = vadd.f32 1e-05, %v2435_v58  ;;  %v2420_v62 = vmul.f32 0.03125, %v2396_v35  ;;  %3774 = vrsqrt.f32 %v2293_v9  ;;  %v2429_v58 = vmul.f32 %v6143_v48, %v6143_v48  ;;  %v7162_v35 = vld [vmem:[#allocation27_spill] sm:$0xff]  ;;  %v6166_v26 = vpop.eup %3764 }
 0xcca   : > { %v6161_v63 = vmul.f32 0.03125, %v7162_v35  ;;  %v6164_v9 = vmul.f32 0.03125, %v7163_v47  ;;  %v2296_v35 = vadd.f32 1e-05, %v2280_v28  ;;  %v2306_v42 = vmul.f32 %v3763_v38, %v2282_v25 }
 0xccb   : > { %3776 = vrsqrt.f32 %v2451_v34  ;;  %v2436_v55 = vsub.f32 %v2420_v62, %v2428_v53  ;;  %v2284_v62 = vsub.f32 %v7097_v7, %v6071_v1  ;;  %v2481_v44 = vsel %vm960_vm1, %v6088_v3, %v2305_v40 }
 0xccc   : > { %3778 = vrsqrt.f32 %v2294_v30  ;;  %v2399_v8 = vpop.xlane.xlu0 %2398  ;;  %v2402_v52 = vpop.xlane.xlu1 %2401  ;;  %v2432_v1 = vmul.f32 %v6164_v9, %v6164_v9 }
 0xccd   : > { %v2452_v18 = vadd.f32 1e-05, %v2436_v55  ;;  %v2421_v53 = vmul.f32 0.03125, %v2399_v8  ;;  %v2422_v34 = vmul.f32 0.03125, %v2402_v52  ;;  %v3767_v30 = vpop.eup %3766  ;;  %3780 = vrsqrt.f32 %v2295_v33 }
 0xcce   : > { %v3769_v15 = vpop.eup %3768  ;;  %v2442_v55 = vsub.f32 %v7094_v27, %v6096_v14  ;;  %v2431_v8 = vmul.f32 %v6161_v63, %v6161_v63  ;;  %v2307_v60 = vmul.f32 %v3767_v30, %v2283_v41 }
 0xccf   : > { %3782 = vrsqrt.f32 %v2452_v18  ;;  %v2437_v47 = vsub.f32 %v2421_v53, %v2429_v58  ;;  %v2438_v59 = vsub.f32 %v2422_v34, %v2430_v39  ;;  %v2482_v34 = vsel %vm960_vm1, %v6134_v6, %v2306_v42 }
 0xcd0   : > { %v2405_v29 = vpop.xlane.xlu0 %2404  ;;  %v2408_v51 = vpop.xlane.xlu1 %2407  ;;  %3784 = vrsqrt.f32 %v2296_v35 }
 0xcd1   : > { %v3771_v33 = vpop.eup %3770  ;;  %v2453_v28 = vadd.f32 1e-05, %v2437_v47  ;;  %v2454_v25 = vadd.f32 1e-05, %v2438_v59  ;;  %v2423_v38 = vmul.f32 0.03125, %v2405_v29  ;;  %v2424_v58 = vmul.f32 0.03125, %v2408_v51 }
 0xcd2   : > { %v3773_v52 = vpop.eup %3772  ;;  %v2465_v27 = vmul.f32 %v3771_v33, %v2441_v61  ;;  %v2443_v59 = vsub.f32 %v7095_v12, %v6108_v54  ;;  %v6194_v61 = vld [vmem:[%s6832_s2] ss:$0 sm:$0xff]  ;;  %v7164_v54 = vsub.f32 %v7097_v7, %v5994_v0  ;;  %v2483_v33 = vsel %vm960_vm1, %v6138_v19, %v2307_v60 }
 0xcd3   : > { %v2466_v14 = vmul.f32 %v3773_v52, %v2442_v55  ;;  %3786 = vrsqrt.f32 %v2453_v28  ;;  %v2439_v39 = vsub.f32 %v2423_v38, %v2431_v8  ;;  %v2440_v18 = vsub.f32 %v2424_v58, %v2432_v1  ;;  %v3775_v53 = vpop.eup %3774 }
 0xcd4   : > { %v2489_v47 = vsel %vm969_vm2, %v2481_v44, %v2465_v27  ;;  %3788 = vrsqrt.f32 %v2454_v25  ;;  %v6187_v29 = vpop.xlane.xlu0 %2612  ;;  %v6189_v40 = vpop.xlane.xlu1 %2615  ;;  %v2148_v35 = vmul.f32 %v6115_v20, %v7164_v54  ;;  %v7165_v55 = vsub.f32 %v7098_v50, %v6003_v31  ;;  %v6212_v25 = vld [vmem:[%s6833_s3] ss:$0 sm:$0xff] }
 0xcd5   : > { %v3777_v3 = vpop.eup %3776  ;;  %v2497_v41 = vmul.f32 %v6194_v61, %v2489_v47  ;;  %v2490_v42 = vsel %vm969_vm2, %v2482_v34, %v2466_v14  ;;  %v2455_v6 = vadd.f32 1e-05, %v2439_v39  ;;  %v2456_v30 = vadd.f32 1e-05, %v2440_v18 }
 0xcd6   : > { %v3779_v12 = vpop.eup %3778  ;;  %v2149_v8 = vmul.f32 %v6124_v17, %v7165_v55  ;;  %v2498_v1 = vmul.f32 %v6194_v61, %v2490_v42  ;;  %v2467_v51 = vmul.f32 %v3777_v3, %v2443_v59  ;;  %v2308_v28 = vmul.f32 %v3769_v15, %v2284_v62 }
 0xcd7   : > { %v2505_v0 = vadd.f32 %v6212_v25, %v2497_v41  ;;  %3790 = vrsqrt.f32 %v2455_v6  ;;  %v3781_v20 = vpop.eup %3780  ;;  %v2444_v31 = vsub.f32 %v7097_v7, %v6127_v11  ;;  %v7166_v58 = vsub.f32 %v7100_v4, %v5965_v32 }
 0xcd8   : > { %v2506_v17 = vadd.f32 %v6212_v25, %v2498_v1  ;;  %v2491_v38 = vsel %vm969_vm2, %v2483_v33, %v2467_v51  ;;  %3792 = vrsqrt.f32 %v2456_v30  ;;  %v6219_v19 = vpop.xlane.xlu0 %2618  ;;  %v6221_v15 = vpop.xlane.xlu1 %2621  ;;  %v7167_v44 = vsub.f32 %v7099_v23, %v6015_v2  ;;  %v7169_v1 = vld [vmem:[#allocation5_spill] sm:$0xff] }
 0xcd9   : > { %v3783_v62 = vpop.eup %3782  ;;  %v1975_v52 = vmul.f32 %v6066_v13, %v7166_v58  ;;  %v2285_v11 = vsub.f32 %v7098_v50, %v6082_v36  ;;  %3429 = vst [vmem:[%s4801_s9 + $0x10] sm:$0xff] %v2505_v0  ;;  %v2499_v60 = vmul.f32 %v6194_v61, %v2491_v38  ;;  %v2127_v27 = vsub.f32 %v7100_v4, %v6027_v46 }
 0xcda   : > { %v2150_v7 = vmul.f32 %v6130_v45, %v7167_v44  ;;  %v2476_v14 = vsel %vm258_vm0, %v6020_v24, %v2148_v35  ;;  %v2286_v32 = vsub.f32 %v7099_v23, %v6085_v21  ;;  %3430 = vst [vmem:[%s4801_s9 + $0x30] sm:$0xff] %v2506_v17  ;;  %v2468_v13 = vmul.f32 %v3783_v62, %v2444_v31  ;;  %v3785_v18 = vpop.eup %3784 }
 0xcdb   : > { %v2128_v2 = vsub.f32 %v7101_v22, %v6042_v37  ;;  %v2484_v36 = vsel %vm960_vm1, %v2476_v14, %v2308_v28  ;;  %v2309_v45 = vmul.f32 %v3775_v53, %v2285_v11  ;;  %v2507_v39 = vadd.f32 %v6212_v25, %v2499_v60 }
 0xcdc   : > { %v2477_v46 = vsel %vm258_vm0, %v6022_v49, %v2149_v8  ;;  %v2310_v34 = vmul.f32 %v3779_v12, %v2286_v32  ;;  %v2445_v24 = vsub.f32 %v7098_v50, %v6143_v48  ;;  %v2492_v21 = vsel %vm969_vm2, %v2484_v36, %v2468_v13  ;;  %v6251_v59 = vpop.xlane.xlu0 %2624  ;;  %v6253_v47 = vpop.xlane.xlu1 %2627 }
 0xcdd   : > { %v3787_v37 = vpop.eup %3786  ;;  %v2478_v53 = vsel %vm258_vm0, %v6030_v56, %v2150_v7  ;;  %v2287_v3 = vsub.f32 %v7100_v4, %v6104_v16  ;;  %v2446_v49 = vsub.f32 %v7099_v23, %v6150_v5  ;;  %3431 = vst [vmem:[%s4801_s9 + $0x50] sm:$0xff] %v2507_v39  ;;  %v2500_v41 = vmul.f32 %v6194_v61, %v2492_v21 }
 0xcde   : > { %v3789_v50 = vpop.eup %3788  ;;  %v2151_v48 = vmul.f32 %v6145_v57, %v2127_v27  ;;  %v2152_v42 = vmul.f32 %v6166_v26, %v2128_v2  ;;  %v2288_v6 = vsub.f32 %v7101_v22, %v6118_v10  ;;  %v2469_v30 = vmul.f32 %v3787_v37, %v2445_v24 }
 0xcdf   : > { %v2485_v56 = vsel %vm960_vm1, %v2477_v46, %v2309_v45  ;;  %v2311_v12 = vmul.f32 %v3781_v20, %v2287_v3  ;;  %v2508_v16 = vadd.f32 %v6212_v25, %v2500_v41  ;;  %v2470_v54 = vmul.f32 %v3789_v50, %v2446_v49 }
 0xce0   : > { %v2486_v23 = vsel %vm960_vm1, %v2478_v53, %v2310_v34  ;;  %v2312_v5 = vmul.f32 %v3785_v18, %v2288_v6  ;;  %v2447_v35 = vsub.f32 %v7100_v4, %v6161_v63  ;;  %v2493_v57 = vsel %vm969_vm2, %v2485_v56, %v2469_v30  ;;  %v2631_v26 = vpop.xlane.xlu0 %2630  ;;  %v2634_v55 = vpop.xlane.xlu1 %2633 }
 0xce1   : > { %v3791_v8 = vpop.eup %3790  ;;  %v7168_v10 = vsub.f32 %v7101_v22, %v5970_v43  ;;  %v2448_v33 = vsub.f32 %v7101_v22, %v6164_v9  ;;  %3432 = vst [vmem:[%s4801_s9 + $0x70] sm:$0xff] %v2508_v16  ;;  %v2501_v28 = vmul.f32 %v6194_v61, %v2493_v57  ;;  %v2494_v0 = vsel %vm969_vm2, %v2486_v23, %v2470_v54  ;;  %v7170_v16 = vld [vmem:[#allocation42_spill] sm:$0xff] }
 0xce2   : > { %v3793_v4 = vpop.eup %3792  ;;  %v2479_v63 = vsel %vm258_vm0, %v1975_v52, %v2151_v48  ;;  %v2502_v20 = vmul.f32 %v6194_v61, %v2494_v0  ;;  %v2471_v31 = vmul.f32 %v3791_v8, %v2447_v35  ;;  %v2673_v45 = vmul.f32 0.03125, %v2631_v26  ;;  %v7171_v35 = vld [vmem:[#allocation24_spill] sm:$0xff] }
 0xce3   : > { %v1976_v51 = vmul.f32 %v7169_v1, %v7168_v10  ;;  %v2487_v17 = vsel %vm960_vm1, %v2479_v63, %v2311_v12  ;;  %v2509_v38 = vadd.f32 %v6212_v25, %v2501_v28  ;;  %v2472_v22 = vmul.f32 %v3793_v4, %v2448_v33  ;;  %v7172_v4 = vld [vmem:[#allocation20_spill] sm:$0xff]  ;;  %v7173_v63 = vld [vmem:[#allocation14_spill] sm:$0xff] }
 0xce4   : > { %v2510_v62 = vadd.f32 %v6212_v25, %v2502_v20  ;;  %v2495_v58 = vsel %vm969_vm2, %v2487_v17, %v2471_v31  ;;  %v6290_v44 = vpop.xlane.xlu0 %2644  ;;  %v6292_v52 = vpop.xlane.xlu1 %2647  ;;  %v2674_v39 = vmul.f32 0.03125, %v2634_v55  ;;  %v2689_v34 = vmul.f32 %v2673_v45, %v2673_v45  ;;  %v7174_v20 = vld [vmem:[#allocation18_spill] sm:$0xff]  ;;  %v7175_v31 = vld [vmem:[#allocation32_spill] sm:$0xff] }
 0xce5   : > { %v2480_v43 = vsel %vm258_vm0, %v1976_v51, %v2152_v42  ;;  %3433 = vst [vmem:[%s4801_s9 + $0x90] sm:$0xff] %v2509_v38  ;;  %v2503_v7 = vmul.f32 %v6194_v61, %v2495_v58  ;;  %v2705_v54 = vsub.f32 %v7170_v16, %v2673_v45  ;;  %v7177_v17 = vld [vmem:[#allocation36_spill] sm:$0xff]  ;;  %v7178_v38 = vld [vmem:[#allocation33_spill] sm:$0xff] }
 0xce6   : > { %v2488_v9 = vsel %vm960_vm1, %v2480_v43, %v2312_v5  ;;  %3434 = vst [vmem:[%s4801_s9 + $0xb0] sm:$0xff] %v2510_v62  ;;  %v2706_v57 = vsub.f32 %v7171_v35, %v2674_v39  ;;  %v7176_v43 = vld [vmem:[#allocation34_spill] sm:$0xff] }
 0xce7   : > { %v2496_v11 = vsel %vm969_vm2, %v2488_v9, %v2472_v22  ;;  %v2511_v27 = vadd.f32 %v6212_v25, %v2503_v7  ;;  %v7179_v22 = vld [vmem:[#allocation35_spill] sm:$0xff] }
 0xce8   : > { %v2504_v60 = vmul.f32 %v6194_v61, %v2496_v11  ;;  %v6301_v32 = vpop.xlane.xlu0 %2650  ;;  %v6303_v13 = vpop.xlane.xlu1 %2653  ;;  %v2690_v61 = vmul.f32 %v2674_v39, %v2674_v39  ;;  %v7180_v11 = vld [vmem:[#allocation40_spill] sm:$0xff] }
 0xce9   : > { %3435 = vst [vmem:[%s4801_s9 + $0xd0] sm:$0xff] %v2511_v27  ;;  %v7181_v27 = vld [vmem:[#allocation41_spill] sm:$0xff] }
 0xcea   : > { %v2512_v14 = vadd.f32 %v6212_v25, %v2504_v60 }
 0xcec   : > { %3436 = vst [vmem:[%s4801_s9 + $0xf0] sm:$0xff] %v2512_v14  ;;  %v6307_v2 = vpop.xlane.xlu0 %2656  ;;  %v6309_v36 = vpop.xlane.xlu1 %2659 }
 0xcf0   : > { %v2663_v18 = vpop.xlane.xlu0 %2662  ;;  %v2666_v46 = vpop.xlane.xlu1 %2665 }
 0xcf1   : > { %v2681_v24 = vmul.f32 0.03125, %v2663_v18  ;;  %v2682_v21 = vmul.f32 0.03125, %v2666_v46  ;;  %v7182_v18 = vld [vmem:[#allocation13_spill] sm:$0xff] }
 0xcf3   : > { %v2697_v37 = vsub.f32 %v2681_v24, %v2689_v34  ;;  %v2698_v25 = vsub.f32 %v2682_v21, %v2690_v61  ;;  %v7183_v24 = vld [vmem:[#allocation30_spill] sm:$0xff] }
 0xcf4   : > { %v2740_v53 = vpop.permute.xlu0 %2739  ;;  %v2742_v3 = vpop.permute.xlu1 %2741 }
 0xcf5   : > { %v2713_v49 = vadd.f32 1e-05, %v2697_v37  ;;  %v2714_v41 = vadd.f32 1e-05, %v2698_v25  ;;  %v2763_v50 = vsel %vm258_vm0, %v2740_v53, 0.0  ;;  %v2766_v48 = vsel %vm258_vm0, %v2742_v3, 0.0 }
 0xcf6   : > { %2764 = vadd.xlane.f32.xlu0 %v2763_v50  ;;  %2767 = vadd.xlane.f32.xlu1 %v2766_v48  ;;  %v7185_v50 = vld [vmem:[#allocation9_spill] sm:$0xff] }
 0xcf7   : > { %3794 = vrsqrt.f32 %v2713_v49  ;;  %v7184_v49 = vld [vmem:[#allocation43_spill] sm:$0xff] }
 0xcf8   : > { %3796 = vrsqrt.f32 %v2714_v41  ;;  %v2744_v42 = vpop.permute.xlu1 %2743  ;;  %v2748_v30 = vpop.permute.xlu0 %2747 }
 0xcf9   : > { %v2769_v6 = vsel %vm258_vm0, %v2744_v42, 0.0  ;;  %v2775_v26 = vsel %vm258_vm0, %v2748_v30, 0.0 }
 0xcfa   : > { %2770 = vadd.xlane.f32.xlu0 %v2769_v6 }
 0xcfc   : > { %v2746_v56 = vpop.permute.xlu1 %2745  ;;  %v2752_v1 = vpop.permute.xlu0 %2751 }
 0xcfd   : > { %v2772_v12 = vsel %vm258_vm0, %v2746_v56, 0.0  ;;  %v2781_v28 = vsel %vm258_vm0, %v2752_v1, 0.0 }
 0xcfe   : > { %2773 = vadd.xlane.f32.xlu0 %v2772_v12 }
 0xd00   : > { %v2750_v23 = vpop.permute.xlu1 %2749 }
 0xd01   : > { %v3795_v5 = vpop.eup %3794  ;;  %v2778_v55 = vsel %vm258_vm0, %v2750_v23, 0.0 }
 0xd02   : > { %v3797_v8 = vpop.eup %3796  ;;  %v6319_v10 = vmul.f32 %v3795_v5, %v2705_v54  ;;  %2776 = vadd.xlane.f32.xlu0 %v2775_v26  ;;  %2779 = vadd.xlane.f32.xlu1 %v2778_v55 }
 0xd03   : > { %v6321_v51 = vmul.f32 %v3797_v8, %v2706_v57 }
 0xd04   : > { %v2754_v33 = vpop.permute.xlu1 %2753 }
 0xd05   : > { %v2784_v0 = vsel %vm258_vm0, %v2754_v33, 0.0 }
 0xd06   : > { %2782 = vadd.xlane.f32.xlu0 %v2781_v28  ;;  %2785 = vadd.xlane.f32.xlu1 %v2784_v0 }
 0xd17   : > { %2797 = vrot.lane.b32.xlu1 %v7172_v4, %s3944_s12 }
 0xd1b   : > { %2799 = vrot.lane.b32.xlu1 %v7173_v63, %s3944_s12 }
 0xd1c   : > { %2795 = vrot.lane.b32.xlu0 %v7174_v20, %s3944_s12 }
 0xd1f   : > { %2801 = vrot.lane.b32.xlu1 %v7175_v31, %s3944_s12 }
 0xd20   : > { %2803 = vrot.lane.b32.xlu0 %v7176_v43, %s3944_s12 }
 0xd23   : > { %2805 = vrot.lane.b32.xlu1 %v7177_v17, %s3944_s12 }
 0xd24   : > { %2807 = vrot.lane.b32.xlu0 %v7178_v38, %s3944_s12 }
 0xd27   : > { %2809 = vrot.lane.b32.xlu1 %v7179_v22, %s3944_s12 }
 0xd83   : > { %v2765_v9 = vpop.xlane.xlu0 %2764  ;;  %v2768_v62 = vpop.xlane.xlu1 %2767 }
 0xd84   : > { %v6341_v58 = vmul.f32 0.03125, %v2765_v9  ;;  %v6343_v7 = vmul.f32 0.03125, %v2768_v62 }
 0xd86   : > { %v2875_v60 = vsub.f32 %v7180_v11, %v6341_v58  ;;  %v2876_v14 = vsub.f32 %v7181_v27, %v6343_v7 }
 0xd87   : > { %v2771_v45 = vpop.xlane.xlu0 %2770 }
 0xd88   : > { %v6349_v39 = vmul.f32 0.03125, %v2771_v45 }
 0xd8a   : > { %v2877_v46 = vsub.f32 %v7182_v18, %v6349_v39 }
 0xd8b   : > { %v2774_v34 = vpop.xlane.xlu0 %2773 }
 0xd8c   : > { %v6353_v61 = vmul.f32 0.03125, %v2774_v34 }
 0xd8e   : > { %v2878_v21 = vsub.f32 %v7183_v24, %v6353_v61 }
 0xd8f   : > { %v2777_v37 = vpop.xlane.xlu0 %2776  ;;  %v2780_v25 = vpop.xlane.xlu1 %2779 }
 0xd90   : > { %v6357_v53 = vmul.f32 0.03125, %v2777_v37  ;;  %v6359_v3 = vmul.f32 0.03125, %v2780_v25 }
 0xd92   : > { %v2879_v41 = vsub.f32 %v7184_v49, %v6357_v53  ;;  %v2880_v48 = vsub.f32 %v7185_v50, %v6359_v3 }
 0xd93   : > { %v2783_v42 = vpop.xlane.xlu0 %2782  ;;  %v2786_v6 = vpop.xlane.xlu1 %2785 }
 0xd94   : > { %v6365_v30 = vmul.f32 0.03125, %v2783_v42  ;;  %v6367_v56 = vmul.f32 0.03125, %v2786_v6  ;;  %v6398_v42 = vmul.f32 0.03125, %v6187_v29  ;;  %v6401_v6 = vmul.f32 0.03125, %v6189_v40 }
 0xd95   : > { %v2677_v29 = vmul.f32 0.03125, %v6301_v32 }
 0xd96   : > { %v2881_v12 = vsub.f32 %v7170_v16, %v6365_v30  ;;  %v2882_v54 = vsub.f32 %v7171_v35, %v6367_v56 }
 0xd97   : > { %v2796_v23 = vpop.permute.xlu0 %2795  ;;  %v2798_v5 = vpop.permute.xlu1 %2797 }
 0xd98   : > { %v2819_v57 = vsel %vm258_vm0, %v2796_v23, 0.0  ;;  %v2822_v26 = vsel %vm258_vm0, %v2798_v5, 0.0  ;;  %v2675_v23 = vmul.f32 0.03125, %v6290_v44  ;;  %v2676_v5 = vmul.f32 0.03125, %v6292_v52 }
 0xd99   : > { %2820 = vadd.xlane.f32.xlu0 %v2819_v57  ;;  %2823 = vadd.xlane.f32.xlu1 %v2822_v26  ;;  %v2683_v57 = vmul.f32 %v6398_v42, %v6398_v42  ;;  %v2684_v26 = vmul.f32 %v6401_v6, %v6401_v6  ;;  %v6416_v44 = vmul.f32 0.03125, %v6221_v15  ;;  %v6426_v15 = vmul.f32 0.03125, %v6251_v59 }
 0xd9b   : > { %v2800_v55 = vpop.permute.xlu1 %2799  ;;  %v2804_v1 = vpop.permute.xlu0 %2803  ;;  %v2687_v59 = vmul.f32 %v6426_v15, %v6426_v15 }
 0xd9c   : > { %v2825_v8 = vsel %vm258_vm0, %v2800_v55, 0.0  ;;  %v2831_v9 = vsel %vm258_vm0, %v2804_v1, 0.0  ;;  %v6410_v55 = vmul.f32 0.03125, %v6219_v19  ;;  %v2692_v1 = vsub.f32 %v2676_v5, %v2684_v26 }
 0xd9d   : > { %2826 = vadd.xlane.f32.xlu0 %v2825_v8  ;;  %v2691_v8 = vsub.f32 %v2675_v23, %v2683_v57  ;;  %v2859_v19 = vmul.f32 %v6341_v58, %v6341_v58  ;;  %v2679_v26 = vmul.f32 0.03125, %v6307_v2 }
 0xd9e   : > { %v2685_v40 = vmul.f32 %v6410_v55, %v6410_v55 }
 0xd9f   : > { %v2802_v33 = vpop.permute.xlu1 %2801  ;;  %v2808_v45 = vpop.permute.xlu0 %2807  ;;  %v2707_v52 = vadd.f32 1e-05, %v2691_v8 }
 0xda0   : > { %v2828_v28 = vsel %vm258_vm0, %v2802_v33, 0.0  ;;  %v2837_v37 = vsel %vm258_vm0, %v2808_v45, 0.0  ;;  %v2708_v33 = vadd.f32 1e-05, %v2692_v1  ;;  %v2860_v45 = vmul.f32 %v6343_v7, %v6343_v7 }
 0xda1   : > { %2829 = vadd.xlane.f32.xlu0 %v2828_v28  ;;  %v2693_v28 = vsub.f32 %v2677_v29, %v2685_v40  ;;  %3798 = vrsqrt.f32 %v2707_v52  ;;  %v2861_v1 = vmul.f32 %v6349_v39, %v6349_v39 }
 0xda2   : > { %3800 = vrsqrt.f32 %v2708_v33 }
 0xda3   : > { %v2806_v0 = vpop.permute.xlu1 %2805  ;;  %v2709_v5 = vadd.f32 1e-05, %v2693_v28 }
 0xda4   : > { %v2834_v62 = vsel %vm258_vm0, %v2806_v0, 0.0  ;;  %v2678_v0 = vmul.f32 0.03125, %v6303_v13 }
 0xda5   : > { %2832 = vadd.xlane.f32.xlu0 %v2831_v9  ;;  %2835 = vadd.xlane.f32.xlu1 %v2834_v62 }
 0xda7   : > { %v2810_v34 = vpop.permute.xlu1 %2809 }
 0xda8   : > { %v2840_v25 = vsel %vm258_vm0, %v2810_v34, 0.0 }
 0xda9   : > { %2838 = vadd.xlane.f32.xlu0 %v2837_v37  ;;  %2841 = vadd.xlane.f32.xlu1 %v2840_v25  ;;  %v2686_v37 = vmul.f32 %v6416_v44, %v6416_v44  ;;  %v6429_v25 = vmul.f32 0.03125, %v6253_v47  ;;  %v2680_v47 = vmul.f32 0.03125, %v6309_v36 }
 0xdab   : > { %v2694_v57 = vsub.f32 %v2678_v0, %v2686_v37  ;;  %v2688_v33 = vmul.f32 %v6429_v25, %v6429_v25  ;;  %v2695_v0 = vsub.f32 %v2679_v26, %v2687_v59  ;;  %v2863_v37 = vmul.f32 %v6357_v53, %v6357_v53 }
 0xdac   : > { %v2864_v26 = vmul.f32 %v6359_v3, %v6359_v3 }
 0xdad   : > { %v2710_v28 = vadd.f32 1e-05, %v2694_v57  ;;  %v2711_v36 = vadd.f32 1e-05, %v2695_v0  ;;  %v3799_v57 = vpop.eup %3798 }
 0xdba   : > { %2909 = vrot.lane.b32.xlu1 %v7181_v27, %s3945_s13 }
 0xdbe   : > { %2911 = vrot.lane.b32.xlu1 %v7182_v18, %s3945_s13 }
 0xdbf   : > { %2907 = vrot.lane.b32.xlu0 %v7180_v11, %s3945_s13 }
 0xdc2   : > { %2913 = vrot.lane.b32.xlu1 %v7183_v24, %s3945_s13 }
 0xdc3   : > { %2915 = vrot.lane.b32.xlu0 %v7184_v49, %s3945_s13 }
 0xdc6   : > { %2917 = vrot.lane.b32.xlu1 %v7185_v50, %s3945_s13 }
 0xdc7   : > { %2919 = vrot.lane.b32.xlu0 %v7170_v16, %s3945_s13 }
 0xdca   : > { %2921 = vrot.lane.b32.xlu1 %v7171_v35, %s3945_s13 }
 0xe26   : > { %v2821_v9 = vpop.xlane.xlu0 %2820  ;;  %v2824_v62 = vpop.xlane.xlu1 %2823 }
 0xe27   : > { %v2851_v32 = vmul.f32 0.03125, %v2821_v9  ;;  %v2852_v34 = vmul.f32 0.03125, %v2824_v62  ;;  %v2862_v62 = vmul.f32 %v6353_v61, %v6353_v61 }
 0xe29   : > { %v2867_v13 = vsub.f32 %v2851_v32, %v2859_v19  ;;  %v2868_v23 = vsub.f32 %v2852_v34, %v2860_v45  ;;  %v2696_v32 = vsub.f32 %v2680_v47, %v2688_v33  ;;  %v2865_v33 = vmul.f32 %v6365_v30, %v6365_v30 }
 0xe2a   : > { %v2827_v8 = vpop.xlane.xlu0 %2826 }
 0xe2b   : > { %v2883_v29 = vadd.f32 1e-05, %v2867_v13  ;;  %v2884_v40 = vadd.f32 1e-05, %v2868_v23  ;;  %v2853_v9 = vmul.f32 0.03125, %v2827_v8 }
 0xe2d   : > { %3802 = vrsqrt.f32 %v2883_v29  ;;  %v2869_v52 = vsub.f32 %v2853_v9, %v2861_v1  ;;  %v3801_v29 = vpop.eup %3800  ;;  %v2699_v9 = vsub.f32 %v7180_v11, %v6398_v42 }
 0xe2e   : > { %3804 = vrsqrt.f32 %v2884_v40  ;;  %v2830_v2 = vpop.xlane.xlu0 %2829  ;;  %v2712_v40 = vadd.f32 1e-05, %v2696_v32 }
 0xe2f   : > { %3806 = vrsqrt.f32 %v2709_v5  ;;  %v2885_v19 = vadd.f32 1e-05, %v2869_v52  ;;  %v2854_v45 = vmul.f32 0.03125, %v2830_v2  ;;  %v2700_v52 = vsub.f32 %v7181_v27, %v6401_v6 }
 0xe31   : > { %3808 = vrsqrt.f32 %v2885_v19  ;;  %v2870_v34 = vsub.f32 %v2854_v45, %v2862_v62 }
 0xe32   : > { %3810 = vrsqrt.f32 %v2710_v28  ;;  %v2833_v13 = vpop.xlane.xlu0 %2832  ;;  %v2836_v23 = vpop.xlane.xlu1 %2835  ;;  %v2866_v28 = vmul.f32 %v6367_v56, %v6367_v56 }
 0xe33   : > { %v2886_v5 = vadd.f32 1e-05, %v2870_v34  ;;  %v2855_v8 = vmul.f32 0.03125, %v2833_v13  ;;  %v2856_v1 = vmul.f32 0.03125, %v2836_v23  ;;  %v2724_v13 = vmul.f32 %v3801_v29, %v2700_v52 }
 0xe34   : > { %v2702_v52 = vsub.f32 %v7183_v24, %v6416_v44 }
 0xe35   : > { %3812 = vrsqrt.f32 %v2886_v5  ;;  %v2871_v59 = vsub.f32 %v2855_v8, %v2863_v37  ;;  %v2872_v47 = vsub.f32 %v2856_v1, %v2864_v26  ;;  %v2723_v37 = vmul.f32 %v3799_v57, %v2699_v9 }
 0xe36   : > { %3814 = vrsqrt.f32 %v2711_v36  ;;  %v2839_v0 = vpop.xlane.xlu0 %2838  ;;  %v2842_v2 = vpop.xlane.xlu1 %2841  ;;  %v2701_v8 = vsub.f32 %v7182_v18, %v6410_v55 }
 0xe37   : > { %v3803_v62 = vpop.eup %3802  ;;  %v2887_v19 = vadd.f32 1e-05, %v2871_v59  ;;  %v2888_v45 = vadd.f32 1e-05, %v2872_v47  ;;  %v2857_v32 = vmul.f32 0.03125, %v2839_v0  ;;  %v2858_v42 = vmul.f32 0.03125, %v2842_v2 }
 0xe38   : > { %v3805_v34 = vpop.eup %3804  ;;  %3816 = vrsqrt.f32 %v2712_v40  ;;  %v2899_v6 = vmul.f32 %v3803_v62, %v2875_v60 }
 0xe39   : > { %v3807_v36 = vpop.eup %3806  ;;  %v2900_v23 = vmul.f32 %v3805_v34, %v2876_v14  ;;  %3818 = vrsqrt.f32 %v2887_v19  ;;  %v2873_v26 = vsub.f32 %v2857_v32, %v2865_v33  ;;  %v2874_v5 = vsub.f32 %v2858_v42, %v2866_v28 }
 0xe3a   : > { %v6462_v1 = vsel %vm258_vm0, %v2723_v37, %v2899_v6  ;;  %3820 = vrsqrt.f32 %v2888_v45  ;;  %v2908_v57 = vpop.permute.xlu0 %2907  ;;  %v2910_v29 = vpop.permute.xlu1 %2909  ;;  %v2725_v59 = vmul.f32 %v3807_v36, %v2701_v8  ;;  %v2703_v45 = vsub.f32 %v7184_v49, %v6426_v15 }
 0xe3b   : > { %v3809_v40 = vpop.eup %3808  ;;  %v6465_v58 = vsel %vm258_vm0, %v2724_v13, %v2900_v23  ;;  %v2889_v60 = vadd.f32 1e-05, %v2873_v26  ;;  %v2890_v9 = vadd.f32 1e-05, %v2874_v5  ;;  %v2931_v7 = vsel %vm258_vm0, %v2908_v57, 0.0 }
 0xe3c   : > { %v3811_v14 = vpop.eup %3810  ;;  %v2901_v55 = vmul.f32 %v3809_v40, %v2877_v46  ;;  %v2934_v47 = vsel %vm258_vm0, %v2910_v29, 0.0  ;;  %2932 = vadd.xlane.f32.xlu0 %v2931_v7  ;;  %v2704_v37 = vsub.f32 %v7185_v50, %v6429_v25 }
 0xe3d   : > { %3822 = vrsqrt.f32 %v2889_v60  ;;  %2935 = vadd.xlane.f32.xlu1 %v2934_v47  ;;  %v2726_v19 = vmul.f32 %v3811_v14, %v2702_v52 }
 0xe3e   : > { %v6475_v33 = vsel %vm258_vm0, %v2725_v59, %v2901_v55  ;;  %3824 = vrsqrt.f32 %v2890_v9  ;;  %v2912_v28 = vpop.permute.xlu1 %2911  ;;  %v2916_v32 = vpop.permute.xlu0 %2915 }
 0xe3f   : > { %v3813_v0 = vpop.eup %3812  ;;  %v2937_v2 = vsel %vm258_vm0, %v2912_v28, 0.0  ;;  %v2943_v8 = vsel %vm258_vm0, %v2916_v32, 0.0 }
 0xe40   : > { %v3815_v62 = vpop.eup %3814  ;;  %v2902_v39 = vmul.f32 %v3813_v0, %v2878_v21  ;;  %2938 = vadd.xlane.f32.xlu0 %v2937_v2 }
 0xe41   : > { %v2727_v36 = vmul.f32 %v3815_v62, %v2703_v45 }
 0xe42   : > { %v3817_v46 = vpop.eup %3816  ;;  %v6484_v44 = vsel %vm258_vm0, %v2726_v19, %v2902_v39  ;;  %v2914_v42 = vpop.permute.xlu1 %2913 }
 0xe43   : > { %v3819_v34 = vpop.eup %3818  ;;  %v2940_v13 = vsel %vm258_vm0, %v2914_v42, 0.0  ;;  %v2728_v21 = vmul.f32 %v3817_v46, %v2704_v37  ;;  %v2920_v29 = vpop.permute.xlu0 %2919 }
 0xe44   : > { %v3821_v6 = vpop.eup %3820  ;;  %v2903_v61 = vmul.f32 %v3819_v34, %v2879_v41  ;;  %2941 = vadd.xlane.f32.xlu0 %v2940_v13  ;;  %v2949_v9 = vsel %vm258_vm0, %v2920_v29, 0.0 }
 0xe45   : > { %v2904_v15 = vmul.f32 %v3821_v6, %v2880_v48 }
 0xe46   : > { %v6496_v23 = vsel %vm258_vm0, %v2727_v36, %v2903_v61  ;;  %v2918_v26 = vpop.permute.xlu1 %2917 }
 0xe47   : > { %v3823_v5 = vpop.eup %3822  ;;  %v6499_v25 = vsel %vm258_vm0, %v2728_v21, %v2904_v15  ;;  %v2946_v57 = vsel %vm258_vm0, %v2918_v26, 0.0 }
 0xe48   : > { %v3825_v53 = vpop.eup %3824  ;;  %v2905_v41 = vmul.f32 %v3823_v5, %v2881_v12  ;;  %2944 = vadd.xlane.f32.xlu0 %v2943_v8  ;;  %2947 = vadd.xlane.f32.xlu1 %v2946_v57 }
 0xe49   : > { %v2906_v3 = vmul.f32 %v3825_v53, %v2882_v54 }
 0xe4a   : > { %v6511_v48 = vsel %vm258_vm0, %v6319_v10, %v2905_v41  ;;  %v2922_v40 = vpop.permute.xlu1 %2921 }
 0xe4b   : > { %v6515_v60 = vsel %vm258_vm0, %v6321_v51, %v2906_v3  ;;  %v2952_v30 = vsel %vm258_vm0, %v2922_v40, 0.0 }
 0xe4c   : > { %2950 = vadd.xlane.f32.xlu0 %v2949_v9  ;;  %2953 = vadd.xlane.f32.xlu1 %v2952_v30 }
 0xe5d   : > { %3067 = vrot.lane.b32.xlu1 %v7180_v11, %s3946_s14 }
 0xe61   : > { %3069 = vrot.lane.b32.xlu1 %v7181_v27, %s3946_s14 }
 0xe62   : > { %2955 = vrot.lane.b32.xlu0 %v7174_v20, %s3945_s13 }
 0xe65   : > { %3071 = vrot.lane.b32.xlu1 %v7182_v18, %s3946_s14 }
 0xe66   : > { %3073 = vrot.lane.b32.xlu0 %v7183_v24, %s3946_s14 }
 0xe69   : > { %3075 = vrot.lane.b32.xlu1 %v7184_v49, %s3946_s14 }
 0xe6a   : > { %3077 = vrot.lane.b32.xlu0 %v7185_v50, %s3946_s14 }
 0xe6d   : > { %3079 = vrot.lane.b32.xlu1 %v7170_v16, %s3946_s14 }
 0xe6e   : > { %3081 = vrot.lane.b32.xlu0 %v7171_v35, %s3946_s14 }
 0xe71   : > { %2957 = vrot.lane.b32.xlu1 %v7172_v4, %s3945_s13 }
 0xe72   : > { %2959 = vrot.lane.b32.xlu0 %v7173_v63, %s3945_s13 }
 0xe75   : > { %2961 = vrot.lane.b32.xlu1 %v7175_v31, %s3945_s13 }
 0xe76   : > { %2963 = vrot.lane.b32.xlu0 %v7176_v43, %s3945_s13 }
 0xe79   : > { %2965 = vrot.lane.b32.xlu1 %v7177_v17, %s3945_s13 }
 0xe7a   : > { %2967 = vrot.lane.b32.xlu0 %v7178_v38, %s3945_s13 }
 0xe7d   : > { %2969 = vrot.lane.b32.xlu1 %v7179_v22, %s3945_s13 }
 0xe7e   : > { %3115 = vrot.lane.b32.xlu0 %v7174_v20, %s3946_s14 }
 0xe81   : > { %3117 = vrot.lane.b32.xlu1 %v7172_v4, %s3946_s14 }
 0xe82   : > { %3119 = vrot.lane.b32.xlu0 %v7173_v63, %s3946_s14 }
 0xe85   : > { %3121 = vrot.lane.b32.xlu1 %v7175_v31, %s3946_s14 }
 0xe86   : > { %3123 = vrot.lane.b32.xlu0 %v7176_v43, %s3946_s14 }
 0xe89   : > { %3125 = vrot.lane.b32.xlu1 %v7177_v17, %s3946_s14 }
 0xe8a   : > { %3127 = vrot.lane.b32.xlu0 %v7178_v38, %s3946_s14 }
 0xe8d   : > { %3129 = vrot.lane.b32.xlu1 %v7179_v22, %s3946_s14 }
 0xec9   : > { %v2933_v10 = vpop.xlane.xlu0 %2932 }
 0xeca   : > { %v6567_v51 = vmul.f32 0.03125, %v2933_v10  ;;  %v2936_v4 = vpop.xlane.xlu1 %2935 }
 0xecb   : > { %v6569_v63 = vmul.f32 0.03125, %v2936_v4 }
 0xecc   : > { %v3035_v20 = vsub.f32 %v7180_v11, %v6567_v51 }
 0xecd   : > { %v3036_v31 = vsub.f32 %v7181_v27, %v6569_v63  ;;  %v2939_v43 = vpop.xlane.xlu0 %2938 }
 0xece   : > { %v6575_v17 = vmul.f32 0.03125, %v2939_v43 }
 0xed0   : > { %v3037_v38 = vsub.f32 %v7182_v18, %v6575_v17 }
 0xed1   : > { %v2942_v56 = vpop.xlane.xlu0 %2941 }
 0xed2   : > { %v6579_v22 = vmul.f32 0.03125, %v2942_v56 }
 0xed4   : > { %v3038_v12 = vsub.f32 %v7183_v24, %v6579_v22 }
 0xed5   : > { %v2945_v54 = vpop.xlane.xlu0 %2944  ;;  %v2948_v7 = vpop.xlane.xlu1 %2947 }
 0xed6   : > { %v6583_v14 = vmul.f32 0.03125, %v2945_v54  ;;  %v6585_v59 = vmul.f32 0.03125, %v2948_v7 }
 0xed8   : > { %v3039_v55 = vsub.f32 %v7184_v49, %v6583_v14  ;;  %v3040_v47 = vsub.f32 %v7185_v50, %v6585_v59 }
 0xed9   : > { %v2951_v52 = vpop.xlane.xlu0 %2950  ;;  %v2954_v28 = vpop.xlane.xlu1 %2953 }
 0xeda   : > { %v6591_v0 = vmul.f32 0.03125, %v2951_v52  ;;  %v6593_v2 = vmul.f32 0.03125, %v2954_v28 }
 0xedc   : > { %v3041_v62 = vsub.f32 %v7170_v16, %v6591_v0  ;;  %v3042_v19 = vsub.f32 %v7171_v35, %v6593_v2 }
 0xedd   : > { %v2956_v39 = vpop.permute.xlu0 %2955  ;;  %v3068_v46 = vpop.permute.xlu1 %3067 }
 0xede   : > { %v2979_v45 = vsel %vm258_vm0, %v2956_v39, 0.0  ;;  %v3091_v32 = vsel %vm258_vm0, %v3068_v46, 0.0 }
 0xedf   : > { %2980 = vadd.xlane.f32.xlu0 %v2979_v45  ;;  %3092 = vadd.xlane.f32.xlu1 %v3091_v32 }
 0xee1   : > { %v3074_v42 = vpop.permute.xlu0 %3073  ;;  %v3070_v34 = vpop.permute.xlu1 %3069 }
 0xee2   : > { %v3094_v37 = vsel %vm258_vm0, %v3070_v34, 0.0  ;;  %v3100_v15 = vsel %vm258_vm0, %v3074_v42, 0.0 }
 0xee3   : > { %3095 = vadd.xlane.f32.xlu0 %v3094_v37 }
 0xee5   : > { %v3078_v13 = vpop.permute.xlu0 %3077  ;;  %v3072_v6 = vpop.permute.xlu1 %3071 }
 0xee6   : > { %v3097_v36 = vsel %vm258_vm0, %v3072_v6, 0.0  ;;  %v3106_v57 = vsel %vm258_vm0, %v3078_v13, 0.0 }
 0xee7   : > { %3098 = vadd.xlane.f32.xlu0 %v3097_v36 }
 0xee9   : > { %v3082_v61 = vpop.permute.xlu0 %3081  ;;  %v3076_v21 = vpop.permute.xlu1 %3075 }
 0xeea   : > { %v3103_v26 = vsel %vm258_vm0, %v3076_v21, 0.0  ;;  %v3112_v3 = vsel %vm258_vm0, %v3082_v61, 0.0 }
 0xeeb   : > { %3101 = vadd.xlane.f32.xlu0 %v3100_v15  ;;  %3104 = vadd.xlane.f32.xlu1 %v3103_v26 }
 0xeed   : > { %v2960_v5 = vpop.permute.xlu0 %2959  ;;  %v3080_v8 = vpop.permute.xlu1 %3079 }
 0xeee   : > { %v3109_v53 = vsel %vm258_vm0, %v3080_v8, 0.0  ;;  %v2985_v10 = vsel %vm258_vm0, %v2960_v5, 0.0 }
 0xeef   : > { %3107 = vadd.xlane.f32.xlu0 %v3106_v57  ;;  %3110 = vadd.xlane.f32.xlu1 %v3109_v53  ;;  %v3019_v53 = vmul.f32 %v6567_v51, %v6567_v51  ;;  %v3022_v51 = vmul.f32 %v6579_v22, %v6579_v22 }
 0xef1   : > { %v2964_v41 = vpop.permute.xlu0 %2963  ;;  %v2958_v29 = vpop.permute.xlu1 %2957 }
 0xef2   : > { %v2982_v40 = vsel %vm258_vm0, %v2958_v29, 0.0  ;;  %v2991_v54 = vsel %vm258_vm0, %v2964_v41, 0.0 }
 0xef3   : > { %3113 = vadd.xlane.f32.xlu0 %v3112_v3  ;;  %2983 = vadd.xlane.f32.xlu1 %v2982_v40 }
 0xef5   : > { %v2968_v9 = vpop.permute.xlu0 %2967  ;;  %v2962_v30 = vpop.permute.xlu1 %2961 }
 0xef6   : > { %v2988_v4 = vsel %vm258_vm0, %v2962_v30, 0.0  ;;  %v2997_v28 = vsel %vm258_vm0, %v2968_v9, 0.0 }
 0xef7   : > { %2986 = vadd.xlane.f32.xlu0 %v2985_v10  ;;  %2989 = vadd.xlane.f32.xlu1 %v2988_v4 }
 0xef9   : > { %v3116_v43 = vpop.permute.xlu0 %3115  ;;  %v2966_v56 = vpop.permute.xlu1 %2965 }
 0xefa   : > { %v2994_v7 = vsel %vm258_vm0, %v2966_v56, 0.0  ;;  %v3139_v32 = vsel %vm258_vm0, %v3116_v43, 0.0 }
 0xefb   : > { %2992 = vadd.xlane.f32.xlu0 %v2991_v54  ;;  %2995 = vadd.xlane.f32.xlu1 %v2994_v7 }
 0xefd   : > { %v2970_v52 = vpop.permute.xlu1 %2969  ;;  %v3120_v46 = vpop.permute.xlu0 %3119 }
 0xefe   : > { %v3000_v39 = vsel %vm258_vm0, %v2970_v52, 0.0  ;;  %v3145_v13 = vsel %vm258_vm0, %v3120_v46, 0.0  ;;  %v3020_v46 = vmul.f32 %v6569_v63, %v6569_v63 }
 0xeff   : > { %2998 = vadd.xlane.f32.xlu0 %v2997_v28  ;;  %3001 = vadd.xlane.f32.xlu1 %v3000_v39 }
 0xf01   : > { %v3118_v45 = vpop.permute.xlu1 %3117  ;;  %v3124_v34 = vpop.permute.xlu0 %3123 }
 0xf02   : > { %v3142_v42 = vsel %vm258_vm0, %v3118_v45, 0.0  ;;  %v3151_v61 = vsel %vm258_vm0, %v3124_v34, 0.0 }
 0xf03   : > { %3140 = vadd.xlane.f32.xlu0 %v3139_v32  ;;  %3143 = vadd.xlane.f32.xlu1 %v3142_v42  ;;  %v3021_v42 = vmul.f32 %v6575_v17, %v6575_v17 }
 0xf05   : > { %v3122_v37 = vpop.permute.xlu1 %3121  ;;  %v3128_v15 = vpop.permute.xlu0 %3127 }
 0xf06   : > { %v3148_v6 = vsel %vm258_vm0, %v3122_v37, 0.0  ;;  %v3157_v5 = vsel %vm258_vm0, %v3128_v15, 0.0 }
 0xf07   : > { %3146 = vadd.xlane.f32.xlu0 %v3145_v13  ;;  %3149 = vadd.xlane.f32.xlu1 %v3148_v6 }
 0xf09   : > { %v3126_v36 = vpop.permute.xlu1 %3125 }
 0xf0a   : > { %v3154_v21 = vsel %vm258_vm0, %v3126_v36, 0.0 }
 0xf0b   : > { %3152 = vadd.xlane.f32.xlu0 %v3151_v61  ;;  %3155 = vadd.xlane.f32.xlu1 %v3154_v21  ;;  %v3023_v61 = vmul.f32 %v6583_v14, %v6583_v14  ;;  %v3024_v21 = vmul.f32 %v6585_v59, %v6585_v59 }
 0xf0d   : > { %v3130_v26 = vpop.permute.xlu1 %3129 }
 0xf0e   : > { %v3160_v8 = vsel %vm258_vm0, %v3130_v26, 0.0 }
 0xf0f   : > { %3158 = vadd.xlane.f32.xlu0 %v3157_v5  ;;  %3161 = vadd.xlane.f32.xlu1 %v3160_v8 }
 0xf6c   : > { %v2981_v57 = vpop.xlane.xlu0 %2980  ;;  %v3093_v9 = vpop.xlane.xlu1 %3092 }
 0xf6d   : > { %v3011_v41 = vmul.f32 0.03125, %v2981_v57 }
 0xf6f   : > { %v3027_v29 = vsub.f32 %v3011_v41, %v3019_v53  ;;  %v3025_v41 = vmul.f32 %v6591_v0, %v6591_v0 }
 0xf70   : > { %v3096_v3 = vpop.xlane.xlu0 %3095 }
 0xf71   : > { %v3043_v40 = vadd.f32 1e-05, %v3027_v29 }
 0xf73   : > { %3826 = vrsqrt.f32 %v3043_v40 }
 0xf74   : > { %v3099_v30 = vpop.xlane.xlu0 %3098 }
 0xf78   : > { %v3102_v10 = vpop.xlane.xlu0 %3101  ;;  %v6625_v4 = vpop.xlane.xlu1 %3104 }
 0xf7c   : > { %v6627_v43 = vpop.xlane.xlu0 %3107  ;;  %v6629_v56 = vpop.xlane.xlu1 %3110 }
 0xf7d   : > { %v3827_v54 = vpop.eup %3826 }
 0xf7e   : > { %v3059_v7 = vmul.f32 %v3827_v54, %v3035_v20  ;;  %v3026_v54 = vmul.f32 %v6593_v2, %v6593_v2 }
 0xf80   : > { %v6636_v52 = vsel %vm960_vm1, %v6462_v1, %v3059_v7  ;;  %v6638_v28 = vpop.xlane.xlu0 %3113  ;;  %v2984_v39 = vpop.xlane.xlu1 %2983  ;;  %v6654_v7 = vmul.f32 0.03125, %v3093_v9 }
 0xf81   : > { %v3012_v45 = vmul.f32 0.03125, %v2984_v39  ;;  %v6656_v39 = vmul.f32 0.03125, %v3096_v3  ;;  %v6664_v3 = vmul.f32 0.03125, %v3102_v10 }
 0xf83   : > { %v3028_v32 = vsub.f32 %v3012_v45, %v3020_v46  ;;  %v3180_v9 = vmul.f32 %v6656_v39, %v6656_v39  ;;  %v3182_v10 = vmul.f32 %v6664_v3, %v6664_v3  ;;  %v3196_v0 = vsub.f32 %v7181_v27, %v6656_v39 }
 0xf84   : > { %v2987_v34 = vpop.xlane.xlu0 %2986  ;;  %v2990_v37 = vpop.xlane.xlu1 %2989  ;;  %v3198_v27 = vsub.f32 %v7183_v24, %v6664_v3 }
 0xf85   : > { %v3044_v20 = vadd.f32 1e-05, %v3028_v32  ;;  %v3013_v13 = vmul.f32 0.03125, %v2987_v34  ;;  %v3014_v1 = vmul.f32 0.03125, %v2990_v37 }
 0xf87   : > { %3828 = vrsqrt.f32 %v3044_v20  ;;  %v3029_v6 = vsub.f32 %v3013_v13, %v3021_v42  ;;  %v3030_v36 = vsub.f32 %v3014_v1, %v3022_v51  ;;  %v6658_v51 = vmul.f32 0.03125, %v3099_v30 }
 0xf88   : > { %v2993_v15 = vpop.xlane.xlu0 %2992  ;;  %v2996_v26 = vpop.xlane.xlu1 %2995  ;;  %v3179_v1 = vmul.f32 %v6654_v7, %v6654_v7 }
 0xf89   : > { %v3045_v5 = vadd.f32 1e-05, %v3029_v6  ;;  %v3046_v8 = vadd.f32 1e-05, %v3030_v36  ;;  %v3015_v57 = vmul.f32 0.03125, %v2993_v15  ;;  %v3016_v53 = vmul.f32 0.03125, %v2996_v26 }
 0xf8b   : > { %3830 = vrsqrt.f32 %v3045_v5  ;;  %v3031_v29 = vsub.f32 %v3015_v57, %v3023_v61  ;;  %v3032_v40 = vsub.f32 %v3016_v53, %v3024_v21 }
 0xf8c   : > { %3832 = vrsqrt.f32 %v3046_v8  ;;  %v2999_v46 = vpop.xlane.xlu0 %2998  ;;  %v3002_v45 = vpop.xlane.xlu1 %3001  ;;  %v3181_v8 = vmul.f32 %v6658_v51, %v6658_v51 }
 0xf8d   : > { %v3047_v32 = vadd.f32 1e-05, %v3031_v29  ;;  %v3048_v42 = vadd.f32 1e-05, %v3032_v40  ;;  %v3017_v34 = vmul.f32 0.03125, %v2999_v46  ;;  %v3018_v37 = vmul.f32 0.03125, %v3002_v45 }
 0xf8f   : > { %3834 = vrsqrt.f32 %v3047_v32  ;;  %v3033_v20 = vsub.f32 %v3017_v34, %v3025_v41  ;;  %v3034_v13 = vsub.f32 %v3018_v37, %v3026_v54  ;;  %v6674_v41 = vmul.f32 0.03125, %v6625_v4 }
 0xf90   : > { %3836 = vrsqrt.f32 %v3048_v42  ;;  %v3141_v6 = vpop.xlane.xlu0 %3140  ;;  %v3144_v36 = vpop.xlane.xlu1 %3143  ;;  %v6681_v34 = vmul.f32 0.03125, %v6627_v43  ;;  %v6684_v37 = vmul.f32 0.03125, %v6629_v56  ;;  %v6695_v43 = vmul.f32 0.03125, %v6638_v28 }
 0xf91   : > { %v3829_v61 = vpop.eup %3828  ;;  %v3049_v21 = vadd.f32 1e-05, %v3033_v20  ;;  %v3050_v15 = vadd.f32 1e-05, %v3034_v13  ;;  %v3171_v26 = vmul.f32 0.03125, %v3141_v6  ;;  %v3172_v30 = vmul.f32 0.03125, %v3144_v36 }
 0xf92   : > { %v3060_v5 = vmul.f32 %v3829_v61, %v3036_v31  ;;  %v3184_v28 = vmul.f32 %v6681_v34, %v6681_v34  ;;  %v3199_v24 = vsub.f32 %v7184_v49, %v6674_v41 }
 0xf93   : > { %3838 = vrsqrt.f32 %v3049_v21  ;;  %v3187_v57 = vsub.f32 %v3171_v26, %v3179_v1  ;;  %v3188_v53 = vsub.f32 %v3172_v30, %v3180_v9  ;;  %v3183_v1 = vmul.f32 %v6674_v41, %v6674_v41 }
 0xf94   : > { %v6678_v29 = vsel %vm960_vm1, %v6465_v58, %v3060_v5  ;;  %3840 = vrsqrt.f32 %v3050_v15  ;;  %v3147_v40 = vpop.xlane.xlu0 %3146  ;;  %v3150_v63 = vpop.xlane.xlu1 %3149  ;;  %v3185_v15 = vmul.f32 %v6684_v37, %v6684_v37  ;;  %v3186_v30 = vmul.f32 %v6695_v43, %v6695_v43 }
 0xf95   : > { %v3831_v31 = vpop.eup %3830  ;;  %v3203_v54 = vadd.f32 1e-05, %v3187_v57  ;;  %v3204_v46 = vadd.f32 1e-05, %v3188_v53  ;;  %v3173_v45 = vmul.f32 0.03125, %v3147_v40  ;;  %v3174_v32 = vmul.f32 0.03125, %v3150_v63 }
 0xf96   : > { %v3833_v42 = vpop.eup %3832  ;;  %v3061_v58 = vmul.f32 %v3831_v31, %v3037_v38 }
 0xf97   : > { %v3062_v4 = vmul.f32 %v3833_v42, %v3038_v12  ;;  %3842 = vrsqrt.f32 %v3203_v54  ;;  %v3189_v20 = vsub.f32 %v3173_v45, %v3181_v8  ;;  %v3190_v13 = vsub.f32 %v3174_v32, %v3182_v10 }
 0xf98   : > { %v6699_v56 = vsel %vm960_vm1, %v6475_v33, %v3061_v58  ;;  %3844 = vrsqrt.f32 %v3204_v46  ;;  %v3153_v17 = vpop.xlane.xlu0 %3152  ;;  %v3156_v38 = vpop.xlane.xlu1 %3155  ;;  %v3195_v45 = vsub.f32 %v7180_v11, %v6654_v7  ;;  %v3197_v11 = vsub.f32 %v7182_v18, %v6658_v51 }
 0xf99   : > { %v3835_v9 = vpop.eup %3834  ;;  %v6703_v22 = vsel %vm960_vm1, %v6484_v44, %v3062_v4  ;;  %v3205_v12 = vadd.f32 1e-05, %v3189_v20  ;;  %v3206_v6 = vadd.f32 1e-05, %v3190_v13  ;;  %v3175_v36 = vmul.f32 0.03125, %v3153_v17 }
 0xf9a   : > { %v3837_v61 = vpop.eup %3836  ;;  %v3063_v33 = vmul.f32 %v3835_v9, %v3039_v55  ;;  %v3176_v21 = vmul.f32 0.03125, %v3156_v38 }
 0xf9b   : > { %v3064_v44 = vmul.f32 %v3837_v61, %v3040_v47  ;;  %3846 = vrsqrt.f32 %v3205_v12  ;;  %v3191_v26 = vsub.f32 %v3175_v36, %v3183_v1 }
 0xf9c   : > { %v3239_v5 = vsel %vm960_vm1, %v6496_v23, %v3063_v33  ;;  %3848 = vrsqrt.f32 %v3206_v6  ;;  %v3192_v8 = vsub.f32 %v3176_v21, %v3184_v28  ;;  %v3159_v14 = vpop.xlane.xlu0 %3158  ;;  %v3162_v55 = vpop.xlane.xlu1 %3161 }
 0xf9d   : > { %v3839_v57 = vpop.eup %3838  ;;  %v3240_v53 = vsel %vm960_vm1, %v6499_v25, %v3064_v44  ;;  %v3207_v10 = vadd.f32 1e-05, %v3191_v26  ;;  %v3177_v40 = vmul.f32 0.03125, %v3159_v14  ;;  %v3178_v59 = vmul.f32 0.03125, %v3162_v55 }
 0xf9e   : > { %v3841_v47 = vpop.eup %3840  ;;  %v3065_v63 = vmul.f32 %v3839_v57, %v3041_v62  ;;  %v3208_v31 = vadd.f32 1e-05, %v3192_v8 }
 0xf9f   : > { %v3066_v23 = vmul.f32 %v3841_v47, %v3042_v19  ;;  %3850 = vrsqrt.f32 %v3207_v10  ;;  %v3193_v54 = vsub.f32 %v3177_v40, %v3185_v15  ;;  %v3194_v46 = vsub.f32 %v3178_v59, %v3186_v30 }
 0xfa0   : > { %v3241_v25 = vsel %vm960_vm1, %v6511_v48, %v3065_v63  ;;  %3852 = vrsqrt.f32 %v3208_v31 }
 0xfa1   : > { %v3843_v32 = vpop.eup %3842  ;;  %v3242_v62 = vsel %vm960_vm1, %v6515_v60, %v3066_v23  ;;  %v3209_v42 = vadd.f32 1e-05, %v3193_v54  ;;  %v3210_v2 = vadd.f32 1e-05, %v3194_v46  ;;  %v3862_v60 = vld [vmem:[%s6832_s2] ss:$0 sm:$0xff] }
 0xfa2   : > { %v3845_v19 = vpop.eup %3844  ;;  %v3219_v58 = vmul.f32 %v3843_v32, %v3195_v45 }
 0xfa3   : > { %v3220_v4 = vmul.f32 %v3845_v19, %v3196_v0  ;;  %3854 = vrsqrt.f32 %v3209_v42 }
 0xfa4   : > { %v3243_v48 = vsel %vm969_vm2, %v6636_v52, %v3219_v58  ;;  %3856 = vrsqrt.f32 %v3210_v2  ;;  %v3863_v52 = vld [vmem:[%s6833_s3] ss:$0 sm:$0xff] }
 0xfa5   : > { %v3847_v7 = vpop.eup %3846  ;;  %v3251_v39 = vmul.f32 %v3862_v60, %v3243_v48  ;;  %v3244_v20 = vsel %vm969_vm2, %v6678_v29, %v3220_v4  ;;  %v3200_v29 = vsub.f32 %v7185_v50, %v6681_v34 }
 0xfa6   : > { %v3849_v13 = vpop.eup %3848  ;;  %v3252_v18 = vmul.f32 %v3862_v60, %v3244_v20  ;;  %v3221_v51 = vmul.f32 %v3847_v7, %v3197_v11 }
 0xfa7   : > { %v3259_v1 = vadd.f32 %v3863_v52, %v3251_v39  ;;  %v3222_v17 = vmul.f32 %v3849_v13, %v3198_v27 }
 0xfa8   : > { %v3260_v3 = vadd.f32 %v3863_v52, %v3252_v18  ;;  %v3245_v38 = vsel %vm969_vm2, %v6699_v56, %v3221_v51  ;;  %v3201_v56 = vsub.f32 %v7170_v16, %v6684_v37 }
 0xfa9   : > { %v3851_v9 = vpop.eup %3850  ;;  %3447 = vst [vmem:[%s4801_s9 + $0x18] sm:$0xff] %v3259_v1  ;;  %v3253_v12 = vmul.f32 %v3862_v60, %v3245_v38  ;;  %v3246_v6 = vsel %vm969_vm2, %v6703_v22, %v3222_v17  ;;  %v3202_v22 = vsub.f32 %v7171_v35, %v6695_v43 }
 0xfaa   : > { %v3853_v36 = vpop.eup %3852  ;;  %3448 = vst [vmem:[%s4801_s9 + $0x38] sm:$0xff] %v3260_v3  ;;  %v3254_v61 = vmul.f32 %v3862_v60, %v3246_v6  ;;  %v3223_v28 = vmul.f32 %v3851_v9, %v3199_v24 }
 0xfab   : > { %v3261_v49 = vadd.f32 %v3863_v52, %v3253_v12  ;;  %v3224_v41 = vmul.f32 %v3853_v36, %v3200_v29 }
 0xfac   : > { %v3262_v33 = vadd.f32 %v3863_v52, %v3254_v61  ;;  %v3247_v50 = vsel %vm969_vm2, %v3239_v5, %v3223_v28 }
 0xfad   : > { %v3855_v34 = vpop.eup %3854  ;;  %3449 = vst [vmem:[%s4801_s9 + $0x58] sm:$0xff] %v3261_v49  ;;  %v3255_v21 = vmul.f32 %v3862_v60, %v3247_v50  ;;  %v3248_v15 = vsel %vm969_vm2, %v3240_v53, %v3224_v41 }
 0xfae   : > { %v3857_v44 = vpop.eup %3856  ;;  %3450 = vst [vmem:[%s4801_s9 + $0x78] sm:$0xff] %v3262_v33  ;;  %v3256_v26 = vmul.f32 %v3862_v60, %v3248_v15  ;;  %v3225_v30 = vmul.f32 %v3855_v34, %v3201_v56 }
 0xfaf   : > { %v3263_v16 = vadd.f32 %v3863_v52, %v3255_v21  ;;  %v3226_v37 = vmul.f32 %v3857_v44, %v3202_v22 }
 0xfb0   : > { %v3264_v5 = vadd.f32 %v3863_v52, %v3256_v26  ;;  %v3249_v8 = vsel %vm969_vm2, %v3241_v25, %v3225_v30 }
 0xfb1   : > { %3451 = vst [vmem:[%s4801_s9 + $0x98] sm:$0xff] %v3263_v16  ;;  %v3257_v35 = vmul.f32 %v3862_v60, %v3249_v8  ;;  %v3250_v43 = vsel %vm969_vm2, %v3242_v62, %v3226_v37 }
 0xfb2   : > { %3452 = vst [vmem:[%s4801_s9 + $0xb8] sm:$0xff] %v3264_v5  ;;  %v3258_v14 = vmul.f32 %v3862_v60, %v3250_v43 }
 0xfb3   : > { %v3265_v55 = vadd.f32 %v3863_v52, %v3257_v35 }
 0xfb4   : > { %v3266_v57 = vadd.f32 %v3863_v52, %v3258_v14 }
 0xfb5   : > { %3453 = vst [vmem:[%s4801_s9 + $0xd8] sm:$0xff] %v3265_v55 }
 0xfb6   : > { %3454 = vst [vmem:[%s4801_s9 + $0xf8] sm:$0xff] %v3266_v57 }
 0xfb7   : > { %3877 = shalt.err (!%p3874_p5)
}
 0xfb8   : > { %s3878_s29 = scalar_lea.hbm %s6776_s8, 4096  ;;  %s3882_s12 = scalar_lea.hbm %s6834_s4, 8192 }
 0xfb9   : > { %p3879_p6 = scmp.ne.s32.totalorder %s6776_s8, %s3878_s29  ;;  %p3883_p10 = scmp.lt.u32.totalorder %s6776_s8, %s6834_s4 }
 0xfba   : > { %p3884_p11 = scmp.lt.u32.totalorder %s3882_s12, %s3878_s29  ;;  %p3886_p13 = scmp.lt.u32.totalorder %s3878_s29, %s6776_s8 }
 0xfbb   : > { %p3880_p7 = pnand %p3879_p6, %p4015_p4 }
 0xfbc   : > { %p3885_p12 = por %p3884_p11, %p3883_p10 }
 0xfbd   : > { %p3881_p9 = pneg %p3880_p7 }
 0xfbe   : > { %p3887_p0 = por %p3886_p13, %p3885_p12 }
 0xfc0   : > { %p3888_p1 = pnand %p3887_p0, %p3881_p9 }
 0xfc2   : > { %3891 = shalt.err (!%p3888_p1)
}
 0xfc3   : > { %s3948_s26 = smov 128   ;;  %s3949_s30 = smov 8  }
 0xfc4   : > { %3534 = dma.vmem_to_hbm [thread:$0]  (%p4015_p4), %s6778_s5, 4096, %s6776_s8, %s6784_s18, %s3948_s26, %s3948_s26, %s3949_s30  }
 0xfc5 PF: > { %p3540_p2 = scmp.ge.s32.totalorder %s3942_s20, 2  ;;  %s3314_s6 = sand.u32 1, %s3922_s15  }
 0xfc6   : > { %s3315_s7 = scalar_lea.sflag [#allocation3], %s3314_s6 }
 0xfc7   : > { %p3537_p3 = pnand %p3540_p2, %p4022_p8 }
 0xfc9   : > { %3917 = dma.done.wait (!%p3537_p3), %s3315_s7, 4096  }
 0xfca   : > { %3919 = vsyncadd (!%p3537_p3), %s3315_s7, 4294963200  ;;  %s17_s20 = sadd.s32 1, %s3942_s20   ;;  %s7186_s15 = smov %s3926_s16 }
 0xfcb   : > { %p14_p5 = scmp.ge.s32.totalorder %s17_s20, 4   ;;  %s7187_s16 = smov %s3930_s17 }
 0xfcc   : > { %s7188_s17 = smov %s4028_s28  ;;  %s7189_s18 = smov %s3938_s19 }
 0xfcd   : > { %s7190_s19 = smov %s7192_s23  ;;  %16 = sbr.rel (!%p14_p5) target bundleno = 4 (0x4), region = 105 }
 0xfd4   :  { %3320 = vsyncpa [#allocation3], 1 }
 0xfd5   :  { %3322 = vsyncpa [#allocation3 + $0x1], 1 }

</bundles_post_ra>
